<compile_context>
chip_gen: v5e
topology: v5e:2x2
jax: 0.10.0
libtpu: 0.0.40
codegen_flags: <defaults>
</compile_context>

<pallas_src>
import functools

import jax
import jax.numpy as jnp
from jax.experimental import pallas as pl
from jax.experimental.pallas import tpu as pltpu


_VMEM_LIMIT_BYTES = 48 * 1024 * 1024      # safe on v7x (64 MiB/TC) and v5e/v6e
_RESIDENT_SLAB_BYTES = 24 * 1024 * 1024   # max size of a VMEM-resident slab
_FUSE_THRESHOLD = 2048                    # n_pad up to which the single fused
                                          # kernel is used (A bf16 <= 8 MiB)


def _round_up(x, m):
    return ((x + m - 1) // m) * m


def _pad_weights(params, h_pad, c_pad):
    """Pad hidden/output dims to lane-dense multiples of 128.

    Padded weight/bias columns are exactly zero, so padding stays inert
    through ReLU and the final slice.  Weights are cast to bf16 (MXU feed);
    biases stay f32 (epilogue math is f32).
    """
    w1, b1, w2, b2, w3, b3 = params
    h = w1.shape[1]
    c = w3.shape[1]
    w1_p = jnp.pad(w1, ((0, 0), (0, h_pad - h))).astype(jnp.bfloat16)
    b1_p = jnp.pad(jnp.reshape(b1, (1, -1)).astype(jnp.float32),
                   ((0, 0), (0, h_pad - h)))
    w2_p = jnp.pad(w2, ((0, h_pad - h), (0, h_pad - h))).astype(jnp.bfloat16)
    b2_p = jnp.pad(jnp.reshape(b2, (1, -1)).astype(jnp.float32),
                   ((0, 0), (0, h_pad - h)))
    w3_p = jnp.pad(w3, ((0, h_pad - h), (0, c_pad - c))).astype(jnp.bfloat16)
    b3_p = jnp.pad(jnp.reshape(b3, (1, -1)).astype(jnp.float32),
                   ((0, 0), (0, c_pad - c)))
    return w1_p, b1_p, w2_p, b2_p, w3_p, b3_p


# ---------------------------------------------------------------------------
# Path A: small graphs -> one fully fused, fully VMEM-resident kernel
# ---------------------------------------------------------------------------
def _gcn_fused_kernel(x_ref, a_ref, w1_ref, b1_ref, w2_ref, b2_ref,
                      w3_ref, b3_ref, o_ref):
    a = a_ref[...]                                               # [N, N] bf16
    xw1 = jnp.dot(x_ref[...], w1_ref[...],
                  preferred_element_type=jnp.float32)            # [N, H] f32
    h1 = jnp.maximum(
        jnp.dot(a, xw1.astype(jnp.bfloat16),
                preferred_element_type=jnp.float32) + b1_ref[...], 0.0)
    hw2 = jnp.dot(h1.astype(jnp.bfloat16), w2_ref[...],
                  preferred_element_type=jnp.float32)
    h2 = jnp.maximum(
        jnp.dot(a, hw2.astype(jnp.bfloat16),
                preferred_element_type=jnp.float32) + b2_ref[...], 0.0)
    # dropout(p=0.5, training=False) -> identity
    out = jnp.dot(h2.astype(jnp.bfloat16), w3_ref[...],
                  preferred_element_type=jnp.float32) + b3_ref[...]
    o_ref[...] = out.astype(o_ref.dtype)


def _gcn_forward_fused(x, adjacency, params):
    w1, _, _, _, w3, _ = params
    n, _ = x.shape
    n_pad = _round_up(n, 128)
    h_pad = _round_up(w1.shape[1], 128)
    c_pad = _round_up(w3.shape[1], 128)

    x_p = jnp.pad(x.astype(jnp.float32),
                  ((0, n_pad - n), (0, 0))).astype(jnp.bfloat16)
    a_p = jnp.pad(adjacency.astype(jnp.float32),
                  ((0, n_pad - n), (0, n_pad - n))).astype(jnp.bfloat16)
    w1_p, b1_p, w2_p, b2_p, w3_p, b3_p = _pad_weights(params, h_pad, c_pad)

    out_pad = pl.pallas_call(
        _gcn_fused_kernel,
        out_shape=jax.ShapeDtypeStruct((n_pad, c_pad), jnp.float32),
        compiler_params=pltpu.CompilerParams(
            vmem_limit_bytes=_VMEM_LIMIT_BYTES),
    )(x_p, a_p, w1_p, b1_p, w2_p, b2_p, w3_p, b3_p)
    return out_pad[:n, :w3.shape[1]]


# ---------------------------------------------------------------------------
# Path B: larger graphs -> two tiled launches, one per GCN layer
#   Layer 1 kernel:  acc += A[i,k] @ (X[k] @ W1)         (W1 resident)
#                    epilogue: relu(acc + b1) @ W2 -> bf16 slab   (W2 resident)
#   Layer 2 kernel:  acc += A[i,k] @ S[k]                (slab resident)
#                    epilogue: relu(acc + b2) @ W3 + b3 -> f32 (lane-dense 128)
# ---------------------------------------------------------------------------
def _gcn_layer1_kernel(a_ref, x_ref, w1_ref, b1_ref, w2_ref, o_ref, acc_ref,
                       *, tk, x_resident):
    k = pl.program_id(1)

    @pl.when(k == 0)
    def _():
        acc_ref[...] = jnp.zeros_like(acc_ref)

    if x_resident:
        x_blk = x_ref[pl.ds(pl.multiple_of(k * tk, tk), tk), :]
    else:
        x_blk = x_ref[...]
    # on-the-fly feature transform for this contraction block (W1 resident)
    xw = jnp.dot(x_blk, w1_ref[...], preferred_element_type=jnp.float32)
    acc_ref[...] += jnp.dot(a_ref[...], xw.astype(jnp.bfloat16),
                            preferred_element_type=jnp.float32)

    @pl.when(k == pl.num_programs(1) - 1)
    def _():
        h1 = jnp.maximum(acc_ref[...] + b1_ref[...], 0.0)
        hw2 = jnp.dot(h1.astype(jnp.bfloat16), w2_ref[...],
                      preferred_element_type=jnp.float32)
        o_ref[...] = hw2.astype(o_ref.dtype)          # bf16 slab for layer 2


def _gcn_layer2_kernel(a_ref, s_ref, b2_ref, w3_ref, b3_ref, o_ref, acc_ref,
                       *, tk, slab_resident):
    k = pl.program_id(1)

    @pl.when(k == 0)
    def _():
        acc_ref[...] = jnp.zeros_like(acc_ref)

    if slab_resident:
        s_blk = s_ref[pl.ds(pl.multiple_of(k * tk, tk), tk), :]
    else:
        s_blk = s_ref[...]
    acc_ref[...] += jnp.dot(a_ref[...], s_blk,
                            preferred_element_type=jnp.float32)

    @pl.when(k == pl.num_programs(1) - 1)
    def _():
        h2 = jnp.maximum(acc_ref[...] + b2_ref[...], 0.0)
        # dropout(p=0.5, training=False) -> identity
        out = jnp.dot(h2.astype(jnp.bfloat16), w3_ref[...],
                      preferred_element_type=jnp.float32) + b3_ref[...]
        o_ref[...] = out.astype(o_ref.dtype)


def _pick_tiles(n, tm_req, tk_req):
    """Row tile tm and contraction tile tk for the aggregation grid.

    * rows/cols padded to a multiple of tm only (no lcm blow-up of A),
    * tk = largest multiple of tm that divides n_pad and is <= tk_req,
    * tm capped at n_pad/2 so the 'parallel' row axis has >= 2 tiles
      (keeps both v7x TensorCores busy).
    """
    n128 = _round_up(n, 128)
    tm = max(128, min(tm_req, n128 // 2 if n128 >= 256 else n128))
    n_pad = _round_up(n, tm)
    tk = tm
    j = 2
    while tm * j <= tk_req:
        if n_pad % (tm * j) == 0:
            tk = tm * j
        j += 1
    return tm, tk, n_pad


def _gcn_forward_tiled(x, adjacency, params, *, tm_req=512, tk_req=1024):
    w1, _, _, _, w3, _ = params
    n, d = x.shape
    h_pad = _round_up(w1.shape[1], 128)
    c_pad = _round_up(w3.shape[1], 128)
    tm, tk, n_pad = _pick_tiles(n, tm_req, tk_req)

    x_p = jnp.pad(x.astype(jnp.float32),
                  ((0, n_pad - n), (0, 0))).astype(jnp.bfloat16)
    a_p = jnp.pad(adjacency.astype(jnp.float32),
                  ((0, n_pad - n), (0, n_pad - n))).astype(jnp.bfloat16)
    w1_p, b1_p, w2_p, b2_p, w3_p, b3_p = _pad_weights(params, h_pad, c_pad)

    x_resident = n_pad * d * 2 <= _RESIDENT_SLAB_BYTES
    slab_resident = n_pad * h_pad * 2 <= _RESIDENT_SLAB_BYTES
    grid = (n_pad // tm, n_pad // tk)

    compiler_params = pltpu.CompilerParams(
        dimension_semantics=("parallel", "arbitrary"),
        vmem_limit_bytes=_VMEM_LIMIT_BYTES)

    # ---- layer 1: relu(A @ (X @ W1) + b1) @ W2  -> bf16 slab --------------
    x_spec = (pl.BlockSpec((n_pad, d), lambda i, k: (0, 0)) if x_resident
              else pl.BlockSpec((tk, d), lambda i, k: (k, 0)))
    hw2 = pl.pallas_call(
        functools.partial(_gcn_layer1_kernel, tk=tk, x_resident=x_resident),
        out_shape=jax.ShapeDtypeStruct((n_pad, h_pad), jnp.bfloat16),
        grid=grid,
        in_specs=[
            pl.BlockSpec((tm, tk), lambda i, k: (i, k)),          # A
            x_spec,                                               # X
            pl.BlockSpec((d, h_pad), lambda i, k: (0, 0)),        # W1
            pl.BlockSpec((1, h_pad), lambda i, k: (0, 0)),        # b1
            pl.BlockSpec((h_pad, h_pad), lambda i, k: (0, 0)),    # W2
        ],
        out_specs=pl.BlockSpec((tm, h_pad), lambda i, k: (i, 0)),
        scratch_shapes=[pltpu.VMEM((tm, h_pad), jnp.float32)],
        compiler_params=compiler_params,
    )(a_p, x_p, w1_p, b1_p, w2_p)

    # ---- layer 2 + head: relu(A @ slab + b2) @ W3 + b3 ---------------------
    slab_spec = (pl.BlockSpec((n_pad, h_pad), lambda i, k: (0, 0))
                 if slab_resident
                 else pl.BlockSpec((tk, h_pad), lambda i, k: (k, 0)))
    out_pad = pl.pallas_call(
        functools.partial(_gcn_layer2_kernel, tk=tk,
                          slab_resident=slab_resident),
        out_shape=jax.ShapeDtypeStruct((n_pad, c_pad), jnp.float32),
        grid=grid,
        in_specs=[
            pl.BlockSpec((tm, tk), lambda i, k: (i, k)),          # A
            slab_spec,                                            # H1 @ W2
            pl.BlockSpec((1, h_pad), lambda i, k: (0, 0)),        # b2
            pl.BlockSpec((h_pad, c_pad), lambda i, k: (0, 0)),    # W3
            pl.BlockSpec((1, c_pad), lambda i, k: (0, 0)),        # b3
        ],
        out_specs=pl.BlockSpec((tm, c_pad), lambda i, k: (i, 0)),
        scratch_shapes=[pltpu.VMEM((tm, h_pad), jnp.float32)],
        compiler_params=compiler_params,
    )(a_p, hw2, b2_p, w3_p, b3_p)

    return out_pad[:n, :w3.shape[1]]


# ---------------------------------------------------------------------------
# Full GCN forward
# ---------------------------------------------------------------------------
def gcn_forward(x, adjacency, params, *, mode="auto", tm=512, tk=1024):
    """x: [N, D] float32, adjacency: [N, N] float32 (normalized, dense)."""
    n = x.shape[0]
    if mode == "fused" or (mode == "auto"
                           and _round_up(n, 128) <= _FUSE_THRESHOLD):
        return _gcn_forward_fused(x, adjacency, params)
    return _gcn_forward_tiled(x, adjacency, params, tm_req=tm, tk_req=tk)


def init_params(key, dim_nodes, hidden_channels=128, n_classes=2):
    """Deterministic glorot-ish init matching the module's parameter shapes."""
    k1, k2, k3, k4, k5, k6 = jax.random.split(key, 6)

    def glorot(k, shape):
        fan_in, fan_out = shape
        scale = jnp.sqrt(6.0 / (fan_in + fan_out))
        return jax.random.uniform(k, shape, jnp.float32, -scale, scale)

    w1 = glorot(k1, (dim_nodes, hidden_channels))
    b1 = 0.1 * jax.random.normal(k4, (1, hidden_channels), jnp.float32)
    w2 = glorot(k2, (hidden_channels, hidden_channels))
    b2 = 0.1 * jax.random.normal(k5, (1, hidden_channels), jnp.float32)
    w3 = glorot(k3, (hidden_channels, n_classes))
    b3 = 0.1 * jax.random.normal(k6, (1, n_classes), jnp.float32)
    return (w1, b1, w2, b2, w3, b3)


def _ref_forward(x, adjacency, params):
    w1, b1, w2, b2, w3, b3 = params
    h1 = jnp.maximum(adjacency @ (x @ w1) + b1, 0.0)
    h2 = jnp.maximum(adjacency @ (h1 @ w2) + b2, 0.0)
    return h2 @ w3 + b3


def _make_adjacency(key, n):
    """Symmetrically-normalized adjacency with self loops: D^-1/2 (A+I) D^-1/2."""
    a_raw = (jax.random.uniform(key, (n, n)) > 0.98).astype(jnp.float32)
    a_sym = jnp.maximum(a_raw, a_raw.T) + jnp.eye(n, dtype=jnp.float32)
    deg = jnp.sum(a_sym, axis=1)
    d_inv_sqrt = 1.0 / jnp.sqrt(deg)
    return a_sym * d_inv_sqrt[:, None] * d_inv_sqrt[None, :]


if __name__ == "__main__":
    key = jax.random.PRNGKey(0)
    k_x1, k_a1, k_x2, k_a2, k_p = jax.random.split(key, 5)

    dim_nodes, hidden, n_classes = 16, 128, 2
    params = init_params(k_p, dim_nodes, hidden, n_classes)

    # --- small graph: single fully-fused VMEM-resident kernel ---------------
    n1 = 512
    x1 = jax.random.normal(k_x1, (n1, dim_nodes), jnp.float32)
    a1 = _make_adjacency(k_a1, n1)
    fused_fn = jax.jit(gcn_forward)
    out1 = jax.block_until_ready(fused_fn(x1, a1, params))
    ref1 = _ref_forward(x1, a1, params)
    assert out1.shape == (n1, n_classes)
    # tolerance accounts for bf16 streaming of A and the XW/H slabs
    assert jnp.allclose(out1, ref1, atol=2e-2, rtol=2e-2), \
        float(jnp.max(jnp.abs(out1 - ref1)))

    # --- ragged graph, forced tiled two-kernel path (exercises padding) -----
    n2 = 384
    x2 = jax.random.normal(k_x2, (n2, dim_nodes), jnp.float32)
    a2 = _make_adjacency(k_a2, n2)
    tiled_fn = jax.jit(functools.partial(gcn_forward, mode="tiled"))
    out2 = jax.block_until_ready(tiled_fn(x2, a2, params))
    ref2 = _ref_forward(x2, a2, params)
    assert out2.shape == (n2, n_classes)
    assert jnp.allclose(out2, ref2, atol=2e-2, rtol=2e-2), \
        float(jnp.max(jnp.abs(out2 - ref2)))

    print("KERNEL_OK")
</pallas_src>

<mosaic_0001>
module attributes {stable_mosaic.version = 11 : i64} {
  func.func @_gcn_fused_kernel(%arg0: memref<512x16xbf16, #tpu.memory_space<vmem>>, %arg1: memref<512x512xbf16, #tpu.memory_space<vmem>>, %arg2: memref<16x128xbf16, #tpu.memory_space<vmem>>, %arg3: memref<1x128xf32, #tpu.memory_space<vmem>>, %arg4: memref<128x128xbf16, #tpu.memory_space<vmem>>, %arg5: memref<1x128xf32, #tpu.memory_space<vmem>>, %arg6: memref<128x128xbf16, #tpu.memory_space<vmem>>, %arg7: memref<1x128xf32, #tpu.memory_space<vmem>>, %arg8: memref<512x128xf32, #tpu.memory_space<vmem>>) attributes {dimension_semantics = [], scalar_prefetch = 0 : i64, scratch_operands = 0 : i64, tpu.core_type = #tpu.core_type<tc>} {
    %c0 = arith.constant 0 : index
    %c0_0 = arith.constant 0 : index
    %0 = vector.load %arg1[%c0, %c0_0] : memref<512x512xbf16, #tpu.memory_space<vmem>>, vector<512x512xbf16>
    %c0_1 = arith.constant 0 : index
    %c0_2 = arith.constant 0 : index
    %1 = vector.load %arg0[%c0_1, %c0_2] : memref<512x16xbf16, #tpu.memory_space<vmem>>, vector<512x16xbf16>
    %c0_3 = arith.constant 0 : index
    %c0_4 = arith.constant 0 : index
    %2 = vector.load %arg2[%c0_3, %c0_4] : memref<16x128xbf16, #tpu.memory_space<vmem>>, vector<16x128xbf16>
    %cst = arith.constant dense<0.000000e+00> : vector<512x128xf32>
    %3 = tpu.matmul %1, %2, %cst {dimension_numbers = #tpu.dot_dimension_numbers<[1], [0], [0], [1], [0, 0, 1, 1], [], []>} : vector<512x16xbf16>, vector<16x128xbf16>, vector<512x128xf32> -> vector<512x128xf32>
    %4 = arith.truncf %3 : vector<512x128xf32> to vector<512x128xbf16>
    %cst_5 = arith.constant dense<0.000000e+00> : vector<512x128xf32>
    %5 = tpu.matmul %0, %4, %cst_5 {dimension_numbers = #tpu.dot_dimension_numbers<[1], [0], [0], [1], [0, 0, 1, 1], [], []>} : vector<512x512xbf16>, vector<512x128xbf16>, vector<512x128xf32> -> vector<512x128xf32>
    %c0_6 = arith.constant 0 : index
    %c0_7 = arith.constant 0 : index
    %6 = vector.load %arg3[%c0_6, %c0_7] : memref<1x128xf32, #tpu.memory_space<vmem>>, vector<1x128xf32>
    %7 = vector.broadcast %6 : vector<1x128xf32> to vector<512x128xf32>
    %8 = arith.addf %5, %7 : vector<512x128xf32>
    %cst_8 = arith.constant 0.000000e+00 : f32
    %9 = vector.broadcast %cst_8 : f32 to vector<512x128xf32>
    %10 = arith.maximumf %8, %9 : vector<512x128xf32>
    %11 = arith.truncf %10 : vector<512x128xf32> to vector<512x128xbf16>
    %c0_9 = arith.constant 0 : index
    %c0_10 = arith.constant 0 : index
    %12 = vector.load %arg4[%c0_9, %c0_10] : memref<128x128xbf16, #tpu.memory_space<vmem>>, vector<128x128xbf16>
    %cst_11 = arith.constant dense<0.000000e+00> : vector<512x128xf32>
    %13 = tpu.matmul %11, %12, %cst_11 {dimension_numbers = #tpu.dot_dimension_numbers<[1], [0], [0], [1], [0, 0, 1, 1], [], []>} : vector<512x128xbf16>, vector<128x128xbf16>, vector<512x128xf32> -> vector<512x128xf32>
    %14 = arith.truncf %13 : vector<512x128xf32> to vector<512x128xbf16>
    %cst_12 = arith.constant dense<0.000000e+00> : vector<512x128xf32>
    %15 = tpu.matmul %0, %14, %cst_12 {dimension_numbers = #tpu.dot_dimension_numbers<[1], [0], [0], [1], [0, 0, 1, 1], [], []>} : vector<512x512xbf16>, vector<512x128xbf16>, vector<512x128xf32> -> vector<512x128xf32>
    %c0_13 = arith.constant 0 : index
    %c0_14 = arith.constant 0 : index
    %16 = vector.load %arg5[%c0_13, %c0_14] : memref<1x128xf32, #tpu.memory_space<vmem>>, vector<1x128xf32>
    %17 = vector.broadcast %16 : vector<1x128xf32> to vector<512x128xf32>
    %18 = arith.addf %15, %17 : vector<512x128xf32>
    %cst_15 = arith.constant 0.000000e+00 : f32
    %19 = vector.broadcast %cst_15 : f32 to vector<512x128xf32>
    %20 = arith.maximumf %18, %19 : vector<512x128xf32>
    %21 = arith.truncf %20 : vector<512x128xf32> to vector<512x128xbf16>
    %c0_16 = arith.constant 0 : index
    %c0_17 = arith.constant 0 : index
    %22 = vector.load %arg6[%c0_16, %c0_17] : memref<128x128xbf16, #tpu.memory_space<vmem>>, vector<128x128xbf16>
    %cst_18 = arith.constant dense<0.000000e+00> : vector<512x128xf32>
    %23 = tpu.matmul %21, %22, %cst_18 {dimension_numbers = #tpu.dot_dimension_numbers<[1], [0], [0], [1], [0, 0, 1, 1], [], []>} : vector<512x128xbf16>, vector<128x128xbf16>, vector<512x128xf32> -> vector<512x128xf32>
    %c0_19 = arith.constant 0 : index
    %c0_20 = arith.constant 0 : index
    %24 = vector.load %arg7[%c0_19, %c0_20] : memref<1x128xf32, #tpu.memory_space<vmem>>, vector<1x128xf32>
    %25 = vector.broadcast %24 : vector<1x128xf32> to vector<512x128xf32>
    %26 = arith.addf %23, %25 : vector<512x128xf32>
    %c0_21 = arith.constant 0 : index
    %c0_22 = arith.constant 0 : index
    %27 = vector.load %arg8[%c0_21, %c0_22] : memref<512x128xf32, #tpu.memory_space<vmem>>, vector<512x128xf32>
    tpu.vector_store %arg8[%c0_21, %c0_22], %26 {strides = array<i32>} : memref<512x128xf32, #tpu.memory_space<vmem>>, vector<512x128xf32>,
    return
  }
}

</mosaic_0001>

<bundles_post_ra>
// kernel: gcn_forward.1
= control target key start
LH: loop header
LB: loop body
LE: loop exit
PB: predicated region body
PF: predicated region fallthrough
CT: control target
= control target key end

     0   :  { %vm390_vm0 = vcmask 130048   ;;  %s7329_s2 = inlined_call_operand.vmem [shape: bf16[16,128], index: 2, kind: input, shape index: {}]   ;;  %s7330_s0 = inlined_call_operand.vmem [shape: bf16[512,16], index: 0, kind: input, shape index: {}]   ;;  %s7331_s1 = inlined_call_operand.vmem [shape: bf16[512,512], index: 1, kind: input, shape index: {}]   ;;  %s7332_s3 = inlined_call_operand.vmem [shape: f32[1,128], index: 3, kind: input, shape index: {}]   ;;  %s7333_s4 = inlined_call_operand.vmem [shape: bf16[128,128], index: 4, kind: input, shape index: {}]   ;;  %s7334_s5 = inlined_call_operand.vmem [shape: f32[1,128], index: 5, kind: input, shape index: {}]   ;;  %s7335_s6 = inlined_call_operand.vmem [shape: bf16[128,128], index: 6, kind: input, shape index: {}]   ;;  %s7336_s7 = inlined_call_operand.vmem [shape: f32[1,128], index: 7, kind: input, shape index: {}]   ;;  %s7337_s8 = inlined_call_operand.vmem [shape: f32[512,128], index: 8, kind: output, shape index: {}]  }
   0x1   :  { %v4350_v0 = vld [vmem:[%s7329_s2] sm:$0xff]  ;;  %v4343_v2 = vld [vmem:[%s7330_s0 + $0xc8] sm:$0xff]  ;;  %v4344_v4 = vld [vmem:[%s7330_s0 + $0xd0] sm:$0xff] }
   0x2   :  { %v4318_v1 = vld [vmem:[%s7330_s0] sm:$0xff]  ;;  %494 = vmatpush.bf16.msra.mxu0 %v4350_v0  ;;  %4367 = vmatpush.bf16.msra.mxu3 %v4350_v0  ;;  %v4319_v3 = vld [vmem:[%s7330_s0 + $0x8] sm:$0xff]  ;;  %v4320_v5 = vld [vmem:[%s7330_s0 + $0x10] sm:$0xff] }
   0x3   :  { %v4345_v6 = vld [vmem:[%s7330_s0 + $0xd8] sm:$0xff]  ;;  %v4346_v8 = vld [vmem:[%s7330_s0 + $0xe0] sm:$0xff]  ;;  %v4347_v10 = vld [vmem:[%s7330_s0 + $0xe8] sm:$0xff] }
   0x4   :  { %v4321_v7 = vld [vmem:[%s7330_s0 + $0x18] sm:$0xff]  ;;  %v4322_v9 = vld [vmem:[%s7330_s0 + $0x20] sm:$0xff]  ;;  %v4323_v11 = vld [vmem:[%s7330_s0 + $0x28] sm:$0xff] }
   0x5   :  { %3582 = vmatmul.msk.bf16.vlgmr.msra.gmra.mxu0 %vm390_vm0, %v4318_v1  ;;  %3607 = vmatmul.msk.bf16.vlgmr.msra.gmra.mxu3 %vm390_vm0, %v4343_v2  ;;  %v4348_v12 = vld [vmem:[%s7330_s0 + $0xf0] sm:$0xff]  ;;  %v4349_v14 = vld [vmem:[%s7330_s0 + $0xf8] sm:$0xff]  ;;  %v4326_v16 = vld [vmem:[%s7330_s0 + $0x40] sm:$0xff] }
   0x6   :  { %v4324_v13 = vld [vmem:[%s7330_s0 + $0x30] sm:$0xff]  ;;  %v4325_v15 = vld [vmem:[%s7330_s0 + $0x38] sm:$0xff]  ;;  %v4327_v21 = vld [vmem:[%s7330_s0 + $0x48] sm:$0xff] }
   0x7   :  { %v4328_v27 = vld [vmem:[%s7330_s0 + $0x50] sm:$0xff]  ;;  %v4329_v33 = vld [vmem:[%s7330_s0 + $0x58] sm:$0xff]  ;;  %v4330_v39 = vld [vmem:[%s7330_s0 + $0x60] sm:$0xff] }
   0x8   :  { %v4331_v44 = vld [vmem:[%s7330_s0 + $0x68] sm:$0xff]  ;;  %v4332_v49 = vld [vmem:[%s7330_s0 + $0x70] sm:$0xff]  ;;  %v4333_v54 = vld [vmem:[%s7330_s0 + $0x78] sm:$0xff] }
   0x9   :  { %v4334_v62 = vld [vmem:[%s7330_s0 + $0x80] sm:$0xff] }
  0x15   :  { %3583 = vmatmul.msk.bf16.gmra.mxu0 %vm390_vm0, %v4319_v3  ;;  %3608 = vmatmul.msk.bf16.gmra.mxu3 %vm390_vm0, %v4344_v4 }
  0x25   :  { %3584 = vmatmul.msk.bf16.gmra.mxu0 %vm390_vm0, %v4320_v5  ;;  %3609 = vmatmul.msk.bf16.gmra.mxu3 %vm390_vm0, %v4345_v6 }
  0x35   :  { %3585 = vmatmul.msk.bf16.gmra.mxu0 %vm390_vm0, %v4321_v7  ;;  %3610 = vmatmul.msk.bf16.gmra.mxu3 %vm390_vm0, %v4346_v8  ;;  %v4335_v8 = vld [vmem:[%s7330_s0 + $0x88] sm:$0xff] }
  0x45   :  { %3586 = vmatmul.msk.bf16.gmra.mxu0 %vm390_vm0, %v4322_v9  ;;  %3611 = vmatmul.msk.bf16.gmra.mxu3 %vm390_vm0, %v4347_v10 }
  0x55   :  { %3587 = vmatmul.msk.bf16.gmra.mxu0 %vm390_vm0, %v4323_v11  ;;  %3612 = vmatmul.msk.bf16.gmra.mxu3 %vm390_vm0, %v4348_v12  ;;  %v3616_v11 = vld [vmem:[%s7331_s1] sm:$0xf]  ;;  %v4192_v12 = vld [vmem:[%s7331_s1 + $0xc] sm:$0xf0] }
  0x65   :  { %3588 = vmatmul.msk.bf16.gmra.mxu0 %vm390_vm0, %v4324_v13  ;;  %3613 = vmatmul.msk.bf16.gmra.mxu3 %vm390_vm0, %v4349_v14  ;;  %v4000_v13 = vld [vmem:[%s7331_s1 + $0x300] sm:$0xf]  ;;  %v4288_v14 = vld [vmem:[%s7331_s1 + $0x30c] sm:$0xf0] }
  0x75   :  { %3589 = vmatmul.msk.bf16.gmra.mxu0 %vm390_vm0, %v4325_v15  ;;  %v4574_v15 = vor.u32 %v4192_v12, %v3616_v11 }
  0x82   :  { %v496_v17 = vpop.f32.mrf.mxu0 }
  0x85   :  { %3590 = vmatmul.msk.bf16.gmra.mxu0 %vm390_vm0, %v4326_v16  ;;  %v4577_v16 = vor.u32 %v4288_v14, %v4000_v13  ;;  %v4342_v14 = vld [vmem:[%s7330_s0 + $0xc0] sm:$0xff] }
  0x87   :  { %7450 = vst [vmem:[#allocation2_spill] sm:$0xff] %v4577_v16 }
  0x88   :  { %v4502_v19 = vpop.f32.mrf.mxu3 }
  0x8a   :  { %v498_v18 = vpop.f32.mrf.mxu0 }
  0x8b   :  { %v4504_v20 = vpack.c.bf16 %v498_v18, %v496_v17 }
  0x90   :  { %v4510_v23 = vpop.f32.mrf.mxu3 }
  0x91   :  { %v681_v9 = vpack.c.bf16 %v4510_v23, %v4502_v19  ;;  %v4336_v19 = vld [vmem:[%s7330_s0 + $0x90] sm:$0xff]  ;;  %v4016_v23 = vld [vmem:[%s7331_s1 + $0x320] sm:$0xf] }
  0x92   :  { %v501_v22 = vpop.f32.mrf.mxu0 }
  0x95   :  { %3591 = vmatmul.msk.bf16.gmra.mxu0 %vm390_vm0, %v4327_v21 }
  0x98   :  { %v4514_v26 = vpop.f32.mrf.mxu3 }
  0x9a   :  { %v503_v24 = vpop.f32.mrf.mxu0 }
  0x9b   :  { %v4512_v25 = vpack.c.bf16 %v503_v24, %v501_v22  ;;  %v3632_v22 = vld [vmem:[%s7331_s1 + $0x20] sm:$0xf]  ;;  %v4292_v24 = vld [vmem:[%s7331_s1 + $0x32c] sm:$0xf0] }
  0xa0   :  { %v4520_v29 = vpop.f32.mrf.mxu3 }
  0xa1   :  { %v682_v7 = vpack.c.bf16 %v4520_v29, %v4514_v26  ;;  %v4602_v26 = vor.u32 %v4292_v24, %v4016_v23  ;;  %v4337_v29 = vld [vmem:[%s7330_s0 + $0x98] sm:$0xff]  ;;  %v4316_v23 = vld [vmem:[%s7331_s1 + $0x3ec] sm:$0xf0] }
  0xa2   :  { %v506_v28 = vpop.f32.mrf.mxu0 }
  0xa3   :  { %7451 = vst [vmem:[#allocation3_spill] sm:$0xff] %v4602_v26 }
  0xa5   :  { %3592 = vmatmul.msk.bf16.gmra.mxu0 %vm390_vm0, %v4328_v27 }
  0xa8   :  { %v631_v32 = vpop.f32.mrf.mxu3 }
  0xaa   :  { %v508_v30 = vpop.f32.mrf.mxu0 }
  0xab   :  { %v4522_v31 = vpack.c.bf16 %v508_v30, %v506_v28 }
  0xb0   :  { %v633_v35 = vpop.f32.mrf.mxu3 }
  0xb1   :  { %v683_v4 = vpack.c.bf16 %v633_v35, %v631_v32  ;;  %v4200_v32 = vld [vmem:[%s7331_s1 + $0x4c] sm:$0xf0] }
  0xb2   :  { %v511_v34 = vpop.f32.mrf.mxu0 }
  0xb5   :  { %3593 = vmatmul.msk.bf16.gmra.mxu0 %vm390_vm0, %v4329_v33  ;;  %v4032_v33 = vld [vmem:[%s7331_s1 + $0x340] sm:$0xf] }
  0xb8   :  { %v636_v38 = vpop.f32.mrf.mxu3 }
  0xba   :  { %v513_v36 = vpop.f32.mrf.mxu0 }
  0xbb   :  { %v659_v37 = vpack.c.bf16 %v513_v36, %v511_v34  ;;  %v4296_v34 = vld [vmem:[%s7331_s1 + $0x34c] sm:$0xf0] }
  0xbc   :  { %v4626_v36 = vor.u32 %v4296_v34, %v4032_v33  ;;  %v3618_v33 = vld [vmem:[%s7331_s1 + $0x10] sm:$0xf0]  ;;  %v3744_v34 = vld [vmem:[%s7331_s1 + $0x100] sm:$0xf] }
  0xbe   :  { %7452 = vst [vmem:[#allocation4_spill] sm:$0xff] %v4626_v36 }
  0xc0   :  { %v638_v41 = vpop.f32.mrf.mxu3 }
  0xc1   :  { %v684_v2 = vpack.c.bf16 %v638_v41, %v636_v38  ;;  %v3664_v41 = vld [vmem:[%s7331_s1 + $0x60] sm:$0xf] }
  0xc2   :  { %v516_v40 = vpop.f32.mrf.mxu0 }
  0xc5   :  { %3594 = vmatmul.msk.bf16.gmra.mxu0 %vm390_vm0, %v4330_v39  ;;  %v4338_v39 = vld [vmem:[%s7330_s0 + $0xa0] sm:$0xff] }
  0xc8   :  { %v641_v43 = vpop.f32.mrf.mxu3 }
  0xca   :  { %v518_v42 = vpop.f32.mrf.mxu0 }
  0xcb   :  { %v660_v3 = vpack.c.bf16 %v518_v42, %v516_v40  ;;  %v4204_v42 = vld [vmem:[%s7331_s1 + $0x6c] sm:$0xf0] }
  0xd0   :  { %v643_v46 = vpop.f32.mrf.mxu3 }
  0xd1   :  { %v685_v63 = vpack.c.bf16 %v643_v46, %v641_v43  ;;  %v4048_v43 = vld [vmem:[%s7331_s1 + $0x360] sm:$0xf] }
  0xd2   :  { %v521_v45 = vpop.f32.mrf.mxu0 }
  0xd5   :  { %3595 = vmatmul.msk.bf16.gmra.mxu0 %vm390_vm0, %v4331_v44  ;;  %v4300_v44 = vld [vmem:[%s7331_s1 + $0x36c] sm:$0xf0] }
  0xd6   :  { %v4652_v46 = vor.u32 %v4300_v44, %v4048_v43 }
  0xd8   :  { %v646_v48 = vpop.f32.mrf.mxu3  ;;  %7453 = vst [vmem:[#allocation5_spill] sm:$0xff] %v4652_v46 }
  0xda   :  { %v523_v47 = vpop.f32.mrf.mxu0 }
  0xdb   :  { %v661_v1 = vpack.c.bf16 %v523_v47, %v521_v45  ;;  %v4650_v45 = vor.u32 %v4204_v42, %v3664_v41 }
  0xe0   :  { %v648_v51 = vpop.f32.mrf.mxu3 }
  0xe1   :  { %v686_v60 = vpack.c.bf16 %v648_v51, %v646_v48  ;;  %v4339_v48 = vld [vmem:[%s7330_s0 + $0xa8] sm:$0xff]  ;;  %v4208_v51 = vld [vmem:[%s7331_s1 + $0x8c] sm:$0xf0] }
  0xe2   :  { %v526_v50 = vpop.f32.mrf.mxu0 }
  0xe5   :  { %3596 = vmatmul.msk.bf16.gmra.mxu0 %vm390_vm0, %v4332_v49 }
  0xe8   :  { %v651_v53 = vpop.f32.mrf.mxu3 }
  0xea   :  { %v528_v52 = vpop.f32.mrf.mxu0 }
  0xeb   :  { %v662_v61 = vpack.c.bf16 %v528_v52, %v526_v50  ;;  %v3680_v50 = vld [vmem:[%s7331_s1 + $0x80] sm:$0xf] }
  0xec   :  { %v4064_v52 = vld [vmem:[%s7331_s1 + $0x380] sm:$0xf] }
  0xf0   :  { %v653_v56 = vpop.f32.mrf.mxu3 }
  0xf1   :  { %v687_v57 = vpack.c.bf16 %v653_v56, %v651_v53  ;;  %v4304_v53 = vld [vmem:[%s7331_s1 + $0x38c] sm:$0xf0] }
  0xf2   :  { %v531_v55 = vpop.f32.mrf.mxu0 }
  0xf3   :  { %1839 = vmatpush.bf16.msrb.mxu0 %v687_v57  ;;  %v4340_v57 = vld [vmem:[%s7330_s0 + $0xb0] sm:$0xff] }
  0xf5   :  { %3597 = vmatmul.msk.bf16.gmra.mxu0 %vm390_vm0, %v4333_v54  ;;  %v4672_v54 = vor.u32 %v4208_v51, %v3680_v50  ;;  %v4228_v50 = vld [vmem:[%s7331_s1 + $0x12c] sm:$0xf0]  ;;  %v4290_v51 = vld [vmem:[%s7331_s1 + $0x324] sm:$0xf] }
  0xf7   :  { %1840 = vmatpush.bf16.msrb.mxu0 %v686_v60  ;;  %v4212_v60 = vld [vmem:[%s7331_s1 + $0xac] sm:$0xf0] }
  0xfa   :  { %v533_v58 = vpop.f32.mrf.mxu0 }
  0xfb   :  { %v663_v59 = vpack.c.bf16 %v533_v58, %v531_v55  ;;  %1841 = vmatpush.bf16.msrb.mxu0 %v685_v63  ;;  %v4674_v55 = vor.u32 %v4304_v53, %v4064_v52  ;;  %v4018_v52 = vld [vmem:[%s7331_s1 + $0x330] sm:$0xf0] }
  0xfd   :  { %1332 = vmatpush.bf16.msra.mxu1 %v663_v59  ;;  %4368 = vmatpush.bf16.msrb.mxu3 %v663_v59  ;;  %7454 = vst [vmem:[#allocation6_spill] sm:$0xff] %v4674_v55  ;;  %v3696_v59 = vld [vmem:[%s7331_s1 + $0xa0] sm:$0xf] }
  0xfe   :  { %v4694_v63 = vor.u32 %v4212_v60, %v3696_v59 }
  0xff   :  { %1842 = vmatpush.bf16.msrb.mxu0 %v684_v2  ;;  %v4341_v2 = vld [vmem:[%s7330_s0 + $0xb8] sm:$0xff] }
 0x101   :  { %1333 = vmatpush.bf16.msra.mxu1 %v662_v61  ;;  %4369 = vmatpush.bf16.msrb.mxu3 %v662_v61  ;;  %v4080_v61 = vld [vmem:[%s7331_s1 + $0x3a0] sm:$0xf] }
 0x102   :  { %v536_v0 = vpop.f32.mrf.mxu0 }
 0x103   :  { %1843 = vmatpush.bf16.msrb.mxu0 %v683_v4  ;;  %v3712_v4 = vld [vmem:[%s7331_s1 + $0xc0] sm:$0xf] }
 0x105   :  { %3598 = vmatmul.msk.bf16.gmra.mxu0 %vm390_vm0, %v4334_v62  ;;  %1334 = vmatpush.bf16.msra.mxu1 %v661_v1  ;;  %v4308_v62 = vld [vmem:[%s7331_s1 + $0x3ac] sm:$0xf0] }
 0x106   :  { %4370 = vmatpush.bf16.msrb.mxu3 %v661_v1 }
 0x107   :  { %1844 = vmatpush.bf16.msrb.mxu0 %v682_v7  ;;  %v4096_v7 = vld [vmem:[%s7331_s1 + $0x3c0] sm:$0xf] }
 0x109   :  { %1335 = vmatpush.bf16.msra.mxu1 %v660_v3 }
 0x10a   :  { %4371 = vmatpush.bf16.msrb.mxu3 %v660_v3  ;;  %v538_v5 = vpop.f32.mrf.mxu0 }
 0x10b   :  { %v4548_v6 = vpack.c.bf16 %v538_v5, %v536_v0  ;;  %1845 = vmatpush.bf16.msrb.mxu0 %v681_v9  ;;  %v4696_v0 = vor.u32 %v4308_v62, %v4080_v61  ;;  %v4216_v5 = vld [vmem:[%s7331_s1 + $0xcc] sm:$0xf0] }
 0x10c   :  { %v4716_v9 = vor.u32 %v4216_v5, %v3712_v4  ;;  %v3776_v4 = vld [vmem:[%s7331_s1 + $0x140] sm:$0xf]  ;;  %v4232_v5 = vld [vmem:[%s7331_s1 + $0x14c] sm:$0xf0] }
 0x10d   :  { %1336 = vmatpush.bf16.msra.mxu1 %v659_v37  ;;  %7455 = vst [vmem:[#allocation7_spill] sm:$0xff] %v4696_v0 }
 0x10e   :  { %4372 = vmatpush.bf16.msrb.mxu3 %v659_v37 }
 0x111   :  { %1337 = vmatpush.bf16.msra.mxu1 %v4522_v31 }
 0x112   :  { %4373 = vmatpush.bf16.msrb.mxu3 %v4522_v31  ;;  %v541_v10 = vpop.f32.mrf.mxu0  ;;  %v3648_v31 = vld [vmem:[%s7331_s1 + $0x40] sm:$0xf] }
 0x113   :  { %v4624_v35 = vor.u32 %v4200_v32, %v3648_v31  ;;  %v4190_v32 = vld [vmem:[%s7331_s1 + $0x4] sm:$0xf] }
 0x115   :  { %3599 = vmatmul.msk.bf16.gmra.mxu0 %vm390_vm0, %v4335_v8  ;;  %1338 = vmatpush.bf16.msra.mxu1 %v4512_v25  ;;  %v4312_v8 = vld [vmem:[%s7331_s1 + $0x3cc] sm:$0xf0] }
 0x116   :  { %4374 = vmatpush.bf16.msrb.mxu3 %v4512_v25 }
 0x119   :  { %1339 = vmatpush.bf16.msra.mxu1 %v4504_v20 }
 0x11a   :  { %4375 = vmatpush.bf16.msrb.mxu3 %v4504_v20  ;;  %v543_v17 = vpop.f32.mrf.mxu0  ;;  %v4196_v20 = vld [vmem:[%s7331_s1 + $0x2c] sm:$0xf0] }
 0x11b   :  { %v4580_v18 = vpack.c.bf16 %v543_v17, %v541_v10  ;;  %v4600_v25 = vor.u32 %v4196_v20, %v3632_v22  ;;  %v4718_v10 = vor.u32 %v4312_v8, %v4096_v7  ;;  %v4220_v22 = vld [vmem:[%s7331_s1 + $0xec] sm:$0xf0]  ;;  %v4112_v20 = vld [vmem:[%s7331_s1 + $0x3e0] sm:$0xf]  ;;  %v4294_v7 = vld [vmem:[%s7331_s1 + $0x344] sm:$0xf] }
 0x11c   :  { %1340 = vmatmul.bf16.vlgmr.msra.gmra.mxu1 %v4574_v15  ;;  %v4034_v8 = vld [vmem:[%s7331_s1 + $0x350] sm:$0xf0] }
 0x11d   :  { %1460 = vmatmul.bf16.vlgmr.msrb.gmra.mxu3 %v4577_v16  ;;  %7456 = vst [vmem:[#allocation8_spill] sm:$0xff] %v4718_v10 }
 0x122   :  { %v546_v21 = vpop.f32.mrf.mxu0 }
 0x125   :  { %3600 = vmatmul.msk.bf16.gmra.mxu0 %vm390_vm0, %v4336_v19 }
 0x12a   :  { %v548_v27 = vpop.f32.mrf.mxu0 }
 0x12b   :  { %v4604_v28 = vpack.c.bf16 %v548_v27, %v546_v21  ;;  %v3728_v21 = vld [vmem:[%s7331_s1 + $0xe0] sm:$0xf] }
 0x12c   :  { %1345 = vmatmul.bf16.gmra.mxu1 %v4600_v25  ;;  %v4741_v27 = vor.u32 %v4220_v22, %v3728_v21 }
 0x12d   :  { %1465 = vmatmul.bf16.gmra.mxu3 %v4602_v26 }
 0x12e   :  { %7457 = vst [vmem:[#allocation9_spill] sm:$0xff] %v4741_v27 }
 0x132   :  { %v551_v30 = vpop.f32.mrf.mxu0 }
 0x135   :  { %3601 = vmatmul.msk.bf16.gmra.mxu0 %vm390_vm0, %v4337_v29  ;;  %v4743_v29 = vor.u32 %v4316_v23, %v4112_v20 }
 0x137   :  { %7458 = vst [vmem:[#allocation10_spill] sm:$0xff] %v4743_v29 }
 0x13a   :  { %v553_v37 = vpop.f32.mrf.mxu0 }
 0x13b   :  { %v4628_v38 = vpack.c.bf16 %v553_v37, %v551_v30  ;;  %v4286_v37 = vld [vmem:[%s7331_s1 + $0x304] sm:$0xf] }
 0x13c   :  { %1350 = vmatmul.bf16.gmra.mxu1 %v4624_v35 }
 0x13d   :  { %1470 = vmatmul.bf16.gmra.mxu3 %v4626_v36 }
 0x142   :  { %v4635_v40 = vpop.f32.mrf.mxu0 }
 0x145   :  { %3602 = vmatmul.msk.bf16.gmra.mxu0 %vm390_vm0, %v4338_v39  ;;  %v4775_v39 = vor.u32 %v4190_v32, %v3618_v33  ;;  %v3666_v32 = vld [vmem:[%s7331_s1 + $0x70] sm:$0xf0]  ;;  %v3792_v33 = vld [vmem:[%s7331_s1 + $0x160] sm:$0xf] }
 0x147   :  { %7459 = vst [vmem:[#allocation11_spill] sm:$0xff] %v4775_v39 }
 0x14a   :  { %v558_v47 = vpop.f32.mrf.mxu0 }
 0x14b   :  { %v668_v24 = vpack.c.bf16 %v558_v47, %v4635_v40 }
 0x14c   :  { %1355 = vmatmul.bf16.gmra.mxu1 %v4650_v45 }
 0x14d   :  { %1475 = vmatmul.bf16.gmra.mxu3 %v4652_v46 }
 0x152   :  { %v561_v49 = vpop.f32.mrf.mxu0 }
 0x155   :  { %3603 = vmatmul.msk.bf16.gmra.mxu0 %vm390_vm0, %v4339_v48  ;;  %v4194_v48 = vld [vmem:[%s7331_s1 + $0x24] sm:$0xf] }
 0x15a   :  { %v563_v56 = vpop.f32.mrf.mxu0 }
 0x15b   :  { %v669_v19 = vpack.c.bf16 %v563_v56, %v561_v49  ;;  %v3760_v49 = vld [vmem:[%s7331_s1 + $0x120] sm:$0xf] }
 0x15c   :  { %1360 = vmatmul.bf16.gmra.mxu1 %v4672_v54 }
 0x15d   :  { %1480 = vmatmul.bf16.gmra.mxu3 %v4674_v55 }
 0x162   :  { %v566_v58 = vpop.f32.mrf.mxu0 }
 0x165   :  { %3604 = vmatmul.msk.bf16.gmra.mxu0 %vm390_vm0, %v4340_v57  ;;  %v4818_v57 = vor.u32 %v4228_v50, %v3760_v49 }
 0x167   :  { %7463 = vst [vmem:[#allocation15_spill] sm:$0xff] %v4818_v57 }
 0x16a   :  { %v568_v1 = vpop.f32.mrf.mxu0 }
 0x16b   :  { %v670_v13 = vpack.c.bf16 %v568_v1, %v566_v58  ;;  %v4820_v58 = vor.u32 %v4290_v51, %v4018_v52 }
 0x16c   :  { %1365 = vmatmul.bf16.gmra.mxu1 %v4694_v63 }
 0x16d   :  { %1485 = vmatmul.bf16.gmra.mxu3 %v4696_v0  ;;  %7464 = vst [vmem:[#allocation16_spill] sm:$0xff] %v4820_v58 }
 0x172   :  { %v571_v3 = vpop.f32.mrf.mxu0 }
 0x175   :  { %3605 = vmatmul.msk.bf16.gmra.mxu0 %vm390_vm0, %v4341_v2  ;;  %v4198_v2 = vld [vmem:[%s7331_s1 + $0x44] sm:$0xf] }
 0x17a   :  { %v573_v11 = vpop.f32.mrf.mxu0 }
 0x17b   :  { %v671_v12 = vpack.c.bf16 %v573_v11, %v571_v3  ;;  %v3650_v3 = vld [vmem:[%s7331_s1 + $0x50] sm:$0xf0] }
 0x17c   :  { %1370 = vmatmul.bf16.gmra.mxu1 %v4716_v9 }
 0x17d   :  { %1490 = vmatmul.bf16.gmra.mxu3 %v4718_v10  ;;  %1501 = vmatpush.bf16.msra.mxu2 %v671_v12 }
 0x17e   :  { %4376 = vmatpush.bf16.msra.mxu3 %v671_v12  ;;  %v4855_v12 = vor.u32 %v4198_v2, %v3650_v3 }
 0x180   :  { %7465 = vst [vmem:[#allocation17_spill] sm:$0xff] %v4855_v12 }
 0x181   :  { %1502 = vmatpush.bf16.msra.mxu2 %v670_v13 }
 0x182   :  { %4377 = vmatpush.bf16.msra.mxu3 %v670_v13  ;;  %v4725_v17 = vpop.f32.mrf.mxu0  ;;  %v4857_v13 = vor.u32 %v4232_v5, %v3776_v4  ;;  %v4206_v4 = vld [vmem:[%s7331_s1 + $0x84] sm:$0xf]  ;;  %v3682_v5 = vld [vmem:[%s7331_s1 + $0x90] sm:$0xf0] }
 0x184   :  { %7466 = vst [vmem:[#allocation18_spill] sm:$0xff] %v4857_v13 }
 0x185   :  { %1503 = vmatpush.bf16.msra.mxu2 %v669_v19  ;;  %3606 = vmatmul.msk.bf16.gmra.mxu0 %vm390_vm0, %v4342_v14  ;;  %v4859_v14 = vor.u32 %v4294_v7, %v4034_v8  ;;  %v3808_v7 = vld [vmem:[%s7331_s1 + $0x180] sm:$0xf]  ;;  %v4240_v8 = vld [vmem:[%s7331_s1 + $0x18c] sm:$0xf0] }
 0x186   :  { %4378 = vmatpush.bf16.msra.mxu3 %v669_v19 }
 0x187   :  { %7467 = vst [vmem:[#allocation19_spill] sm:$0xff] %v4859_v14 }
 0x189   :  { %1504 = vmatpush.bf16.msra.mxu2 %v668_v24 }
 0x18a   :  { %4379 = vmatpush.bf16.msra.mxu3 %v668_v24  ;;  %v4745_v30 = vpop.f32.mrf.mxu0  ;;  %v4202_v24 = vld [vmem:[%s7331_s1 + $0x64] sm:$0xf] }
 0x18c   :  { %1375 = vmatmul.bf16.gmra.mxu1 %v4741_v27 }
 0x18d   :  { %1495 = vmatmul.bf16.gmra.mxu3 %v4743_v29  ;;  %1505 = vmatpush.bf16.msra.mxu2 %v4628_v38 }
 0x18e   :  { %4380 = vmatpush.bf16.msra.mxu3 %v4628_v38  ;;  %v4002_v38 = vld [vmem:[%s7331_s1 + $0x310] sm:$0xf0] }
 0x18f   :  { %v4780_v41 = vor.u32 %v4286_v37, %v4002_v38  ;;  %v4050_v37 = vld [vmem:[%s7331_s1 + $0x370] sm:$0xf0] }
 0x191   :  { %1506 = vmatpush.bf16.msra.mxu2 %v4604_v28  ;;  %7461 = vst [vmem:[#allocation13_spill] sm:$0xff] %v4780_v41 }
 0x192   :  { %4381 = vmatpush.bf16.msra.mxu3 %v4604_v28  ;;  %v4753_v31 = vpop.f32.mrf.mxu0  ;;  %v4224_v28 = vld [vmem:[%s7331_s1 + $0x10c] sm:$0xf0] }
 0x193   :  { %v4777_v40 = vor.u32 %v4224_v28, %v3744_v34  ;;  %v4236_v34 = vld [vmem:[%s7331_s1 + $0x16c] sm:$0xf0]  ;;  %v4298_v28 = vld [vmem:[%s7331_s1 + $0x364] sm:$0xf] }
 0x194   :  { %v4898_v49 = vor.u32 %v4298_v28, %v4050_v37  ;;  %v4935_v28 = vor.u32 %v4240_v8, %v3808_v7  ;;  %v3824_v7 = vld [vmem:[%s7331_s1 + $0x1a0] sm:$0xf]  ;;  %v4244_v8 = vld [vmem:[%s7331_s1 + $0x1ac] sm:$0xf0] }
 0x195   :  { %1507 = vmatpush.bf16.msra.mxu2 %v4580_v18  ;;  %7460 = vst [vmem:[#allocation12_spill] sm:$0xff] %v4777_v40  ;;  %v4970_v0 = vor.u32 %v4244_v8, %v3824_v7  ;;  %v3840_v7 = vld [vmem:[%s7331_s1 + $0x1c0] sm:$0xf]  ;;  %v4248_v8 = vld [vmem:[%s7331_s1 + $0x1cc] sm:$0xf0] }
 0x196   :  { %4382 = vmatpush.bf16.msra.mxu3 %v4580_v18  ;;  %7470 = vst [vmem:[#allocation22_spill] sm:$0xff] %v4898_v49 }
 0x197   :  { %7472 = vst [vmem:[#allocation24_spill] sm:$0xff] %v4935_v28 }
 0x198   :  { %7475 = vst [vmem:[#allocation27_spill] sm:$0xff] %v4970_v0 }
 0x199   :  { %1508 = vmatpush.bf16.msra.mxu2 %v4548_v6  ;;  %v4782_v42 = vpop.f32.mrf.mxu1 }
 0x19a   :  { %4383 = vmatpush.bf16.msra.mxu3 %v4548_v6  ;;  %v4785_v18 = vpop.f32.mrf.mxu0  ;;  %v3634_v6 = vld [vmem:[%s7331_s1 + $0x30] sm:$0xf0] }
 0x19b   :  { %v4816_v56 = vor.u32 %v4194_v48, %v3634_v6  ;;  %v4894_v48 = vor.u32 %v4202_v24, %v3666_v32  ;;  %v4896_v6 = vor.u32 %v4236_v34, %v3792_v33  ;;  %v4302_v24 = vld [vmem:[%s7331_s1 + $0x384] sm:$0xf]  ;;  %v4066_v32 = vld [vmem:[%s7331_s1 + $0x390] sm:$0xf0]  ;;  %v4933_v34 = vor.u32 %v4206_v4, %v3682_v5 }
 0x19c   :  { %1509 = vmatmul.bf16.vlgmr.msra.gmra.mxu2 %v4775_v39  ;;  %1380 = vmatmul.bf16.gmra.mxu1 %v4777_v40  ;;  %v4937_v37 = vor.u32 %v4302_v24, %v4066_v32  ;;  %v4210_v4 = vld [vmem:[%s7331_s1 + $0xa4] sm:$0xf]  ;;  %v3698_v5 = vld [vmem:[%s7331_s1 + $0xb0] sm:$0xf0]  ;;  %v4207_v39 = vld [vmem:[%s7331_s1 + $0x8c] sm:$0xf] }
 0x19d   :  { %1629 = vmatmul.bf16.vlgmr.msra.gmra.mxu3 %v4780_v41  ;;  %7462 = vst [vmem:[#allocation14_spill] sm:$0xff] %v4816_v56  ;;  %v4306_v24 = vld [vmem:[%s7331_s1 + $0x3a4] sm:$0xf]  ;;  %v4082_v32 = vld [vmem:[%s7331_s1 + $0x3b0] sm:$0xf0]  ;;  %v4968_v10 = vor.u32 %v4210_v4, %v3698_v5 }
 0x19e   :  { %7468 = vst [vmem:[#allocation20_spill] sm:$0xff] %v4894_v48  ;;  %v4972_v55 = vor.u32 %v4306_v24, %v4082_v32  ;;  %v4214_v4 = vld [vmem:[%s7331_s1 + $0xc4] sm:$0xf]  ;;  %v3714_v5 = vld [vmem:[%s7331_s1 + $0xd0] sm:$0xf0] }
 0x19f   :  { %7469 = vst [vmem:[#allocation21_spill] sm:$0xff] %v4896_v6  ;;  %v4310_v24 = vld [vmem:[%s7331_s1 + $0x3c4] sm:$0xf]  ;;  %v4098_v32 = vld [vmem:[%s7331_s1 + $0x3d0] sm:$0xf0] }
 0x1a0   :  { %v4790_v43 = vpop.f32.mrf.mxu3  ;;  %7471 = vst [vmem:[#allocation23_spill] sm:$0xff] %v4933_v34 }
 0x1a1   :  { %v4792_v44 = vpop.f32.mrf.mxu1  ;;  %7473 = vst [vmem:[#allocation25_spill] sm:$0xff] %v4937_v37 }
 0x1a2   :  { %v4794_v47 = vpop.f32.mrf.mxu0  ;;  %7474 = vst [vmem:[#allocation26_spill] sm:$0xff] %v4968_v10 }
 0x1a3   :  { %7476 = vst [vmem:[#allocation28_spill] sm:$0xff] %v4972_v55 }
 0x1a8   :  { %v4814_v53 = vpop.f32.mrf.mxu3 }
 0x1a9   :  { %v4822_v59 = vpop.f32.mrf.mxu1 }
 0x1aa   :  { %v4824_v60 = vpop.f32.mrf.mxu0 }
 0x1ac   :  { %1514 = vmatmul.bf16.gmra.mxu2 %v4816_v56  ;;  %1385 = vmatmul.bf16.gmra.mxu1 %v4818_v57 }
 0x1ad   :  { %1634 = vmatmul.bf16.gmra.mxu3 %v4820_v58 }
 0x1b0   :  { %v4829_v61 = vpop.f32.mrf.mxu3 }
 0x1b1   :  { %v4831_v62 = vpop.f32.mrf.mxu1 }
 0x1b2   :  { %v4833_v1 = vpop.f32.mrf.mxu0 }
 0x1b8   :  { %v4853_v11 = vpop.f32.mrf.mxu3 }
 0x1b9   :  { %v4861_v19 = vpop.f32.mrf.mxu1 }
 0x1ba   :  { %v4863_v21 = vpop.f32.mrf.mxu0 }
 0x1bc   :  { %1519 = vmatmul.bf16.gmra.mxu2 %v4855_v12  ;;  %1390 = vmatmul.bf16.gmra.mxu1 %v4857_v13 }
 0x1bd   :  { %1639 = vmatmul.bf16.gmra.mxu3 %v4859_v14 }
 0x1c0   :  { %v4868_v22 = vpop.f32.mrf.mxu3 }
 0x1c1   :  { %v4870_v20 = vpop.f32.mrf.mxu1 }
 0x1c2   :  { %v4872_v23 = vpop.f32.mrf.mxu0 }
 0x1c8   :  { %v4892_v38 = vpop.f32.mrf.mxu3 }
 0x1c9   :  { %v4900_v50 = vpop.f32.mrf.mxu1 }
 0x1ca   :  { %v4902_v51 = vpop.f32.mrf.mxu0 }
 0x1cc   :  { %1524 = vmatmul.bf16.gmra.mxu2 %v4894_v48  ;;  %1395 = vmatmul.bf16.gmra.mxu1 %v4896_v6 }
 0x1cd   :  { %1644 = vmatmul.bf16.gmra.mxu3 %v4898_v49 }
 0x1d0   :  { %v4907_v52 = vpop.f32.mrf.mxu3 }
 0x1d1   :  { %v4909_v2 = vpop.f32.mrf.mxu1 }
 0x1d2   :  { %v4911_v3 = vpop.f32.mrf.mxu0 }
 0x1d8   :  { %v4931_v33 = vpop.f32.mrf.mxu3 }
 0x1d9   :  { %v4939_v49 = vpop.f32.mrf.mxu1 }
 0x1da   :  { %v603_v14 = vpop.f32.mrf.mxu0 }
 0x1dc   :  { %1529 = vmatmul.bf16.gmra.mxu2 %v4933_v34  ;;  %1400 = vmatmul.bf16.gmra.mxu1 %v4935_v28  ;;  %v5007_v28 = vor.u32 %v4310_v24, %v4098_v32 }
 0x1dd   :  { %1649 = vmatmul.bf16.gmra.mxu3 %v4937_v37 }
 0x1de   :  { %7479 = vst [vmem:[#allocation31_spill] sm:$0xff] %v5007_v28 }
 0x1e0   :  { %v4944_v58 = vpop.f32.mrf.mxu3 }
 0x1e1   :  { %v4946_v41 = vpop.f32.mrf.mxu1 }
 0x1e2   :  { %v606_v29 = vpop.f32.mrf.mxu0 }
 0x1e8   :  { %v4966_v37 = vpop.f32.mrf.mxu3 }
 0x1e9   :  { %v4974_v46 = vpop.f32.mrf.mxu1 }
 0x1ea   :  { %v608_v36 = vpop.f32.mrf.mxu0 }
 0x1eb   :  { %v678_v13 = vpack.c.bf16 %v608_v36, %v606_v29  ;;  %v3856_v36 = vld [vmem:[%s7331_s1 + $0x1e0] sm:$0xf]  ;;  %v4252_v29 = vld [vmem:[%s7331_s1 + $0x1ec] sm:$0xf0] }
 0x1ec   :  { %1534 = vmatmul.bf16.gmra.mxu2 %v4968_v10  ;;  %1405 = vmatmul.bf16.gmra.mxu1 %v4970_v0  ;;  %v5003_v10 = vor.u32 %v4214_v4, %v3714_v5  ;;  %v5005_v0 = vor.u32 %v4248_v8, %v3840_v7  ;;  %v677_v7 = vpack.c.bf16 %v603_v14, %v4911_v3 }
 0x1ed   :  { %1654 = vmatmul.bf16.gmra.mxu3 %v4972_v55  ;;  %v676_v14 = vpack.c.bf16 %v4902_v51, %v4872_v23  ;;  %v5043_v24 = vor.u32 %v4252_v29, %v3856_v36  ;;  %v674_v36 = vpack.c.bf16 %v4824_v60, %v4794_v47  ;;  %v3872_v47 = vld [vmem:[%s7331_s1 + $0x200] sm:$0xf]  ;;  %v4256_v60 = vld [vmem:[%s7331_s1 + $0x20c] sm:$0xf0] }
 0x1ee   :  { %7477 = vst [vmem:[#allocation29_spill] sm:$0xff] %v5003_v10 }
 0x1ef   :  { %7478 = vst [vmem:[#allocation30_spill] sm:$0xff] %v5005_v0 }
 0x1f0   :  { %v4979_v26 = vpop.f32.mrf.mxu3  ;;  %7481 = vst [vmem:[#allocation33_spill] sm:$0xff] %v5043_v24 }
 0x1f1   :  { %v4981_v16 = vpop.f32.mrf.mxu1 }
 0x1f2   :  { %v611_v34 = vpop.f32.mrf.mxu0 }
 0x1f8   :  { %v5001_v55 = vpop.f32.mrf.mxu3 }
 0x1f9   :  { %v5009_v48 = vpop.f32.mrf.mxu1 }
 0x1fa   :  { %v613_v6 = vpop.f32.mrf.mxu0 }
 0x1fb   :  { %v679_v12 = vpack.c.bf16 %v613_v6, %v611_v34  ;;  %v4218_v6 = vld [vmem:[%s7331_s1 + $0xe4] sm:$0xf]  ;;  %v3730_v34 = vld [vmem:[%s7331_s1 + $0xf0] sm:$0xf0] }
 0x1fc   :  { %1539 = vmatmul.bf16.gmra.mxu2 %v5003_v10  ;;  %1410 = vmatmul.bf16.gmra.mxu1 %v5005_v0  ;;  %v5041_v8 = vor.u32 %v4218_v6, %v3730_v34  ;;  %v3626_v10 = vld [vmem:[%s7331_s1 + $0x18] sm:$0xf0]  ;;  %v675_v6 = vpack.c.bf16 %v4863_v21, %v4833_v1  ;;  %v673_v1 = vpack.c.bf16 %v4785_v18, %v4753_v31  ;;  %v3746_v21 = vld [vmem:[%s7331_s1 + $0x110] sm:$0xf0]  ;;  %v3624_v31 = vld [vmem:[%s7331_s1 + $0x8] sm:$0xf] }
 0x1fd   :  { %1659 = vmatmul.bf16.gmra.mxu3 %v5007_v28  ;;  %v4191_v28 = vld [vmem:[%s7331_s1 + $0xc] sm:$0xf]  ;;  %v4193_v18 = vld [vmem:[%s7331_s1 + $0x14] sm:$0xf0] }
 0x1fe   :  { %1670 = vmatpush.bf16.msrb.mxu3 %v679_v12  ;;  %v4314_v12 = vld [vmem:[%s7331_s1 + $0x3e4] sm:$0xf]  ;;  %7480 = vst [vmem:[#allocation32_spill] sm:$0xff] %v5041_v8  ;;  %v5059_v34 = vor.u32 %v4191_v28, %v3626_v10  ;;  %v672_v28 = vpack.c.bf16 %v4745_v30, %v4725_v17  ;;  %v5110_v17 = vld [vmem:[%s7332_s3] ss:$0 sm:$0xff] }
 0x1ff   :  { %v4222_v10 = vld [vmem:[%s7331_s1 + $0x104] sm:$0xf]  ;;  %v4203_v0 = vld [vmem:[%s7331_s1 + $0x6c] sm:$0xf] }
 0x200   :  { %v5014_v56 = vpop.f32.mrf.mxu3  ;;  %7483 = vst [vmem:[#allocation35_spill] sm:$0xff] %v5059_v34 }
 0x201   :  { %v5016_v4 = vpop.f32.mrf.mxu1 }
 0x202   :  { %1671 = vmatpush.bf16.msrb.mxu3 %v678_v13  ;;  %v616_v5 = vpop.f32.mrf.mxu0  ;;  %v4114_v13 = vld [vmem:[%s7331_s1 + $0x3f0] sm:$0xf0] }
 0x203   :  { %v5045_v32 = vor.u32 %v4314_v12, %v4114_v13  ;;  %v5093_v13 = vor.u32 %v4222_v10, %v3746_v21  ;;  %v1462_v10 = vadd.f32 %v5110_v17, %v4790_v43  ;;  %v3888_v43 = vld [vmem:[%s7331_s1 + $0x220] sm:$0xf] }
 0x205   :  { %7482 = vst [vmem:[#allocation34_spill] sm:$0xff] %v5045_v32 }
 0x206   :  { %1672 = vmatpush.bf16.msrb.mxu3 %v677_v7  ;;  %7484 = vst [vmem:[#allocation36_spill] sm:$0xff] %v5093_v13 }
 0x208   :  { %v5039_v3 = vpop.f32.mrf.mxu3 }
 0x209   :  { %v5047_v7 = vpop.f32.mrf.mxu1 }
 0x20a   :  { %1673 = vmatpush.bf16.msrb.mxu3 %v676_v14  ;;  %v618_v23 = vpop.f32.mrf.mxu0  ;;  %v5095_v14 = vor.u32 %v4256_v60, %v3872_v47 }
 0x20b   :  { %v680_v51 = vpack.c.bf16 %v618_v23, %v616_v5  ;;  %v5097_v23 = vor.u32 %v4193_v18, %v3624_v31 }
 0x20c   :  { %1544 = vmatmul.bf16.gmra.mxu2 %v5041_v8  ;;  %1415 = vmatmul.bf16.gmra.mxu1 %v5043_v24  ;;  %7485 = vst [vmem:[#allocation37_spill] sm:$0xff] %v5095_v14  ;;  %v4199_v8 = vld [vmem:[%s7331_s1 + $0x4c] sm:$0xf] }
 0x20d   :  { %1664 = vmatmul.bf16.gmra.mxu3 %v5045_v32  ;;  %1846 = vmatpush.bf16.msrb.mxu0 %v680_v51  ;;  %7486 = vst [vmem:[#allocation38_spill] sm:$0xff] %v5097_v23 }
 0x20e   :  { %1674 = vmatpush.bf16.msrb.mxu3 %v675_v6  ;;  %v4195_v6 = vld [vmem:[%s7331_s1 + $0x2c] sm:$0xf] }
 0x210   :  { %v5064_v29 = vpop.f32.mrf.mxu3  ;;  %1847 = vmatmul.bf16.vlgmr.msrb.gmra.mxu0 %v5059_v34 }
 0x211   :  { %v5067_v5 = vpop.f32.mrf.mxu1 }
 0x212   :  { %1675 = vmatpush.bf16.msrb.mxu3 %v674_v36  ;;  %v3642_v36 = vld [vmem:[%s7331_s1 + $0x38] sm:$0xf0] }
 0x213   :  { %v5114_v30 = vor.u32 %v4195_v6, %v3642_v36  ;;  %v4260_v6 = vld [vmem:[%s7331_s1 + $0x22c] sm:$0xf0]  ;;  %v1344_v36 = vadd.f32 %v5110_v17, %v4792_v44 }
 0x215   :  { %7487 = vst [vmem:[#allocation39_spill] sm:$0xff] %v5114_v30 }
 0x216   :  { %1676 = vmatpush.bf16.msrb.mxu3 %v673_v1  ;;  %v1342_v1 = vadd.f32 %v5110_v17, %v4782_v42  ;;  %v3762_v42 = vld [vmem:[%s7331_s1 + $0x130] sm:$0xf0] }
 0x218   :  { %v5091_v12 = vpop.f32.mrf.mxu3 }
 0x219   :  { %v5099_v51 = vpop.f32.mrf.mxu1 }
 0x21a   :  { %1677 = vmatpush.bf16.msrb.mxu3 %v672_v28  ;;  %v4226_v28 = vld [vmem:[%s7331_s1 + $0x124] sm:$0xf] }
 0x21b   :  { %v5152_v34 = vor.u32 %v4226_v28, %v3762_v42  ;;  %v1467_v42 = vadd.f32 %v5110_v17, %v4829_v61  ;;  %v3904_v61 = vld [vmem:[%s7331_s1 + $0x240] sm:$0xf] }
 0x21c   :  { %1549 = vmatmul.bf16.gmra.mxu2 %v5093_v13  ;;  %1420 = vmatmul.bf16.gmra.mxu1 %v5095_v14  ;;  %v5154_v13 = vor.u32 %v4260_v6, %v3888_v43 }
 0x21d   :  { %1678 = vmatmul.bf16.vlgmr.msrb.gmra.mxu3 %v5097_v23  ;;  %7488 = vst [vmem:[#allocation40_spill] sm:$0xff] %v5152_v34 }
 0x21e   :  { %7489 = vst [vmem:[#allocation41_spill] sm:$0xff] %v5154_v13 }
 0x21f   :  { %v1510_v21 = vpop.f32.mrf.mxu2 }
 0x220   :  { %v5121_v47 = vadd.f32 %v1510_v21, %v1342_v1  ;;  %v1630_v60 = vpop.f32.mrf.mxu3  ;;  %1852 = vmatmul.bf16.gmra.mxu0 %v5114_v30  ;;  %v3640_v1 = vld [vmem:[%s7331_s1 + $0x28] sm:$0xf]  ;;  %v1464_v21 = vadd.f32 %v5110_v17, %v4814_v53  ;;  %v3658_v53 = vld [vmem:[%s7331_s1 + $0x58] sm:$0xf0] }
 0x221   :  { %v5124_v31 = vadd.f32 %v1630_v60, %v1462_v10  ;;  %v5126_v18 = vpop.f32.mrf.mxu1  ;;  %v4197_v10 = vld [vmem:[%s7331_s1 + $0x34] sm:$0xf0]  ;;  %v5170_v28 = vor.u32 %v4199_v8, %v3658_v53  ;;  %v4230_v8 = vld [vmem:[%s7331_s1 + $0x144] sm:$0xf]  ;;  %v3656_v53 = vld [vmem:[%s7331_s1 + $0x48] sm:$0xf] }
 0x222   :  { %v5158_v23 = vor.u32 %v4197_v10, %v3640_v1 }
 0x223   :  { %7491 = vst [vmem:[#allocation43_spill] sm:$0xff] %v5170_v28 }
 0x224   :  { %7490 = vst [vmem:[#allocation42_spill] sm:$0xff] %v5158_v23 }
 0x227   :  { %v1512_v60 = vpop.f32.mrf.mxu2 }
 0x228   :  { %v5150_v32 = vadd.f32 %v1512_v60, %v1344_v36  ;;  %v1632_v30 = vpop.f32.mrf.mxu3  ;;  %v1349_v60 = vadd.f32 %v5110_v17, %v4831_v62 }
 0x229   :  { %v5156_v44 = vadd.f32 %v1632_v30, %v1464_v21  ;;  %v5160_v14 = vpop.f32.mrf.mxu1  ;;  %v1347_v30 = vadd.f32 %v5110_v17, %v4822_v59  ;;  %v3778_v59 = vld [vmem:[%s7331_s1 + $0x150] sm:$0xf0]  ;;  %v4264_v21 = vld [vmem:[%s7331_s1 + $0x24c] sm:$0xf0] }
 0x22c   :  { %1554 = vmatmul.bf16.gmra.mxu2 %v5152_v34  ;;  %1425 = vmatmul.bf16.gmra.mxu1 %v5154_v13  ;;  %v5208_v34 = vor.u32 %v4230_v8, %v3778_v59  ;;  %v1472_v59 = vadd.f32 %v5110_v17, %v4868_v22  ;;  %v3920_v22 = vld [vmem:[%s7331_s1 + $0x260] sm:$0xf] }
 0x22d   :  { %1683 = vmatmul.bf16.gmra.mxu3 %v5158_v23  ;;  %v5210_v23 = vor.u32 %v4264_v21, %v3904_v61 }
 0x22e   :  { %7493 = vst [vmem:[#allocation45_spill] sm:$0xff] %v5208_v34 }
 0x22f   :  { %v1515_v43 = vpop.f32.mrf.mxu2  ;;  %7494 = vst [vmem:[#allocation46_spill] sm:$0xff] %v5210_v23 }
 0x230   :  { %v5177_v6 = vadd.f32 %v1515_v43, %v1347_v30  ;;  %v1635_v36 = vpop.f32.mrf.mxu3  ;;  %1857 = vmatmul.bf16.gmra.mxu0 %v5170_v28  ;;  %v4201_v30 = vld [vmem:[%s7331_s1 + $0x54] sm:$0xf0] }
 0x231   :  { %v5180_v1 = vadd.f32 %v1635_v36, %v1467_v42  ;;  %v5182_v10 = vpop.f32.mrf.mxu1  ;;  %v1469_v42 = vadd.f32 %v5110_v17, %v4853_v11  ;;  %v5214_v13 = vor.u32 %v4201_v30, %v3656_v53  ;;  %v3674_v11 = vld [vmem:[%s7331_s1 + $0x78] sm:$0xf0] }
 0x232   :  { %v5226_v8 = vor.u32 %v4203_v0, %v3674_v11  ;;  %v4234_v0 = vld [vmem:[%s7331_s1 + $0x164] sm:$0xf]  ;;  %v3672_v11 = vld [vmem:[%s7331_s1 + $0x68] sm:$0xf] }
 0x233   :  { %7492 = vst [vmem:[#allocation44_spill] sm:$0xff] %v5180_v1 }
 0x234   :  { %7496 = vst [vmem:[#allocation48_spill] sm:$0xff] %v5214_v13 }
 0x235   :  { %7497 = vst [vmem:[#allocation49_spill] sm:$0xff] %v5226_v8 }
 0x237   :  { %v1517_v43 = vpop.f32.mrf.mxu2 }
 0x238   :  { %v5206_v36 = vadd.f32 %v1517_v43, %v1349_v60  ;;  %v1637_v28 = vpop.f32.mrf.mxu3  ;;  %v1354_v43 = vadd.f32 %v5110_v17, %v4870_v20 }
 0x239   :  { %v5212_v62 = vadd.f32 %v1637_v28, %v1469_v42  ;;  %v5216_v24 = vpop.f32.mrf.mxu1  ;;  %v1352_v28 = vadd.f32 %v5110_v17, %v4861_v19  ;;  %v3794_v19 = vld [vmem:[%s7331_s1 + $0x170] sm:$0xf0]  ;;  %v4268_v42 = vld [vmem:[%s7331_s1 + $0x26c] sm:$0xf0] }
 0x23b   :  { %7495 = vst [vmem:[#allocation47_spill] sm:$0xff] %v5212_v62  ;;  %v3786_v62 = vld [vmem:[%s7331_s1 + $0x158] sm:$0xf0] }
 0x23c   :  { %1559 = vmatmul.bf16.gmra.mxu2 %v5208_v34  ;;  %1430 = vmatmul.bf16.gmra.mxu1 %v5210_v23  ;;  %v5264_v34 = vor.u32 %v4234_v0, %v3794_v19  ;;  %v1477_v19 = vadd.f32 %v5110_v17, %v4907_v52  ;;  %v3936_v52 = vld [vmem:[%s7331_s1 + $0x280] sm:$0xf] }
 0x23d   :  { %1688 = vmatmul.bf16.gmra.mxu3 %v5214_v13  ;;  %v5266_v13 = vor.u32 %v4268_v42, %v3920_v22 }
 0x23e   :  { %7499 = vst [vmem:[#allocation51_spill] sm:$0xff] %v5264_v34 }
 0x23f   :  { %v1520_v61 = vpop.f32.mrf.mxu2  ;;  %7500 = vst [vmem:[#allocation52_spill] sm:$0xff] %v5266_v13 }
 0x240   :  { %v5233_v21 = vadd.f32 %v1520_v61, %v1352_v28  ;;  %v1640_v60 = vpop.f32.mrf.mxu3  ;;  %1862 = vmatmul.bf16.gmra.mxu0 %v5226_v8  ;;  %v4205_v28 = vld [vmem:[%s7331_s1 + $0x74] sm:$0xf0] }
 0x241   :  { %v5236_v53 = vadd.f32 %v1640_v60, %v1472_v59  ;;  %v5238_v30 = vpop.f32.mrf.mxu1  ;;  %v1474_v59 = vadd.f32 %v5110_v17, %v4892_v38  ;;  %v5270_v23 = vor.u32 %v4205_v28, %v3672_v11  ;;  %v3690_v38 = vld [vmem:[%s7331_s1 + $0x98] sm:$0xf0] }
 0x242   :  { %v5282_v0 = vor.u32 %v4207_v39, %v3690_v38  ;;  %v4238_v39 = vld [vmem:[%s7331_s1 + $0x184] sm:$0xf]  ;;  %v3688_v38 = vld [vmem:[%s7331_s1 + $0x88] sm:$0xf] }
 0x243   :  { %7498 = vst [vmem:[#allocation50_spill] sm:$0xff] %v5236_v53  ;;  %v4231_v53 = vld [vmem:[%s7331_s1 + $0x14c] sm:$0xf] }
 0x244   :  { %7502 = vst [vmem:[#allocation54_spill] sm:$0xff] %v5270_v23 }
 0x245   :  { %7503 = vst [vmem:[#allocation55_spill] sm:$0xff] %v5282_v0 }
 0x247   :  { %v1522_v61 = vpop.f32.mrf.mxu2 }
 0x248   :  { %v5262_v60 = vadd.f32 %v1522_v61, %v1354_v43  ;;  %v1642_v8 = vpop.f32.mrf.mxu3  ;;  %v1359_v61 = vadd.f32 %v5110_v17, %v4909_v2 }
 0x249   :  { %v5268_v20 = vadd.f32 %v1642_v8, %v1474_v59  ;;  %v5272_v57 = vpop.f32.mrf.mxu1  ;;  %v1357_v8 = vadd.f32 %v5110_v17, %v4900_v50  ;;  %v3810_v50 = vld [vmem:[%s7331_s1 + $0x190] sm:$0xf0]  ;;  %v4272_v59 = vld [vmem:[%s7331_s1 + $0x28c] sm:$0xf0] }
 0x24b   :  { %7501 = vst [vmem:[#allocation53_spill] sm:$0xff] %v5268_v20  ;;  %v4211_v20 = vld [vmem:[%s7331_s1 + $0xac] sm:$0xf] }
 0x24c   :  { %1564 = vmatmul.bf16.gmra.mxu2 %v5264_v34  ;;  %1435 = vmatmul.bf16.gmra.mxu1 %v5266_v13  ;;  %v5320_v34 = vor.u32 %v4238_v39, %v3810_v50  ;;  %v1482_v50 = vadd.f32 %v5110_v17, %v4944_v58  ;;  %v3952_v58 = vld [vmem:[%s7331_s1 + $0x2a0] sm:$0xf] }
 0x24d   :  { %1693 = vmatmul.bf16.gmra.mxu3 %v5270_v23  ;;  %v5322_v23 = vor.u32 %v4272_v59, %v3936_v52 }
 0x24e   :  { %7505 = vst [vmem:[#allocation57_spill] sm:$0xff] %v5320_v34 }
 0x24f   :  { %v1525_v22 = vpop.f32.mrf.mxu2  ;;  %7506 = vst [vmem:[#allocation58_spill] sm:$0xff] %v5322_v23 }
 0x250   :  { %v5289_v42 = vadd.f32 %v1525_v22, %v1357_v8  ;;  %v1645_v43 = vpop.f32.mrf.mxu3  ;;  %1867 = vmatmul.bf16.gmra.mxu0 %v5282_v0  ;;  %v4209_v8 = vld [vmem:[%s7331_s1 + $0x94] sm:$0xf0] }
 0x251   :  { %v5292_v11 = vadd.f32 %v1645_v43, %v1477_v19  ;;  %v5294_v28 = vpop.f32.mrf.mxu1  ;;  %v1479_v19 = vadd.f32 %v5110_v17, %v4931_v33  ;;  %v5326_v13 = vor.u32 %v4209_v8, %v3688_v38  ;;  %v3706_v33 = vld [vmem:[%s7331_s1 + $0xb8] sm:$0xf0] }
 0x252   :  { %v5338_v39 = vor.u32 %v4211_v20, %v3706_v33  ;;  %v4242_v20 = vld [vmem:[%s7331_s1 + $0x1a4] sm:$0xf]  ;;  %v3704_v33 = vld [vmem:[%s7331_s1 + $0xa8] sm:$0xf] }
 0x253   :  { %7504 = vst [vmem:[#allocation56_spill] sm:$0xff] %v5292_v11 }
 0x254   :  { %7508 = vst [vmem:[#allocation60_spill] sm:$0xff] %v5326_v13 }
 0x255   :  { %7509 = vst [vmem:[#allocation61_spill] sm:$0xff] %v5338_v39 }
 0x257   :  { %v1527_v22 = vpop.f32.mrf.mxu2 }
 0x258   :  { %v5318_v43 = vadd.f32 %v1527_v22, %v1359_v61  ;;  %v1647_v0 = vpop.f32.mrf.mxu3  ;;  %v1364_v22 = vadd.f32 %v5110_v17, %v4946_v41 }
 0x259   :  { %v5324_v2 = vadd.f32 %v1647_v0, %v1479_v19  ;;  %v5328_v11 = vpop.f32.mrf.mxu1  ;;  %v1362_v0 = vadd.f32 %v5110_v17, %v4939_v49  ;;  %v3826_v49 = vld [vmem:[%s7331_s1 + $0x1b0] sm:$0xf0]  ;;  %v4276_v19 = vld [vmem:[%s7331_s1 + $0x2ac] sm:$0xf0] }
 0x25b   :  { %7507 = vst [vmem:[#allocation59_spill] sm:$0xff] %v5324_v2  ;;  %v4215_v2 = vld [vmem:[%s7331_s1 + $0xcc] sm:$0xf] }
 0x25c   :  { %1569 = vmatmul.bf16.gmra.mxu2 %v5320_v34  ;;  %1440 = vmatmul.bf16.gmra.mxu1 %v5322_v23  ;;  %v5376_v34 = vor.u32 %v4242_v20, %v3826_v49  ;;  %v1487_v49 = vadd.f32 %v5110_v17, %v4979_v26  ;;  %v4246_v26 = vld [vmem:[%s7331_s1 + $0x1c4] sm:$0xf] }
 0x25d   :  { %1698 = vmatmul.bf16.gmra.mxu3 %v5326_v13  ;;  %v5378_v13 = vor.u32 %v4276_v19, %v3952_v58 }
 0x25e   :  { %7511 = vst [vmem:[#allocation63_spill] sm:$0xff] %v5376_v34 }
 0x25f   :  { %v1530_v52 = vpop.f32.mrf.mxu2  ;;  %7512 = vst [vmem:[#allocation64_spill] sm:$0xff] %v5378_v13 }
 0x260   :  { %v5345_v59 = vadd.f32 %v1530_v52, %v1362_v0  ;;  %v1650_v61 = vpop.f32.mrf.mxu3  ;;  %1872 = vmatmul.bf16.gmra.mxu0 %v5338_v39  ;;  %v4213_v0 = vld [vmem:[%s7331_s1 + $0xb4] sm:$0xf0] }
 0x261   :  { %v5348_v38 = vadd.f32 %v1650_v61, %v1482_v50  ;;  %v5350_v8 = vpop.f32.mrf.mxu1  ;;  %v1484_v50 = vadd.f32 %v5110_v17, %v4966_v37  ;;  %v5382_v23 = vor.u32 %v4213_v0, %v3704_v33  ;;  %v3722_v37 = vld [vmem:[%s7331_s1 + $0xd8] sm:$0xf0] }
 0x262   :  { %v5394_v20 = vor.u32 %v4215_v2, %v3722_v37  ;;  %v4358_v33 = vld [vmem:[%s7333_s4 + $0x38] sm:$0xff]  ;;  %v4280_v37 = vld [vmem:[%s7331_s1 + $0x2cc] sm:$0xf0] }
 0x263   :  { %7510 = vst [vmem:[#allocation62_spill] sm:$0xff] %v5348_v38  ;;  %2168 = vmatpush.bf16.msrb.mxu1 %v4358_v33 }
 0x264   :  { %7514 = vst [vmem:[#allocation66_spill] sm:$0xff] %v5382_v23 }
 0x265   :  { %7515 = vst [vmem:[#allocation67_spill] sm:$0xff] %v5394_v20 }
 0x267   :  { %v1532_v52 = vpop.f32.mrf.mxu2 }
 0x268   :  { %v5374_v61 = vadd.f32 %v1532_v52, %v1364_v22  ;;  %v1652_v39 = vpop.f32.mrf.mxu3  ;;  %v3968_v52 = vld [vmem:[%s7331_s1 + $0x2c0] sm:$0xf] }
 0x269   :  { %v5380_v41 = vadd.f32 %v1652_v39, %v1484_v50  ;;  %v5384_v38 = vpop.f32.mrf.mxu1  ;;  %v1367_v39 = vadd.f32 %v5110_v17, %v4974_v46  ;;  %v4357_v46 = vld [vmem:[%s7333_s4 + $0x30] sm:$0xff] }
 0x26a   :  { %v3842_v50 = vld [vmem:[%s7331_s1 + $0x1d0] sm:$0xf0]  ;;  %2169 = vmatpush.bf16.msrb.mxu1 %v4357_v46 }
 0x26b   :  { %7513 = vst [vmem:[#allocation65_spill] sm:$0xff] %v5380_v41 }
 0x26c   :  { %1574 = vmatmul.bf16.gmra.mxu2 %v5376_v34  ;;  %1445 = vmatmul.bf16.gmra.mxu1 %v5378_v13  ;;  %v5440_v13 = vor.u32 %v4280_v37, %v3968_v52  ;;  %v1372_v52 = vadd.f32 %v5110_v17, %v5009_v48  ;;  %v1492_v37 = vadd.f32 %v5110_v17, %v5014_v56  ;;  %v4250_v48 = vld [vmem:[%s7331_s1 + $0x1e4] sm:$0xf]  ;;  %v4353_v56 = vld [vmem:[%s7333_s4 + $0x10] sm:$0xff] }
 0x26d   :  { %1703 = vmatmul.bf16.gmra.mxu3 %v5382_v23  ;;  %v5438_v23 = vor.u32 %v4246_v26, %v3842_v50  ;;  %v3738_v26 = vld [vmem:[%s7331_s1 + $0xf8] sm:$0xf0] }
 0x26e   :  { %7518 = vst [vmem:[#allocation70_spill] sm:$0xff] %v5440_v13 }
 0x26f   :  { %v1535_v58 = vpop.f32.mrf.mxu2  ;;  %7517 = vst [vmem:[#allocation69_spill] sm:$0xff] %v5438_v23 }
 0x270   :  { %v5401_v19 = vadd.f32 %v1535_v58, %v1367_v39  ;;  %v1655_v22 = vpop.f32.mrf.mxu3  ;;  %1877 = vmatmul.bf16.gmra.mxu0 %v5394_v20  ;;  %v1369_v39 = vadd.f32 %v5110_v17, %v4981_v16  ;;  %v4217_v58 = vld [vmem:[%s7331_s1 + $0xd4] sm:$0xf0]  ;;  %v4356_v16 = vld [vmem:[%s7333_s4 + $0x28] sm:$0xff] }
 0x271   :  { %v5407_v2 = vadd.f32 %v1655_v22, %v1487_v49  ;;  %v5409_v0 = vpop.f32.mrf.mxu1  ;;  %v3720_v49 = vld [vmem:[%s7331_s1 + $0xc8] sm:$0xf]  ;;  %v1489_v22 = vadd.f32 %v5110_v17, %v5001_v55  ;;  %v4219_v55 = vld [vmem:[%s7331_s1 + $0xec] sm:$0xf]  ;;  %2170 = vmatpush.bf16.msrb.mxu1 %v4356_v16 }
 0x272   :  { %v5447_v41 = vor.u32 %v4217_v58, %v3720_v49  ;;  %v5459_v50 = vor.u32 %v4219_v55, %v3738_v26  ;;  %v3858_v55 = vld [vmem:[%s7331_s1 + $0x1f0] sm:$0xf0]  ;;  %v3984_v26 = vld [vmem:[%s7331_s1 + $0x2e0] sm:$0xf] }
 0x273   :  { %7516 = vst [vmem:[#allocation68_spill] sm:$0xff] %v5407_v2 }
 0x274   :  { %7520 = vst [vmem:[#allocation72_spill] sm:$0xff] %v5447_v41 }
 0x275   :  { %7521 = vst [vmem:[#allocation73_spill] sm:$0xff] %v5459_v50 }
 0x277   :  { %v1537_v33 = vpop.f32.mrf.mxu2 }
 0x278   :  { %v5436_v20 = vadd.f32 %v1537_v33, %v1369_v39  ;;  %v1657_v34 = vpop.f32.mrf.mxu3 }
 0x279   :  { %v5445_v2 = vadd.f32 %v1657_v34, %v1489_v22  ;;  %v5449_v46 = vpop.f32.mrf.mxu1  ;;  %v4355_v34 = vld [vmem:[%s7333_s4 + $0x20] sm:$0xff]  ;;  %v4354_v22 = vld [vmem:[%s7333_s4 + $0x18] sm:$0xff] }
 0x27a   :  { %2171 = vmatpush.bf16.msrb.mxu1 %v4355_v34  ;;  %v4284_v34 = vld [vmem:[%s7331_s1 + $0x2ec] sm:$0xf0] }
 0x27b   :  { %7519 = vst [vmem:[#allocation71_spill] sm:$0xff] %v5445_v2 }
 0x27c   :  { %1579 = vmatmul.bf16.gmra.mxu2 %v5438_v23  ;;  %1450 = vmatmul.bf16.gmra.mxu1 %v5440_v13  ;;  %v5508_v13 = vor.u32 %v4284_v34, %v3984_v26  ;;  %v1377_v34 = vadd.f32 %v5110_v17, %v5047_v7  ;;  %v3874_v7 = vld [vmem:[%s7331_s1 + $0x210] sm:$0xf0] }
 0x27d   :  { %1708 = vmatmul.bf16.gmra.mxu3 %v5447_v41  ;;  %v5506_v41 = vor.u32 %v4250_v48, %v3858_v55  ;;  %v3754_v48 = vld [vmem:[%s7331_s1 + $0x118] sm:$0xf0] }
 0x27e   :  { %2172 = vmatpush.bf16.msrb.mxu1 %v4354_v22  ;;  %7524 = vst [vmem:[#allocation76_spill] sm:$0xff] %v5508_v13 }
 0x27f   :  { %v1540_v39 = vpop.f32.mrf.mxu2  ;;  %7523 = vst [vmem:[#allocation75_spill] sm:$0xff] %v5506_v41 }
 0x280   :  { %v5469_v49 = vadd.f32 %v1540_v39, %v1372_v52  ;;  %v1660_v58 = vpop.f32.mrf.mxu3  ;;  %1882 = vmatmul.bf16.gmra.mxu0 %v5459_v50  ;;  %v1374_v52 = vadd.f32 %v5110_v17, %v5016_v4  ;;  %v4221_v39 = vld [vmem:[%s7331_s1 + $0xf4] sm:$0xf0]  ;;  %v4352_v4 = vld [vmem:[%s7333_s4 + $0x8] sm:$0xff] }
 0x281   :  { %v5475_v33 = vadd.f32 %v1660_v58, %v1492_v37  ;;  %v5477_v16 = vpop.f32.mrf.mxu1  ;;  %v3736_v37 = vld [vmem:[%s7331_s1 + $0xe8] sm:$0xf]  ;;  %v1494_v58 = vadd.f32 %v5110_v17, %v5039_v3  ;;  %v4223_v3 = vld [vmem:[%s7331_s1 + $0x10c] sm:$0xf] }
 0x282   :  { %2173 = vmatpush.bf16.msrb.mxu1 %v4353_v56  ;;  %v5515_v2 = vor.u32 %v4221_v39, %v3736_v37  ;;  %v5527_v55 = vor.u32 %v4223_v3, %v3754_v48  ;;  %v4254_v3 = vld [vmem:[%s7331_s1 + $0x204] sm:$0xf] }
 0x283   :  { %7522 = vst [vmem:[#allocation74_spill] sm:$0xff] %v5475_v33 }
 0x284   :  { %7526 = vst [vmem:[#allocation78_spill] sm:$0xff] %v5515_v2 }
 0x285   :  { %7527 = vst [vmem:[#allocation79_spill] sm:$0xff] %v5527_v55 }
 0x286   :  { %2174 = vmatpush.bf16.msrb.mxu1 %v4352_v4 }
 0x287   :  { %v1542_v22 = vpop.f32.mrf.mxu2 }
 0x288   :  { %v5504_v50 = vadd.f32 %v1542_v22, %v1374_v52  ;;  %v1662_v23 = vpop.f32.mrf.mxu3  ;;  %v1497_v52 = vadd.f32 %v5110_v17, %v5064_v29  ;;  %v1379_v29 = vadd.f32 %v5110_v17, %v5067_v5 }
 0x289   :  { %v5513_v33 = vadd.f32 %v1662_v23, %v1494_v58  ;;  %v5517_v56 = vpop.f32.mrf.mxu1  ;;  %v4351_v23 = vld [vmem:[%s7333_s4] sm:$0xff] }
 0x28a   :  { %2175 = vmatpush.bf16.msrb.mxu1 %v4351_v23  ;;  %v3752_v23 = vld [vmem:[%s7331_s1 + $0x108] sm:$0xf] }
 0x28b   :  { %7525 = vst [vmem:[#allocation77_spill] sm:$0xff] %v5513_v33 }
 0x28c   :  { %1584 = vmatmul.bf16.gmra.mxu2 %v5506_v41  ;;  %1455 = vmatmul.bf16.gmra.mxu1 %v5508_v13  ;;  %v5562_v41 = vor.u32 %v4254_v3, %v3874_v7  ;;  %v1382_v3 = vadd.f32 %v5110_v17, %v5099_v51  ;;  %v1384_v51 = vadd.f32 %v5110_v17, %v5126_v18 }
 0x28d   :  { %1713 = vmatmul.bf16.gmra.mxu3 %v5515_v2  ;;  %v1848_v26 = vpop.f32.mrf.mxu0 }
 0x28e   :  { %7529 = vst [vmem:[#allocation81_spill] sm:$0xff] %v5562_v41 }
 0x28f   :  { %v1545_v37 = vpop.f32.mrf.mxu2 }
 0x290   :  { %v5537_v39 = vadd.f32 %v1545_v37, %v1377_v34  ;;  %v1665_v58 = vpop.f32.mrf.mxu3  ;;  %1887 = vmatmul.bf16.gmra.mxu0 %v5527_v55  ;;  %v4225_v34 = vld [vmem:[%s7331_s1 + $0x114] sm:$0xf0] }
 0x291   :  { %v5540_v22 = vadd.f32 %v1665_v58, %v1497_v52  ;;  %v5542_v4 = vpop.f32.mrf.mxu1  ;;  %v1499_v52 = vadd.f32 %v5110_v17, %v5091_v12  ;;  %v5566_v5 = vor.u32 %v4225_v34, %v3752_v23  ;;  %v3770_v12 = vld [vmem:[%s7331_s1 + $0x138] sm:$0xf0] }
 0x293   :  { %7528 = vst [vmem:[#allocation80_spill] sm:$0xff] %v5540_v22  ;;  %v4227_v22 = vld [vmem:[%s7331_s1 + $0x12c] sm:$0xf] }
 0x294   :  { %7531 = vst [vmem:[#allocation83_spill] sm:$0xff] %v5566_v5 }
 0x295   :  { %v1850_v48 = vpop.f32.mrf.mxu0 }
 0x297   :  { %v1547_v37 = vpop.f32.mrf.mxu2 }
 0x298   :  { %v5560_v58 = vadd.f32 %v1547_v37, %v1379_v29  ;;  %v1667_v55 = vpop.f32.mrf.mxu3  ;;  %v5577_v29 = vor.u32 %v4227_v22, %v3770_v12  ;;  %v4258_v22 = vld [vmem:[%s7331_s1 + $0x224] sm:$0xf]  ;;  %v3890_v12 = vld [vmem:[%s7331_s1 + $0x230] sm:$0xf0] }
 0x299   :  { %v5564_v2 = vadd.f32 %v1667_v55, %v1499_v52  ;;  %v5568_v13 = vpop.f32.mrf.mxu1 }
 0x29a   :  { %7532 = vst [vmem:[#allocation84_spill] sm:$0xff] %v5577_v29 }
 0x29b   :  { %7530 = vst [vmem:[#allocation82_spill] sm:$0xff] %v5564_v2 }
 0x29c   :  { %1589 = vmatmul.bf16.gmra.mxu2 %v5562_v41 }
 0x29d   :  { %1718 = vmatmul.bf16.gmra.mxu3 %v5566_v5  ;;  %v1853_v55 = vpop.f32.mrf.mxu0  ;;  %v5604_v5 = vor.u32 %v4258_v22, %v3890_v12  ;;  %v5618_v22 = vor.u32 %v4231_v53, %v3786_v62  ;;  %v4262_v53 = vld [vmem:[%s7331_s1 + $0x244] sm:$0xf] }
 0x29f   :  { %v1550_v7 = vpop.f32.mrf.mxu2  ;;  %7533 = vst [vmem:[#allocation85_spill] sm:$0xff] %v5604_v5 }
 0x2a0   :  { %v5582_v23 = vadd.f32 %v1550_v7, %v1382_v3  ;;  %v1679_v34 = vpop.f32.mrf.mxu3  ;;  %1892 = vmatmul.bf16.gmra.mxu0 %v5577_v29  ;;  %v3768_v3 = vld [vmem:[%s7331_s1 + $0x128] sm:$0xf]  ;;  %7535 = vst [vmem:[#allocation87_spill] sm:$0xff] %v5618_v22 }
 0x2a1   :  { %v5585_v52 = vpop.f32.mrf.mxu1  ;;  %v1680_v37 = vadd.f32 %v1679_v34, %v5121_v47  ;;  %v4229_v47 = vld [vmem:[%s7331_s1 + $0x134] sm:$0xf0] }
 0x2a2   :  { %v5607_v40 = vor.u32 %v4229_v47, %v3768_v3 }
 0x2a3   :  { %v1849_v2 = vadd.f32 %v1848_v26, %v1680_v37 }
 0x2a4   :  { %7534 = vst [vmem:[#allocation86_spill] sm:$0xff] %v5607_v40 }
 0x2a5   :  { %v1855_v41 = vpop.f32.mrf.mxu0  ;;  %v2008_v26 = vmax.f32 %v1849_v2, 0.0 }
 0x2a7   :  { %v1552_v7 = vpop.f32.mrf.mxu2 }
 0x2a8   :  { %v5602_v34 = vadd.f32 %v1552_v7, %v1384_v51  ;;  %v1681_v29 = vpop.f32.mrf.mxu3 }
 0x2a9   :  { %v1682_v33 = vadd.f32 %v1681_v29, %v5150_v32  ;;  %v5609_v18 = vpop.f32.mrf.mxu1  ;;  %v1387_v29 = vadd.f32 %v5110_v17, %v5160_v14  ;;  %v3906_v14 = vld [vmem:[%s7331_s1 + $0x250] sm:$0xf0] }
 0x2ab   :  { %v1851_v51 = vadd.f32 %v1850_v48, %v1682_v33  ;;  %v1389_v48 = vadd.f32 %v5110_v17, %v5182_v10 }
 0x2ac   :  { %1594 = vmatmul.bf16.gmra.mxu2 %v5604_v5  ;;  %v4235_v5 = vld [vmem:[%s7331_s1 + $0x16c] sm:$0xf] }
 0x2ad   :  { %v2009_v37 = vmax.f32 %v1851_v51, 0.0  ;;  %1723 = vmatmul.bf16.gmra.mxu3 %v5607_v40  ;;  %v1858_v32 = vpop.f32.mrf.mxu0  ;;  %v3784_v51 = vld [vmem:[%s7331_s1 + $0x148] sm:$0xf]  ;;  %v3802_v40 = vld [vmem:[%s7331_s1 + $0x178] sm:$0xf0] }
 0x2af   :  { %v2072_v12 = vpack.c.bf16 %v2009_v37, %v2008_v26  ;;  %v1555_v3 = vpop.f32.mrf.mxu2 }
 0x2b0   :  { %v5623_v47 = vadd.f32 %v1555_v3, %v1387_v29  ;;  %v1684_v7 = vpop.f32.mrf.mxu3  ;;  %1897 = vmatmul.bf16.gmra.mxu0 %v5618_v22 }
 0x2b1   :  { %2176 = vmatmul.bf16.vlgmr.msrb.gmra.mxu1 %v2072_v12  ;;  %v5626_v33 = vpop.f32.mrf.mxu1  ;;  %v1685_v62 = vadd.f32 %v1684_v7, %v5177_v6  ;;  %v4233_v6 = vld [vmem:[%s7331_s1 + $0x154] sm:$0xf0]  ;;  %v5645_v12 = vor.u32 %v4262_v53, %v3906_v14  ;;  %v5659_v53 = vor.u32 %v4235_v5, %v3802_v40  ;;  %v1392_v14 = vadd.f32 %v5110_v17, %v5216_v24  ;;  %v4266_v5 = vld [vmem:[%s7331_s1 + $0x264] sm:$0xf]  ;;  %v3922_v24 = vld [vmem:[%s7331_s1 + $0x270] sm:$0xf0] }
 0x2b2   :  { %v5648_v22 = vor.u32 %v4233_v6, %v3784_v51 }
 0x2b3   :  { %7536 = vst [vmem:[#allocation88_spill] sm:$0xff] %v5645_v12  ;;  %v1854_v3 = vadd.f32 %v1853_v55, %v1685_v62 }
 0x2b4   :  { %7537 = vst [vmem:[#allocation89_spill] sm:$0xff] %v5648_v22 }
 0x2b5   :  { %v1860_v2 = vpop.f32.mrf.mxu0  ;;  %7538 = vst [vmem:[#allocation90_spill] sm:$0xff] %v5659_v53  ;;  %v2010_v55 = vmax.f32 %v1854_v3, 0.0 }
 0x2b7   :  { %v1557_v26 = vpop.f32.mrf.mxu2 }
 0x2b8   :  { %v5643_v37 = vadd.f32 %v1557_v26, %v1389_v48  ;;  %v1686_v29 = vpop.f32.mrf.mxu3 }
 0x2b9   :  { %v1687_v7 = vadd.f32 %v1686_v29, %v5206_v36  ;;  %v5650_v10 = vpop.f32.mrf.mxu1 }
 0x2bb   :  { %v1856_v48 = vadd.f32 %v1855_v41, %v1687_v7  ;;  %v1394_v7 = vadd.f32 %v5110_v17, %v5238_v30  ;;  %v4239_v30 = vld [vmem:[%s7331_s1 + $0x18c] sm:$0xf] }
 0x2bc   :  { %1599 = vmatmul.bf16.gmra.mxu2 %v5645_v12  ;;  %v3818_v12 = vld [vmem:[%s7331_s1 + $0x198] sm:$0xf0] }
 0x2bd   :  { %v2011_v62 = vmax.f32 %v1856_v48, 0.0  ;;  %1728 = vmatmul.bf16.gmra.mxu3 %v5648_v22  ;;  %v1863_v36 = vpop.f32.mrf.mxu0  ;;  %v3800_v48 = vld [vmem:[%s7331_s1 + $0x168] sm:$0xf] }
 0x2bf   :  { %v1560_v51 = vpop.f32.mrf.mxu2  ;;  %v2073_v6 = vpack.c.bf16 %v2011_v62, %v2010_v55 }
 0x2c0   :  { %v5664_v26 = vadd.f32 %v1560_v51, %v1392_v14  ;;  %v1689_v29 = vpop.f32.mrf.mxu3  ;;  %1902 = vmatmul.bf16.gmra.mxu0 %v5659_v53  ;;  %v5686_v51 = vor.u32 %v4266_v5, %v3922_v24  ;;  %v5700_v5 = vor.u32 %v4239_v30, %v3818_v12  ;;  %v1397_v24 = vadd.f32 %v5110_v17, %v5272_v57  ;;  %v3938_v12 = vld [vmem:[%s7331_s1 + $0x290] sm:$0xf0] }
 0x2c1   :  { %2181 = vmatmul.bf16.gmra.mxu1 %v2073_v6  ;;  %v5667_v41 = vpop.f32.mrf.mxu1  ;;  %v1690_v40 = vadd.f32 %v1689_v29, %v5233_v21  ;;  %v4237_v21 = vld [vmem:[%s7331_s1 + $0x174] sm:$0xf0]  ;;  %v1399_v57 = vadd.f32 %v5110_v17, %v5294_v28  ;;  %v4243_v28 = vld [vmem:[%s7331_s1 + $0x1ac] sm:$0xf] }
 0x2c2   :  { %7539 = vst [vmem:[#allocation91_spill] sm:$0xff] %v5686_v51  ;;  %v5689_v53 = vor.u32 %v4237_v21, %v3800_v48 }
 0x2c3   :  { %v1859_v6 = vadd.f32 %v1858_v32, %v1690_v40  ;;  %7541 = vst [vmem:[#allocation93_spill] sm:$0xff] %v5700_v5 }
 0x2c4   :  { %7540 = vst [vmem:[#allocation92_spill] sm:$0xff] %v5689_v53 }
 0x2c5   :  { %v1865_v3 = vpop.f32.mrf.mxu0  ;;  %v2012_v32 = vmax.f32 %v1859_v6, 0.0 }
 0x2c7   :  { %v1562_v55 = vpop.f32.mrf.mxu2 }
 0x2c8   :  { %v5684_v62 = vadd.f32 %v1562_v55, %v1394_v7  ;;  %v1691_v14 = vpop.f32.mrf.mxu3 }
 0x2c9   :  { %v1692_v29 = vadd.f32 %v1691_v14, %v5262_v60  ;;  %v5698_v7 = vpop.f32.mrf.mxu1 }
 0x2cb   :  { %v1861_v22 = vadd.f32 %v1860_v2, %v1692_v29  ;;  %v3816_v29 = vld [vmem:[%s7331_s1 + $0x188] sm:$0xf] }
 0x2cc   :  { %1604 = vmatmul.bf16.gmra.mxu2 %v5686_v51 }
 0x2cd   :  { %v2013_v40 = vmax.f32 %v1861_v22, 0.0  ;;  %1733 = vmatmul.bf16.gmra.mxu3 %v5689_v53  ;;  %v1868_v60 = vpop.f32.mrf.mxu0  ;;  %v4270_v22 = vld [vmem:[%s7331_s1 + $0x284] sm:$0xf] }
 0x2cf   :  { %v1565_v48 = vpop.f32.mrf.mxu2  ;;  %v2074_v21 = vpack.c.bf16 %v2013_v40, %v2012_v32 }
 0x2d0   :  { %v5705_v55 = vadd.f32 %v1565_v48, %v1397_v24  ;;  %v1694_v14 = vpop.f32.mrf.mxu3  ;;  %1907 = vmatmul.bf16.gmra.mxu0 %v5700_v5  ;;  %v5727_v48 = vor.u32 %v4270_v22, %v3938_v12  ;;  %v3834_v5 = vld [vmem:[%s7331_s1 + $0x1b8] sm:$0xf0] }
 0x2d1   :  { %2186 = vmatmul.bf16.gmra.mxu1 %v2074_v21  ;;  %v1695_v2 = vadd.f32 %v1694_v14, %v5289_v42  ;;  %v4241_v42 = vld [vmem:[%s7331_s1 + $0x194] sm:$0xf0]  ;;  %v5723_v30 = vpop.f32.mrf.mxu1 }
 0x2d2   :  { %7542 = vst [vmem:[#allocation94_spill] sm:$0xff] %v5727_v48  ;;  %v5730_v17 = vor.u32 %v4241_v42, %v3816_v29 }
 0x2d3   :  { %v1864_v21 = vadd.f32 %v1863_v36, %v1695_v2 }
 0x2d4   :  { %7543 = vst [vmem:[#allocation95_spill] sm:$0xff] %v5730_v17 }
 0x2d5   :  { %v1870_v6 = vpop.f32.mrf.mxu0  ;;  %v2014_v22 = vmax.f32 %v1864_v21, 0.0 }
 0x2d7   :  { %v1567_v32 = vpop.f32.mrf.mxu2 }
 0x2d8   :  { %v5725_v40 = vadd.f32 %v1567_v32, %v1399_v57  ;;  %v1696_v24 = vpop.f32.mrf.mxu3  ;;  %v5739_v57 = vor.u32 %v4243_v28, %v3834_v5  ;;  %v3832_v32 = vld [vmem:[%s7331_s1 + $0x1a8] sm:$0xf] }
 0x2d9   :  { %v1697_v14 = vadd.f32 %v1696_v24, %v5318_v43  ;;  %v5742_v29 = vpop.f32.mrf.mxu1  ;;  %v4245_v24 = vld [vmem:[%s7331_s1 + $0x1b4] sm:$0xf0] }
 0x2da   :  { %7544 = vst [vmem:[#allocation96_spill] sm:$0xff] %v5739_v57 }
 0x2db   :  { %v1866_v51 = vadd.f32 %v1865_v3, %v1697_v14  ;;  %v4274_v3 = vld [vmem:[%s7331_s1 + $0x2a4] sm:$0xf] }
 0x2dc   :  { %1609 = vmatmul.bf16.gmra.mxu2 %v5727_v48 }
 0x2dd   :  { %v2015_v12 = vmax.f32 %v1866_v51, 0.0  ;;  %1738 = vmatmul.bf16.gmra.mxu3 %v5730_v17  ;;  %v1873_v43 = vpop.f32.mrf.mxu0  ;;  %v3954_v51 = vld [vmem:[%s7331_s1 + $0x2b0] sm:$0xf0] }
 0x2de   :  { %v5758_v14 = vor.u32 %v4274_v3, %v3954_v51 }
 0x2df   :  { %v2075_v36 = vpack.c.bf16 %v2015_v12, %v2014_v22  ;;  %v5761_v22 = vor.u32 %v4245_v24, %v3832_v32  ;;  %v4247_v12 = vld [vmem:[%s7331_s1 + $0x1cc] sm:$0xf] }
 0x2e0   :  { %v1699_v2 = vpop.f32.mrf.mxu3  ;;  %1912 = vmatmul.bf16.gmra.mxu0 %v5739_v57  ;;  %7545 = vst [vmem:[#allocation97_spill] sm:$0xff] %v5758_v14 }
 0x2e1   :  { %2191 = vmatmul.bf16.gmra.mxu1 %v2075_v36  ;;  %v1700_v42 = vadd.f32 %v1699_v2, %v5345_v59  ;;  %7546 = vst [vmem:[#allocation98_spill] sm:$0xff] %v5761_v22  ;;  %v3850_v36 = vld [vmem:[%s7331_s1 + $0x1d8] sm:$0xf0]  ;;  %v5769_v2 = vpop.f32.mrf.mxu1 }
 0x2e2   :  { %v5772_v3 = vor.u32 %v4247_v12, %v3850_v36  ;;  %v4249_v12 = vld [vmem:[%s7331_s1 + $0x1d4] sm:$0xf0] }
 0x2e3   :  { %v1869_v59 = vadd.f32 %v1868_v60, %v1700_v42 }
 0x2e4   :  { %7547 = vst [vmem:[#allocation99_spill] sm:$0xff] %v5772_v3 }
 0x2e5   :  { %v1875_v5 = vpop.f32.mrf.mxu0  ;;  %v2016_v60 = vmax.f32 %v1869_v59, 0.0 }
 0x2e8   :  { %v1701_v21 = vpop.f32.mrf.mxu3 }
 0x2e9   :  { %v1702_v28 = vadd.f32 %v1701_v21, %v5374_v61  ;;  %v5776_v24 = vpop.f32.mrf.mxu1 }
 0x2eb   :  { %v1871_v57 = vadd.f32 %v1870_v6, %v1702_v28  ;;  %v4278_v6 = vld [vmem:[%s7331_s1 + $0x2c4] sm:$0xf]  ;;  %v3848_v28 = vld [vmem:[%s7331_s1 + $0x1c8] sm:$0xf] }
 0x2ec   :  { %1614 = vmatmul.bf16.gmra.mxu2 %v5758_v14 }
 0x2ed   :  { %v2017_v42 = vmax.f32 %v1871_v57, 0.0  ;;  %1743 = vmatmul.bf16.gmra.mxu3 %v5761_v22  ;;  %v1878_v61 = vpop.f32.mrf.mxu0  ;;  %v3970_v57 = vld [vmem:[%s7331_s1 + $0x2d0] sm:$0xf0] }
 0x2ef   :  { %v2076_v51 = vpack.c.bf16 %v2017_v42, %v2016_v60  ;;  %v5791_v60 = vor.u32 %v4278_v6, %v3970_v57 }
 0x2f0   :  { %v1704_v32 = vpop.f32.mrf.mxu3  ;;  %1917 = vmatmul.bf16.gmra.mxu0 %v5772_v3  ;;  %v3866_v3 = vld [vmem:[%s7331_s1 + $0x1f8] sm:$0xf0] }
 0x2f1   :  { %2196 = vmatmul.bf16.gmra.mxu1 %v2076_v51  ;;  %v1705_v21 = vadd.f32 %v1704_v32, %v5401_v19  ;;  %7548 = vst [vmem:[#allocation100_spill] sm:$0xff] %v5791_v60  ;;  %v5794_v51 = vor.u32 %v4249_v12, %v3848_v28  ;;  %v4251_v32 = vld [vmem:[%s7331_s1 + $0x1ec] sm:$0xf] }
 0x2f2   :  { %v5803_v22 = vor.u32 %v4251_v32, %v3866_v3 }
 0x2f3   :  { %v1874_v19 = vadd.f32 %v1873_v43, %v1705_v21  ;;  %7549 = vst [vmem:[#allocation101_spill] sm:$0xff] %v5794_v51  ;;  %v5806_v43 = vpop.f32.mrf.mxu1 }
 0x2f4   :  { %7550 = vst [vmem:[#allocation102_spill] sm:$0xff] %v5803_v22 }
 0x2f5   :  { %v1880_v59 = vpop.f32.mrf.mxu0  ;;  %v2018_v6 = vmax.f32 %v1874_v19, 0.0  ;;  %v4253_v19 = vld [vmem:[%s7331_s1 + $0x1f4] sm:$0xf0] }
 0x2f8   :  { %v1706_v36 = vpop.f32.mrf.mxu3 }
 0x2f9   :  { %v1707_v42 = vadd.f32 %v1706_v36, %v5436_v20  ;;  %v3864_v36 = vld [vmem:[%s7331_s1 + $0x1e8] sm:$0xf] }
 0x2fb   :  { %v1876_v14 = vadd.f32 %v1875_v5, %v1707_v42  ;;  %v4282_v5 = vld [vmem:[%s7331_s1 + $0x2e4] sm:$0xf]  ;;  %v5822_v42 = vpop.f32.mrf.mxu1 }
 0x2fc   :  { %1619 = vmatmul.bf16.gmra.mxu2 %v5791_v60 }
 0x2fd   :  { %v2019_v57 = vmax.f32 %v1876_v14, 0.0  ;;  %1748 = vmatmul.bf16.gmra.mxu3 %v5794_v51  ;;  %v1883_v20 = vpop.f32.mrf.mxu0  ;;  %v3986_v14 = vld [vmem:[%s7331_s1 + $0x2f0] sm:$0xf0] }
 0x2fe   :  { %v5824_v32 = vor.u32 %v4282_v5, %v3986_v14 }
 0x2ff   :  { %v2077_v21 = vpack.c.bf16 %v2019_v57, %v2018_v6 }
 0x300   :  { %v1709_v28 = vpop.f32.mrf.mxu3  ;;  %1922 = vmatmul.bf16.gmra.mxu0 %v5803_v22  ;;  %7551 = vst [vmem:[#allocation103_spill] sm:$0xff] %v5824_v32  ;;  %v3882_v22 = vld [vmem:[%s7331_s1 + $0x218] sm:$0xf0] }
 0x301   :  { %2201 = vmatmul.bf16.gmra.mxu1 %v2077_v21  ;;  %v1710_v12 = vadd.f32 %v1709_v28, %v5469_v49  ;;  %v5827_v21 = vor.u32 %v4253_v19, %v3864_v36  ;;  %v4255_v28 = vld [vmem:[%s7331_s1 + $0x20c] sm:$0xf] }
 0x302   :  { %v5836_v51 = vor.u32 %v4255_v28, %v3882_v22  ;;  %v3880_v22 = vld [vmem:[%s7331_s1 + $0x208] sm:$0xf] }
 0x303   :  { %v1879_v6 = vadd.f32 %v1878_v61, %v1710_v12  ;;  %7552 = vst [vmem:[#allocation104_spill] sm:$0xff] %v5827_v21  ;;  %v5840_v36 = vpop.f32.mrf.mxu1 }
 0x304   :  { %7553 = vst [vmem:[#allocation105_spill] sm:$0xff] %v5836_v51 }
 0x305   :  { %v1885_v3 = vpop.f32.mrf.mxu0  ;;  %v2020_v5 = vmax.f32 %v1879_v6, 0.0 }
 0x308   :  { %v1711_v49 = vpop.f32.mrf.mxu3 }
 0x309   :  { %v1712_v57 = vadd.f32 %v1711_v49, %v5504_v50 }
 0x30b   :  { %v1881_v60 = vadd.f32 %v1880_v59, %v1712_v57  ;;  %v4257_v59 = vld [vmem:[%s7331_s1 + $0x214] sm:$0xf0] }
 0x30c   :  { %1624 = vmatmul.bf16.gmra.mxu2 %v5824_v32  ;;  %v5850_v28 = vor.u32 %v4257_v59, %v3880_v22 }
 0x30d   :  { %v2021_v14 = vmax.f32 %v1881_v60, 0.0  ;;  %1753 = vmatmul.bf16.gmra.mxu3 %v5827_v21  ;;  %v1888_v50 = vpop.f32.mrf.mxu0 }
 0x30e   :  { %7554 = vst [vmem:[#allocation106_spill] sm:$0xff] %v5850_v28 }
 0x30f   :  { %v2078_v61 = vpack.c.bf16 %v2021_v14, %v2020_v5  ;;  %v4259_v5 = vld [vmem:[%s7331_s1 + $0x22c] sm:$0xf] }
 0x310   :  { %v1714_v12 = vpop.f32.mrf.mxu3  ;;  %1927 = vmatmul.bf16.gmra.mxu0 %v5836_v51 }
 0x311   :  { %2206 = vmatmul.bf16.gmra.mxu1 %v2078_v61  ;;  %v1715_v19 = vadd.f32 %v1714_v12, %v5537_v39  ;;  %v3898_v39 = vld [vmem:[%s7331_s1 + $0x238] sm:$0xf0]  ;;  %v5858_v61 = vpop.f32.mrf.mxu1 }
 0x312   :  { %v5860_v12 = vor.u32 %v4259_v5, %v3898_v39  ;;  %v3914_v39 = vld [vmem:[%s7331_s1 + $0x258] sm:$0xf0] }
 0x313   :  { %v1884_v6 = vadd.f32 %v1883_v20, %v1715_v19 }
 0x314   :  { %7555 = vst [vmem:[#allocation107_spill] sm:$0xff] %v5860_v12 }
 0x315   :  { %v1890_v49 = vpop.f32.mrf.mxu0  ;;  %v2022_v51 = vmax.f32 %v1884_v6, 0.0  ;;  %v4261_v6 = vld [vmem:[%s7331_s1 + $0x234] sm:$0xf0] }
 0x318   :  { %v1716_v60 = vpop.f32.mrf.mxu3 }
 0x319   :  { %v1717_v57 = vadd.f32 %v1716_v60, %v5560_v58  ;;  %v5865_v60 = vpop.f32.mrf.mxu1 }
 0x31b   :  { %v1886_v14 = vadd.f32 %v1885_v3, %v1717_v57  ;;  %v3896_v3 = vld [vmem:[%s7331_s1 + $0x228] sm:$0xf] }
 0x31d   :  { %v2023_v32 = vmax.f32 %v1886_v14, 0.0  ;;  %1758 = vmatmul.bf16.gmra.mxu3 %v5850_v28  ;;  %v1893_v58 = vpop.f32.mrf.mxu0 }
 0x31f   :  { %v2079_v20 = vpack.c.bf16 %v2023_v32, %v2022_v51  ;;  %v5874_v32 = vor.u32 %v4261_v6, %v3896_v3 }
 0x320   :  { %v1719_v19 = vpop.f32.mrf.mxu3  ;;  %1932 = vmatmul.bf16.gmra.mxu0 %v5860_v12 }
 0x321   :  { %2211 = vmatmul.bf16.gmra.mxu1 %v2079_v20  ;;  %v1720_v22 = vadd.f32 %v1719_v19, %v5582_v23  ;;  %7556 = vst [vmem:[#allocation108_spill] sm:$0xff] %v5874_v32  ;;  %v4263_v23 = vld [vmem:[%s7331_s1 + $0x24c] sm:$0xf] }
 0x322   :  { %v5882_v20 = vor.u32 %v4263_v23, %v3914_v39 }
 0x323   :  { %v1889_v5 = vadd.f32 %v1888_v50, %v1720_v22  ;;  %v5885_v22 = vpop.f32.mrf.mxu2 }
 0x324   :  { %7557 = vst [vmem:[#allocation109_spill] sm:$0xff] %v5882_v20 }
 0x325   :  { %v1895_v59 = vpop.f32.mrf.mxu0  ;;  %v2024_v19 = vmax.f32 %v1889_v5, 0.0  ;;  %v3912_v5 = vld [vmem:[%s7331_s1 + $0x248] sm:$0xf] }
 0x328   :  { %v1721_v57 = vpop.f32.mrf.mxu3 }
 0x329   :  { %v1722_v51 = vadd.f32 %v1721_v57, %v5602_v34 }
 0x32b   :  { %v1891_v14 = vadd.f32 %v1890_v49, %v1722_v51  ;;  %v4265_v51 = vld [vmem:[%s7331_s1 + $0x254] sm:$0xf0]  ;;  %v5901_v23 = vpop.f32.mrf.mxu2 }
 0x32d   :  { %v2025_v12 = vmax.f32 %v1891_v14, 0.0  ;;  %1763 = vmatmul.bf16.gmra.mxu3 %v5874_v32  ;;  %v1898_v50 = vpop.f32.mrf.mxu0 }
 0x32e   :  { %v5887_v34 = vpop.f32.mrf.mxu1 }
 0x32f   :  { %v2080_v3 = vpack.c.bf16 %v2025_v12, %v2024_v19  ;;  %v5904_v19 = vor.u32 %v4265_v51, %v3912_v5 }
 0x330   :  { %v1724_v6 = vpop.f32.mrf.mxu3  ;;  %1937 = vmatmul.bf16.gmra.mxu0 %v5882_v20 }
 0x331   :  { %2216 = vmatmul.bf16.gmra.mxu1 %v2080_v3  ;;  %v1725_v57 = vadd.f32 %v1724_v6, %v5623_v47  ;;  %7558 = vst [vmem:[#allocation110_spill] sm:$0xff] %v5904_v19  ;;  %v4267_v3 = vld [vmem:[%s7331_s1 + $0x26c] sm:$0xf]  ;;  %v3930_v6 = vld [vmem:[%s7331_s1 + $0x278] sm:$0xf0] }
 0x332   :  { %v5912_v32 = vor.u32 %v4267_v3, %v3930_v6 }
 0x333   :  { %v1894_v14 = vadd.f32 %v1893_v58, %v1725_v57  ;;  %v5918_v51 = vpop.f32.mrf.mxu2 }
 0x334   :  { %7559 = vst [vmem:[#allocation111_spill] sm:$0xff] %v5912_v32 }
 0x335   :  { %v1900_v28 = vpop.f32.mrf.mxu0  ;;  %v2026_v12 = vmax.f32 %v1894_v14, 0.0  ;;  %v4269_v14 = vld [vmem:[%s7331_s1 + $0x274] sm:$0xf0] }
 0x336   :  { %v5891_v49 = vpop.f32.mrf.mxu1 }
 0x338   :  { %v1726_v39 = vpop.f32.mrf.mxu3 }
 0x339   :  { %v1727_v47 = vadd.f32 %v1726_v39, %v5643_v37 }
 0x33b   :  { %v1896_v20 = vadd.f32 %v1895_v59, %v1727_v47 }
 0x33d   :  { %v2027_v21 = vmax.f32 %v1896_v20, 0.0  ;;  %1768 = vmatmul.bf16.gmra.mxu3 %v5904_v19  ;;  %v1903_v58 = vpop.f32.mrf.mxu0  ;;  %v3928_v20 = vld [vmem:[%s7331_s1 + $0x268] sm:$0xf] }
 0x33e   :  { %v5915_v57 = vpop.f32.mrf.mxu1  ;;  %v5932_v6 = vor.u32 %v4269_v14, %v3928_v20 }
 0x33f   :  { %v2081_v37 = vpack.c.bf16 %v2027_v21, %v2026_v12 }
 0x340   :  { %v1729_v5 = vpop.f32.mrf.mxu3  ;;  %1942 = vmatmul.bf16.gmra.mxu0 %v5912_v32  ;;  %7560 = vst [vmem:[#allocation112_spill] sm:$0xff] %v5932_v6  ;;  %v5940_v32 = vpop.f32.mrf.mxu2 }
 0x341   :  { %2221 = vmatmul.bf16.gmra.mxu1 %v2081_v37  ;;  %v1730_v39 = vadd.f32 %v1729_v5, %v5664_v26  ;;  %v4271_v26 = vld [vmem:[%s7331_s1 + $0x28c] sm:$0xf]  ;;  %v3946_v37 = vld [vmem:[%s7331_s1 + $0x298] sm:$0xf0] }
 0x342   :  { %v5942_v19 = vor.u32 %v4271_v26, %v3946_v37  ;;  %v4273_v26 = vld [vmem:[%s7331_s1 + $0x294] sm:$0xf0] }
 0x343   :  { %v1899_v47 = vadd.f32 %v1898_v50, %v1730_v39 }
 0x344   :  { %7561 = vst [vmem:[#allocation113_spill] sm:$0xff] %v5942_v19 }
 0x345   :  { %v1905_v48 = vpop.f32.mrf.mxu0  ;;  %v2028_v21 = vmax.f32 %v1899_v47, 0.0  ;;  %v3944_v47 = vld [vmem:[%s7331_s1 + $0x288] sm:$0xf] }
 0x346   :  { %v5921_v59 = vpop.f32.mrf.mxu1 }
 0x348   :  { %v1731_v12 = vpop.f32.mrf.mxu3 }
 0x349   :  { %v1732_v3 = vadd.f32 %v1731_v12, %v5684_v62 }
 0x34b   :  { %v1901_v5 = vadd.f32 %v1900_v28, %v1732_v3  ;;  %v5949_v28 = vpop.f32.mrf.mxu2 }
 0x34d   :  { %v2029_v17 = vmax.f32 %v1901_v5, 0.0  ;;  %1773 = vmatmul.bf16.gmra.mxu3 %v5932_v6  ;;  %v1908_v62 = vpop.f32.mrf.mxu0  ;;  %v5962_v5 = vor.u32 %v4273_v26, %v3944_v47 }
 0x34e   :  { %v5945_v50 = vpop.f32.mrf.mxu1 }
 0x34f   :  { %v2082_v39 = vpack.c.bf16 %v2029_v17, %v2028_v21  ;;  %7562 = vst [vmem:[#allocation114_spill] sm:$0xff] %v5962_v5  ;;  %v3978_v17 = vld [vmem:[%s7331_s1 + $0x2d8] sm:$0xf0] }
 0x350   :  { %v1734_v20 = vpop.f32.mrf.mxu3  ;;  %1947 = vmatmul.bf16.gmra.mxu0 %v5942_v19 }
 0x351   :  { %2226 = vmatmul.bf16.gmra.mxu1 %v2082_v39  ;;  %v1735_v14 = vadd.f32 %v1734_v20, %v5705_v55  ;;  %v4275_v39 = vld [vmem:[%s7331_s1 + $0x2ac] sm:$0xf]  ;;  %v3962_v20 = vld [vmem:[%s7331_s1 + $0x2b8] sm:$0xf0] }
 0x352   :  { %v5970_v6 = vor.u32 %v4275_v39, %v3962_v20  ;;  %v3960_v39 = vld [vmem:[%s7331_s1 + $0x2a8] sm:$0xf]  ;;  %v4277_v20 = vld [vmem:[%s7331_s1 + $0x2b4] sm:$0xf0] }
 0x353   :  { %v1904_v37 = vadd.f32 %v1903_v58, %v1735_v14  ;;  %v5975_v47 = vpop.f32.mrf.mxu2 }
 0x354   :  { %7563 = vst [vmem:[#allocation115_spill] sm:$0xff] %v5970_v6 }
 0x355   :  { %v1910_v12 = vpop.f32.mrf.mxu0  ;;  %v2030_v53 = vmax.f32 %v1904_v37, 0.0 }
 0x356   :  { %v5951_v3 = vpop.f32.mrf.mxu1 }
 0x358   :  { %v1736_v21 = vpop.f32.mrf.mxu3 }
 0x359   :  { %v1737_v55 = vadd.f32 %v1736_v21, %v5725_v40  ;;  %v5981_v21 = vld [vmem:[%s7332_s3] ss:$0 sm:$0xff] }
 0x35a   :  { %v1404_v37 = vadd.f32 %v5981_v21, %v5350_v8 }
 0x35b   :  { %v1906_v19 = vadd.f32 %v1905_v48, %v1737_v55  ;;  %v1402_v48 = vadd.f32 %v5981_v21, %v5328_v11 }
 0x35c   :  { %v1573_v11 = vadd.f32 %v5901_v23, %v1404_v37 }
 0x35d   :  { %v2031_v27 = vmax.f32 %v1906_v19, 0.0  ;;  %1778 = vmatmul.bf16.gmra.mxu3 %v5962_v5  ;;  %v1913_v58 = vpop.f32.mrf.mxu0  ;;  %v1571_v19 = vadd.f32 %v5885_v22, %v1402_v48 }
 0x35e   :  { %v5973_v14 = vpop.f32.mrf.mxu1 }
 0x35f   :  { %v2083_v40 = vpack.c.bf16 %v2031_v27, %v2030_v53 }
 0x360   :  { %v1739_v26 = vpop.f32.mrf.mxu3  ;;  %1952 = vmatmul.bf16.gmra.mxu0 %v5970_v6  ;;  %v6007_v6 = vpop.f32.mrf.mxu2 }
 0x361   :  { %2231 = vmatmul.bf16.gmra.mxu1 %v2083_v40  ;;  %v1740_v27 = vadd.f32 %v1739_v26, %v1571_v19  ;;  %v5999_v26 = vor.u32 %v4277_v20, %v3960_v39  ;;  %v4279_v19 = vld [vmem:[%s7331_s1 + $0x2cc] sm:$0xf] }
 0x362   :  { %v6009_v23 = vor.u32 %v4279_v19, %v3978_v17  ;;  %v1409_v17 = vadd.f32 %v5981_v21, %v5409_v0  ;;  %v4281_v19 = vld [vmem:[%s7331_s1 + $0x2d4] sm:$0xf0]  ;;  %v4283_v0 = vld [vmem:[%s7331_s1 + $0x2ec] sm:$0xf] }
 0x363   :  { %v1909_v48 = vadd.f32 %v1908_v62, %v1740_v27  ;;  %7564 = vst [vmem:[#allocation116_spill] sm:$0xff] %v5999_v26 }
 0x364   :  { %7565 = vst [vmem:[#allocation117_spill] sm:$0xff] %v6009_v23 }
 0x365   :  { %v1915_v53 = vpop.f32.mrf.mxu0  ;;  %v2032_v37 = vmax.f32 %v1909_v48, 0.0 }
 0x366   :  { %v5988_v55 = vpop.f32.mrf.mxu1 }
 0x368   :  { %v1741_v40 = vpop.f32.mrf.mxu3 }
 0x369   :  { %v1742_v8 = vadd.f32 %v1741_v40, %v1573_v11  ;;  %v1407_v11 = vadd.f32 %v5981_v21, %v5384_v38  ;;  %v1578_v38 = vadd.f32 %v5940_v32, %v1409_v17 }
 0x36b   :  { %v1911_v5 = vadd.f32 %v1910_v12, %v1742_v8  ;;  %v1576_v40 = vadd.f32 %v5918_v51, %v1407_v11  ;;  %v1587_v12 = vpop.f32.mrf.mxu2 }
 0x36d   :  { %v2033_v22 = vmax.f32 %v1911_v5, 0.0  ;;  %1783 = vmatmul.bf16.gmra.mxu3 %v5999_v26  ;;  %v1918_v62 = vpop.f32.mrf.mxu0 }
 0x36e   :  { %v6012_v27 = vpop.f32.mrf.mxu1 }
 0x36f   :  { %v2084_v39 = vpack.c.bf16 %v2033_v22, %v2032_v37  ;;  %v3976_v22 = vld [vmem:[%s7331_s1 + $0x2c8] sm:$0xf] }
 0x370   :  { %v1744_v20 = vpop.f32.mrf.mxu3  ;;  %1957 = vmatmul.bf16.gmra.mxu0 %v6009_v23  ;;  %v6029_v11 = vor.u32 %v4281_v19, %v3976_v22  ;;  %v1412_v19 = vadd.f32 %v5981_v21, %v5449_v46 }
 0x371   :  { %2236 = vmatmul.bf16.gmra.mxu1 %v2084_v39  ;;  %v1745_v5 = vadd.f32 %v1744_v20, %v1576_v40  ;;  %v3994_v20 = vld [vmem:[%s7331_s1 + $0x2f8] sm:$0xf0] }
 0x372   :  { %7566 = vst [vmem:[#allocation118_spill] sm:$0xff] %v6029_v11  ;;  %v6037_v23 = vor.u32 %v4283_v0, %v3994_v20 }
 0x373   :  { %v1914_v51 = vadd.f32 %v1913_v58, %v1745_v5  ;;  %v1590_v58 = vpop.f32.mrf.mxu2 }
 0x374   :  { %7567 = vst [vmem:[#allocation119_spill] sm:$0xff] %v6037_v23 }
 0x375   :  { %v1920_v48 = vpop.f32.mrf.mxu0  ;;  %v2034_v26 = vmax.f32 %v1914_v51, 0.0 }
 0x376   :  { %v6020_v8 = vpop.f32.mrf.mxu1 }
 0x378   :  { %v1746_v37 = vpop.f32.mrf.mxu3 }
 0x379   :  { %v1747_v39 = vadd.f32 %v1746_v37, %v1578_v38  ;;  %v1414_v38 = vadd.f32 %v5981_v21, %v5477_v16  ;;  %v4287_v16 = vld [vmem:[%s7331_s1 + $0x30c] sm:$0xf] }
 0x37b   :  { %v1916_v40 = vadd.f32 %v1915_v53, %v1747_v39  ;;  %v1581_v53 = vadd.f32 %v5949_v28, %v1412_v19  ;;  %v1583_v46 = vadd.f32 %v5975_v47, %v1414_v38  ;;  %v1592_v0 = vpop.f32.mrf.mxu2 }
 0x37d   :  { %v2035_v1 = vmax.f32 %v1916_v40, 0.0  ;;  %1788 = vmatmul.bf16.gmra.mxu3 %v6029_v11  ;;  %v1923_v32 = vpop.f32.mrf.mxu0 }
 0x37e   :  { %v6040_v17 = vpop.f32.mrf.mxu1 }
 0x37f   :  { %v2085_v5 = vpack.c.bf16 %v2035_v1, %v2034_v26  ;;  %v3992_v1 = vld [vmem:[%s7331_s1 + $0x2e8] sm:$0xf]  ;;  %v4285_v26 = vld [vmem:[%s7331_s1 + $0x2f4] sm:$0xf0] }
 0x380   :  { %v1749_v22 = vpop.f32.mrf.mxu3  ;;  %1962 = vmatmul.bf16.gmra.mxu0 %v6037_v23 }
 0x381   :  { %2241 = vmatmul.bf16.gmra.mxu1 %v2085_v5  ;;  %v1750_v37 = vadd.f32 %v1749_v22, %v1581_v53  ;;  %v6057_v5 = vor.u32 %v4285_v26, %v3992_v1  ;;  %v4010_v22 = vld [vmem:[%s7331_s1 + $0x318] sm:$0xf0]  ;;  %v1417_v1 = vadd.f32 %v5981_v21, %v5517_v56 }
 0x382   :  { %v6065_v53 = vor.u32 %v4287_v16, %v4010_v22 }
 0x383   :  { %v1919_v28 = vadd.f32 %v1918_v62, %v1750_v37  ;;  %7568 = vst [vmem:[#allocation120_spill] sm:$0xff] %v6057_v5  ;;  %v1595_v26 = vpop.f32.mrf.mxu2 }
 0x384   :  { %7569 = vst [vmem:[#allocation121_spill] sm:$0xff] %v6065_v53 }
 0x385   :  { %v1925_v51 = vpop.f32.mrf.mxu0  ;;  %v2036_v23 = vmax.f32 %v1919_v28, 0.0 }
 0x386   :  { %v6048_v39 = vpop.f32.mrf.mxu1 }
 0x388   :  { %v1751_v20 = vpop.f32.mrf.mxu3 }
 0x389   :  { %v1752_v40 = vadd.f32 %v1751_v20, %v1583_v46  ;;  %v1586_v46 = vadd.f32 %v6007_v6, %v1417_v1  ;;  %v4026_v6 = vld [vmem:[%s7331_s1 + $0x338] sm:$0xf0] }
 0x38b   :  { %v1921_v19 = vadd.f32 %v1920_v48, %v1752_v40  ;;  %v1419_v48 = vadd.f32 %v5981_v21, %v5542_v4  ;;  %v4291_v4 = vld [vmem:[%s7331_s1 + $0x32c] sm:$0xf]  ;;  %v1597_v1 = vpop.f32.mrf.mxu2 }
 0x38d   :  { %v2037_v11 = vmax.f32 %v1921_v19, 0.0  ;;  %1793 = vmatmul.bf16.gmra.mxu3 %v6057_v5  ;;  %v1928_v47 = vpop.f32.mrf.mxu0  ;;  %v1588_v16 = vadd.f32 %v1587_v12, %v1419_v48 }
 0x38e   :  { %v2207_v62 = vpop.f32.mrf.mxu1 }
 0x38f   :  { %v2086_v38 = vpack.c.bf16 %v2037_v11, %v2036_v23  ;;  %v4008_v23 = vld [vmem:[%s7331_s1 + $0x308] sm:$0xf]  ;;  %v4289_v11 = vld [vmem:[%s7331_s1 + $0x314] sm:$0xf0] }
 0x390   :  { %v1754_v37 = vpop.f32.mrf.mxu3  ;;  %1967 = vmatmul.bf16.gmra.mxu0 %v6065_v53 }
 0x391   :  { %2246 = vmatmul.bf16.gmra.mxu1 %v2086_v38  ;;  %v1755_v20 = vadd.f32 %v1754_v37, %v1586_v46  ;;  %v6080_v38 = vor.u32 %v4289_v11, %v4008_v23  ;;  %v6088_v46 = vor.u32 %v4291_v4, %v4026_v6  ;;  %v1422_v23 = vadd.f32 %v5981_v21, %v5568_v13 }
 0x393   :  { %v1924_v22 = vadd.f32 %v1923_v32, %v1755_v20  ;;  %7570 = vst [vmem:[#allocation122_spill] sm:$0xff] %v6088_v46  ;;  %v1591_v11 = vadd.f32 %v1590_v58, %v1422_v23 }
 0x395   :  { %v1930_v28 = vpop.f32.mrf.mxu0  ;;  %v2038_v53 = vmax.f32 %v1924_v22, 0.0  ;;  %v6096_v22 = vpop.f32.mrf.mxu2 }
 0x396   :  { %v2209_v40 = vpop.f32.mrf.mxu1 }
 0x398   :  { %v1756_v56 = vpop.f32.mrf.mxu3 }
 0x399   :  { %v1757_v19 = vadd.f32 %v1756_v56, %v1588_v16 }
 0x39b   :  { %v1926_v37 = vadd.f32 %v1925_v51, %v1757_v19  ;;  %v1424_v51 = vadd.f32 %v5981_v21, %v5585_v52 }
 0x39d   :  { %v2039_v5 = vmax.f32 %v1926_v37, 0.0  ;;  %1798 = vmatmul.bf16.gmra.mxu3 %v6080_v38  ;;  %v1933_v12 = vpop.f32.mrf.mxu0  ;;  %v1593_v4 = vadd.f32 %v1592_v0, %v1424_v51 }
 0x39e   :  { %v2212_v32 = vpop.f32.mrf.mxu1 }
 0x39f   :  { %v2087_v48 = vpack.c.bf16 %v2039_v5, %v2038_v53  ;;  %v4024_v5 = vld [vmem:[%s7331_s1 + $0x328] sm:$0xf]  ;;  %v4293_v53 = vld [vmem:[%s7331_s1 + $0x334] sm:$0xf0] }
 0x3a0   :  { %v1759_v20 = vpop.f32.mrf.mxu3  ;;  %1972 = vmatmul.bf16.gmra.mxu0 %v6088_v46  ;;  %v6104_v52 = vor.u32 %v4293_v53, %v4024_v5  ;;  %v1602_v5 = vpop.f32.mrf.mxu2 }
 0x3a1   :  { %2251 = vmatmul.bf16.gmra.mxu1 %v2087_v48  ;;  %v1760_v16 = vadd.f32 %v1759_v20, %v1591_v11  ;;  %v4295_v48 = vld [vmem:[%s7331_s1 + $0x34c] sm:$0xf]  ;;  %v4042_v20 = vld [vmem:[%s7331_s1 + $0x358] sm:$0xf0]  ;;  %v2343_v11 = vpack.c.bf16 %v2209_v40, %v2207_v62  ;;  %v1427_v62 = vadd.f32 %v5981_v21, %v5609_v18  ;;  %v2341_v40 = vpack.c.bf16 %v6020_v8, %v6012_v27  ;;  %v4297_v18 = vld [vmem:[%s7331_s1 + $0x354] sm:$0xf0] }
 0x3a2   :  { %v6112_v46 = vor.u32 %v4295_v48, %v4042_v20  ;;  %v4299_v20 = vld [vmem:[%s7331_s1 + $0x36c] sm:$0xf] }
 0x3a3   :  { %v1929_v58 = vadd.f32 %v1928_v47, %v1760_v16 }
 0x3a5   :  { %v1935_v56 = vpop.f32.mrf.mxu0  ;;  %v2040_v0 = vmax.f32 %v1929_v58, 0.0 }
 0x3a6   :  { %v2214_v19 = vpop.f32.mrf.mxu1 }
 0x3a7   :  { %v2344_v13 = vpack.c.bf16 %v2214_v19, %v2212_v32  ;;  %v2342_v19 = vpack.c.bf16 %v6048_v39, %v6040_v17  ;;  %v4040_v39 = vld [vmem:[%s7331_s1 + $0x348] sm:$0xf] }
 0x3a8   :  { %v1761_v6 = vpop.f32.mrf.mxu3  ;;  %v6139_v48 = vor.u32 %v4297_v18, %v4040_v39 }
 0x3a9   :  { %v1762_v37 = vadd.f32 %v1761_v6, %v1593_v4  ;;  %2373 = vmatpush.bf16.msrb.mxu2 %v2344_v13  ;;  %v1429_v4 = vadd.f32 %v5981_v21, %v5626_v33 }
 0x3ab   :  { %v1931_v23 = vadd.f32 %v1930_v28, %v1762_v37  ;;  %v1596_v28 = vadd.f32 %v1595_v26, %v1427_v62  ;;  %v1598_v26 = vadd.f32 %v1597_v1, %v1429_v4  ;;  %v7571_v37 = vpack.c.bf16 %v5988_v55, %v5973_v14  ;;  %v4058_v1 = vld [vmem:[%s7331_s1 + $0x378] sm:$0xf0] }
 0x3ac   :  { %v7573_v14 = vpack.c.bf16 %v5951_v3, %v5945_v50  ;;  %v7574_v62 = vpack.c.bf16 %v5921_v59, %v5915_v57  ;;  %v1434_v50 = vadd.f32 %v5981_v21, %v5667_v41  ;;  %v7575_v4 = vpack.c.bf16 %v5891_v49, %v5887_v34  ;;  %v4301_v57 = vld [vmem:[%s7331_s1 + $0x374] sm:$0xf0] }
 0x3ad   :  { %v2041_v32 = vmax.f32 %v1931_v23, 0.0  ;;  %1803 = vmatmul.bf16.gmra.mxu3 %v6104_v52  ;;  %2374 = vmatpush.bf16.msrb.mxu2 %v2343_v11  ;;  %v1938_v47 = vpop.f32.mrf.mxu0  ;;  %v1605_v23 = vpop.f32.mrf.mxu2 }
 0x3ae   :  { %v6115_v51 = vpop.f32.mrf.mxu1  ;;  %v1603_v59 = vadd.f32 %v1602_v5, %v1434_v50 }
 0x3af   :  { %v2088_v16 = vpack.c.bf16 %v2041_v32, %v2040_v0  ;;  %v6147_v0 = vor.u32 %v4299_v20, %v4058_v1 }
 0x3b0   :  { %v1764_v53 = vpop.f32.mrf.mxu3  ;;  %1977 = vmatmul.bf16.gmra.mxu0 %v6112_v46 }
 0x3b1   :  { %2256 = vmatmul.bf16.gmra.mxu1 %v2088_v16  ;;  %2375 = vmatpush.bf16.msrb.mxu2 %v2342_v19  ;;  %v1765_v13 = vadd.f32 %v1764_v53, %v1596_v28  ;;  %7572 = vst [vmem:[#allocation123_spill] sm:$0xff] %v6147_v0 }
 0x3b3   :  { %v1934_v58 = vadd.f32 %v1933_v12, %v1765_v13 }
 0x3b5   :  { %2376 = vmatpush.bf16.msrb.mxu2 %v2341_v40  ;;  %v1940_v6 = vpop.f32.mrf.mxu0  ;;  %v2042_v12 = vmax.f32 %v1934_v58, 0.0  ;;  %v1607_v40 = vpop.f32.mrf.mxu2 }
 0x3b6   :  { %v6126_v17 = vpop.f32.mrf.mxu1 }
 0x3b7   :  { %v2345_v27 = vpack.c.bf16 %v6126_v17, %v6115_v51 }
 0x3b8   :  { %v1766_v8 = vpop.f32.mrf.mxu3 }
 0x3b9   :  { %v1767_v33 = vadd.f32 %v1766_v8, %v1598_v26  ;;  %2377 = vmatpush.bf16.msrb.mxu2 %v7571_v37  ;;  %v4303_v26 = vld [vmem:[%s7331_s1 + $0x38c] sm:$0xf]  ;;  %v4074_v8 = vld [vmem:[%s7331_s1 + $0x398] sm:$0xf0] }
 0x3ba   :  { %v6186_v5 = vor.u32 %v4303_v26, %v4074_v8  ;;  %v1442_v8 = vadd.f32 %v5981_v21, %v5742_v29 }
 0x3bb   :  { %v1936_v11 = vadd.f32 %v1935_v56, %v1767_v33  ;;  %v1432_v56 = vadd.f32 %v5981_v21, %v5650_v10  ;;  %v4056_v10 = vld [vmem:[%s7331_s1 + $0x368] sm:$0xf] }
 0x3bc   :  { %v6178_v18 = vor.u32 %v4301_v57, %v4056_v10  ;;  %7576 = vst [vmem:[#allocation124_spill] sm:$0xff] %v6186_v5  ;;  %v4307_v10 = vld [vmem:[%s7331_s1 + $0x3ac] sm:$0xf]  ;;  %v4090_v57 = vld [vmem:[%s7331_s1 + $0x3b8] sm:$0xf0] }
 0x3bd   :  { %v2043_v32 = vmax.f32 %v1936_v11, 0.0  ;;  %1808 = vmatmul.bf16.gmra.mxu3 %v6139_v48  ;;  %2378 = vmatpush.bf16.msrb.mxu2 %v7573_v14  ;;  %v1943_v55 = vpop.f32.mrf.mxu0  ;;  %v1601_v28 = vadd.f32 %v6096_v22, %v1432_v56  ;;  %v4072_v56 = vld [vmem:[%s7331_s1 + $0x388] sm:$0xf] }
 0x3be   :  { %v6153_v16 = vpop.f32.mrf.mxu1 }
 0x3bf   :  { %v2089_v19 = vpack.c.bf16 %v2043_v32, %v2042_v12  ;;  %v1437_v12 = vadd.f32 %v5981_v21, %v5698_v7 }
 0x3c0   :  { %v1769_v53 = vpop.f32.mrf.mxu3  ;;  %1982 = vmatmul.bf16.gmra.mxu0 %v6147_v0 }
 0x3c1   :  { %2261 = vmatmul.bf16.gmra.mxu1 %v2089_v19  ;;  %2379 = vmatpush.bf16.msrb.mxu2 %v7574_v62  ;;  %v1770_v3 = vadd.f32 %v1769_v53, %v1601_v28  ;;  %v1606_v32 = vadd.f32 %v1605_v23, %v1437_v12  ;;  %v4305_v62 = vld [vmem:[%s7331_s1 + $0x394] sm:$0xf0]  ;;  %v4088_v12 = vld [vmem:[%s7331_s1 + $0x3a8] sm:$0xf] }
 0x3c3   :  { %v1939_v34 = vadd.f32 %v1938_v47, %v1770_v3  ;;  %v1610_v47 = vpop.f32.mrf.mxu2 }
 0x3c5   :  { %2380 = vmatpush.bf16.msrb.mxu2 %v7575_v4  ;;  %v1945_v13 = vpop.f32.mrf.mxu0  ;;  %v2044_v33 = vmax.f32 %v1939_v34, 0.0  ;;  %v6207_v4 = vor.u32 %v4305_v62, %v4072_v56  ;;  %v4311_v62 = vld [vmem:[%s7331_s1 + $0x3cc] sm:$0xf] }
 0x3c6   :  { %v6167_v39 = vpop.f32.mrf.mxu1 }
 0x3c7   :  { %v2346_v41 = vpack.c.bf16 %v6167_v39, %v6153_v16 }
 0x3c8   :  { %v1771_v22 = vpop.f32.mrf.mxu3  ;;  %2381 = vmatmul.bf16.vlgmr.msrb.gmra.mxu2 %v4574_v15 }
 0x3c9   :  { %v1772_v49 = vadd.f32 %v1771_v22, %v1603_v59  ;;  %v6215_v59 = vor.u32 %v4307_v10, %v4090_v57 }
 0x3cb   :  { %v1941_v58 = vadd.f32 %v1940_v6, %v1772_v49  ;;  %v1439_v6 = vadd.f32 %v5981_v21, %v5723_v30  ;;  %v1612_v23 = vpop.f32.mrf.mxu2  ;;  %7577 = vst [vmem:[#allocation125_spill] sm:$0xff] %v6215_v59 }
 0x3cd   :  { %v2045_v37 = vmax.f32 %v1941_v58, 0.0  ;;  %1813 = vmatmul.bf16.gmra.mxu3 %v6178_v18  ;;  %v1948_v15 = vpop.f32.mrf.mxu0  ;;  %v1608_v28 = vadd.f32 %v1607_v40, %v1439_v6 }
 0x3ce   :  { %v6189_v20 = vpop.f32.mrf.mxu1 }
 0x3cf   :  { %v2090_v1 = vpack.c.bf16 %v2045_v37, %v2044_v33  ;;  %v1611_v33 = vadd.f32 %v1610_v47, %v1442_v8 }
 0x3d0   :  { %v1774_v11 = vpop.f32.mrf.mxu3  ;;  %1987 = vmatmul.bf16.gmra.mxu0 %v6186_v5  ;;  %v7630_v5 = vld [vmem:[#allocation72_spill] sm:$0xff] }
 0x3d1   :  { %2266 = vmatmul.bf16.gmra.mxu1 %v2090_v1  ;;  %v1775_v14 = vadd.f32 %v1774_v11, %v1606_v32  ;;  %v4309_v32 = vld [vmem:[%s7331_s1 + $0x3b4] sm:$0xf0] }
 0x3d2   :  { %v6236_v56 = vor.u32 %v4309_v32, %v4088_v12 }
 0x3d3   :  { %v1944_v30 = vadd.f32 %v1943_v55, %v1775_v14  ;;  %v1615_v58 = vpop.f32.mrf.mxu2 }
 0x3d5   :  { %v1950_v19 = vpop.f32.mrf.mxu0  ;;  %v2046_v22 = vmax.f32 %v1944_v30, 0.0 }
 0x3d6   :  { %v6196_v53 = vpop.f32.mrf.mxu1 }
 0x3d7   :  { %v2347_v7 = vpack.c.bf16 %v6196_v53, %v6189_v20 }
 0x3d8   :  { %v1776_v50 = vpop.f32.mrf.mxu3  ;;  %2386 = vmatmul.bf16.gmra.mxu2 %v4600_v25 }
 0x3d9   :  { %v1777_v3 = vadd.f32 %v1776_v50, %v1608_v28  ;;  %v4106_v28 = vld [vmem:[%s7331_s1 + $0x3d8] sm:$0xf0] }
 0x3da   :  { %v6244_v30 = vor.u32 %v4311_v62, %v4106_v28 }
 0x3db   :  { %v1946_v40 = vadd.f32 %v1945_v13, %v1777_v3  ;;  %v1444_v13 = vadd.f32 %v5981_v21, %v5769_v2 }
 0x3dc   :  { %7578 = vst [vmem:[#allocation126_spill] sm:$0xff] %v6244_v30 }
 0x3dd   :  { %v2047_v34 = vmax.f32 %v1946_v40, 0.0  ;;  %1818 = vmatmul.bf16.gmra.mxu3 %v6207_v4  ;;  %v1953_v25 = vpop.f32.mrf.mxu0  ;;  %v1613_v6 = vadd.f32 %v1612_v23, %v1444_v13  ;;  %v1617_v23 = vpop.f32.mrf.mxu2  ;;  %v4104_v13 = vld [vmem:[%s7331_s1 + $0x3c8] sm:$0xf] }
 0x3de   :  { %v6218_v55 = vpop.f32.mrf.mxu1 }
 0x3df   :  { %v2091_v49 = vpack.c.bf16 %v2047_v34, %v2046_v22  ;;  %v1447_v22 = vadd.f32 %v5981_v21, %v5776_v24 }
 0x3e0   :  { %v1779_v26 = vpop.f32.mrf.mxu3  ;;  %1992 = vmatmul.bf16.gmra.mxu0 %v6215_v59 }
 0x3e1   :  { %2271 = vmatmul.bf16.gmra.mxu1 %v2091_v49  ;;  %v1780_v37 = vadd.f32 %v1779_v26, %v1611_v33  ;;  %v1616_v34 = vadd.f32 %v1615_v58, %v1447_v22 }
 0x3e3   :  { %v1949_v2 = vadd.f32 %v1948_v15, %v1780_v37  ;;  %v4313_v37 = vld [vmem:[%s7331_s1 + $0x3d4] sm:$0xf0] }
 0x3e5   :  { %v1955_v1 = vpop.f32.mrf.mxu0  ;;  %v2048_v3 = vmax.f32 %v1949_v2, 0.0  ;;  %v1620_v8 = vpop.f32.mrf.mxu2 }
 0x3e6   :  { %v6225_v11 = vpop.f32.mrf.mxu1 }
 0x3e7   :  { %v2348_v29 = vpack.c.bf16 %v6225_v11, %v6218_v55 }
 0x3e8   :  { %v1781_v47 = vpop.f32.mrf.mxu3  ;;  %2391 = vmatmul.bf16.gmra.mxu2 %v4624_v35 }
 0x3e9   :  { %v1782_v14 = vadd.f32 %v1781_v47, %v1613_v6  ;;  %v4315_v6 = vld [vmem:[%s7331_s1 + $0x3ec] sm:$0xf]  ;;  %v4122_v47 = vld [vmem:[%s7331_s1 + $0x3f8] sm:$0xf0] }
 0x3eb   :  { %v1951_v50 = vadd.f32 %v1950_v19, %v1782_v14  ;;  %v1449_v19 = vadd.f32 %v5981_v21, %v5806_v43  ;;  %v6263_v43 = vor.u32 %v4313_v37, %v4104_v13  ;;  %v6271_v14 = vor.u32 %v4315_v6, %v4122_v47 }
 0x3ed   :  { %v2049_v10 = vmax.f32 %v1951_v50, 0.0  ;;  %1823 = vmatmul.bf16.gmra.mxu3 %v6236_v56  ;;  %v1958_v35 = vpop.f32.mrf.mxu0  ;;  %v1618_v12 = vadd.f32 %v1617_v23, %v1449_v19  ;;  %7579 = vst [vmem:[#allocation127_spill] sm:$0xff] %v6271_v14  ;;  %v1622_v23 = vpop.f32.mrf.mxu2  ;;  %v4120_v19 = vld [vmem:[%s7331_s1 + $0x3e8] sm:$0xf] }
 0x3ee   :  { %v6247_v15 = vpop.f32.mrf.mxu1 }
 0x3ef   :  { %v2092_v57 = vpack.c.bf16 %v2049_v10, %v2048_v3  ;;  %v1452_v10 = vadd.f32 %v5981_v21, %v5822_v42 }
 0x3f0   :  { %v1784_v40 = vpop.f32.mrf.mxu3  ;;  %1997 = vmatmul.bf16.gmra.mxu0 %v6244_v30 }
 0x3f1   :  { %2276 = vmatmul.bf16.gmra.mxu1 %v2092_v57  ;;  %v1785_v49 = vadd.f32 %v1784_v40, %v1616_v34  ;;  %v1621_v57 = vadd.f32 %v1620_v8, %v1452_v10 }
 0x3f3   :  { %v1954_v58 = vadd.f32 %v1953_v25, %v1785_v49  ;;  %v4317_v49 = vld [vmem:[%s7331_s1 + $0x3f4] sm:$0xf0] }
 0x3f5   :  { %v1960_v26 = vpop.f32.mrf.mxu0  ;;  %v2050_v62 = vmax.f32 %v1954_v58, 0.0 }
 0x3f6   :  { %v6254_v33 = vpop.f32.mrf.mxu1 }
 0x3f8   :  { %v1786_v24 = vpop.f32.mrf.mxu3  ;;  %2396 = vmatmul.bf16.gmra.mxu2 %v4650_v45 }
 0x3f9   :  { %v1787_v32 = vadd.f32 %v1786_v24, %v1618_v12  ;;  %v6288_v12 = vor.u32 %v4317_v49, %v4120_v19 }
 0x3fb   :  { %v1956_v2 = vadd.f32 %v1955_v1, %v1787_v32  ;;  %v1454_v1 = vadd.f32 %v5981_v21, %v5840_v36  ;;  %v1625_v36 = vpop.f32.mrf.mxu2 }
 0x3fd   :  { %v2051_v28 = vmax.f32 %v1956_v2, 0.0  ;;  %1828 = vmatmul.bf16.gmra.mxu3 %v6263_v43  ;;  %v1963_v45 = vpop.f32.mrf.mxu0  ;;  %v1623_v13 = vadd.f32 %v1622_v23, %v1454_v1 }
 0x3fe   :  { %v6274_v25 = vpop.f32.mrf.mxu1 }
 0x3ff   :  { %v2093_v50 = vpack.c.bf16 %v2051_v28, %v2050_v62  ;;  %v1457_v28 = vadd.f32 %v5981_v21, %v5858_v61 }
 0x400   :  { %v1789_v3 = vpop.f32.mrf.mxu3  ;;  %2002 = vmatmul.bf16.gmra.mxu0 %v6271_v14 }
 0x401   :  { %2281 = vmatmul.bf16.gmra.mxu1 %v2093_v50  ;;  %v1790_v40 = vadd.f32 %v1789_v3, %v1621_v57  ;;  %v1626_v50 = vadd.f32 %v1625_v36, %v1457_v28 }
 0x403   :  { %v1959_v42 = vadd.f32 %v1958_v35, %v1790_v40  ;;  %v1459_v35 = vadd.f32 %v5981_v21, %v5865_v60 }
 0x405   :  { %v1965_v22 = vpop.f32.mrf.mxu0  ;;  %v2052_v58 = vmax.f32 %v1959_v42, 0.0 }
 0x406   :  { %v2244_v34 = vpop.f32.mrf.mxu1 }
 0x408   :  { %v1791_v37 = vpop.f32.mrf.mxu3  ;;  %2401 = vmatmul.bf16.gmra.mxu2 %v4672_v54  ;;  %v1627_v54 = vpop.f32.mrf.mxu2 }
 0x409   :  { %v1792_v8 = vadd.f32 %v1791_v37, %v1623_v13  ;;  %v1628_v10 = vadd.f32 %v1627_v54, %v1459_v35 }
 0x40b   :  { %v1961_v24 = vadd.f32 %v1960_v26, %v1792_v8 }
 0x40d   :  { %v2053_v32 = vmax.f32 %v1961_v24, 0.0  ;;  %1833 = vmatmul.bf16.gmra.mxu3 %v6288_v12  ;;  %v1968_v6 = vpop.f32.mrf.mxu0 }
 0x40e   :  { %v2247_v47 = vpop.f32.mrf.mxu1 }
 0x40f   :  { %v2094_v2 = vpack.c.bf16 %v2053_v32, %v2052_v58 }
 0x410   :  { %v1794_v62 = vpop.f32.mrf.mxu3 }
 0x411   :  { %2286 = vmatmul.bf16.gmra.mxu1 %v2094_v2  ;;  %v1795_v23 = vadd.f32 %v1794_v62, %v1626_v50 }
 0x413   :  { %v1964_v1 = vadd.f32 %v1963_v45, %v1795_v23 }
 0x415   :  { %v1970_v3 = vpop.f32.mrf.mxu0  ;;  %v2054_v49 = vmax.f32 %v1964_v1, 0.0 }
 0x416   :  { %v2249_v26 = vpop.f32.mrf.mxu1 }
 0x417   :  { %v2351_v45 = vpack.c.bf16 %v2249_v26, %v2247_v47 }
 0x418   :  { %v1796_v57 = vpop.f32.mrf.mxu3  ;;  %2406 = vmatmul.bf16.gmra.mxu2 %v4694_v63 }
 0x419   :  { %v1797_v40 = vadd.f32 %v1796_v57, %v1628_v10  ;;  %v7581_v10 = vld [vmem:[#allocation9_spill] sm:$0xff] }
 0x41b   :  { %v1966_v19 = vadd.f32 %v1965_v22, %v1797_v40 }
 0x41d   :  { %v2055_v13 = vmax.f32 %v1966_v19, 0.0  ;;  %v1973_v37 = vpop.f32.mrf.mxu0 }
 0x41e   :  { %v2252_v61 = vpop.f32.mrf.mxu1 }
 0x41f   :  { %v2095_v42 = vpack.c.bf16 %v2055_v13, %v2054_v49 }
 0x420   :  { %v1799_v8 = vpop.f32.mrf.mxu3 }
 0x421   :  { %2291 = vmatmul.bf16.gmra.mxu1 %v2095_v42  ;;  %v1800_v36 = vadd.f32 %v1799_v8, %v5124_v31  ;;  %v2350_v31 = vpack.c.bf16 %v2244_v34, %v6274_v25  ;;  %v7582_v34 = vld [vmem:[#allocation47_spill] sm:$0xff]  ;;  %v7586_v42 = vld [vmem:[#allocation53_spill] sm:$0xff] }
 0x423   :  { %v1969_v32 = vadd.f32 %v1968_v6, %v1800_v36  ;;  %v7580_v6 = vld [vmem:[#allocation44_spill] sm:$0xff] }
 0x425   :  { %v1975_v60 = vpop.f32.mrf.mxu0  ;;  %v2056_v2 = vmax.f32 %v1969_v32, 0.0 }
 0x426   :  { %v2254_v21 = vpop.f32.mrf.mxu1 }
 0x427   :  { %v2352_v24 = vpack.c.bf16 %v2254_v21, %v2252_v61 }
 0x428   :  { %v1801_v58 = vpop.f32.mrf.mxu3  ;;  %2411 = vmatmul.bf16.gmra.mxu2 %v4716_v9  ;;  %v2349_v9 = vpack.c.bf16 %v6254_v33, %v6247_v15 }
 0x429   :  { %v1802_v63 = vadd.f32 %v1801_v58, %v5156_v44  ;;  %2542 = vmatpush.bf16.msra.mxu3 %v2352_v24  ;;  %v7587_v58 = vld [vmem:[#allocation56_spill] sm:$0xff] }
 0x42b   :  { %v1971_v22 = vadd.f32 %v1970_v3, %v1802_v63 }
 0x42d   :  { %v2057_v62 = vmax.f32 %v1971_v22, 0.0  ;;  %2543 = vmatpush.bf16.msra.mxu3 %v2351_v45  ;;  %v1978_v28 = vpop.f32.mrf.mxu0 }
 0x42e   :  { %v6299_v50 = vpop.f32.mrf.mxu1 }
 0x42f   :  { %v2096_v54 = vpack.c.bf16 %v2057_v62, %v2056_v2  ;;  %v7588_v2 = vld [vmem:[#allocation15_spill] sm:$0xff]  ;;  %v7589_v62 = vld [vmem:[#allocation14_spill] sm:$0xff] }
 0x430   :  { %v1804_v35 = vpop.f32.mrf.mxu3 }
 0x431   :  { %2296 = vmatmul.bf16.gmra.mxu1 %v2096_v54  ;;  %2544 = vmatpush.bf16.msra.mxu3 %v2350_v31  ;;  %v1805_v44 = vadd.f32 %v1804_v35, %v7580_v6  ;;  %v7590_v31 = vld [vmem:[#allocation59_spill] sm:$0xff] }
 0x433   :  { %v1974_v25 = vadd.f32 %v1973_v37, %v1805_v44  ;;  %v7583_v37 = vld [vmem:[#allocation50_spill] sm:$0xff] }
 0x435   :  { %2545 = vmatpush.bf16.msra.mxu3 %v2349_v9  ;;  %v1980_v23 = vpop.f32.mrf.mxu0  ;;  %v2058_v33 = vmax.f32 %v1974_v25, 0.0 }
 0x436   :  { %v6305_v47 = vpop.f32.mrf.mxu1 }
 0x437   :  { %v2353_v3 = vpack.c.bf16 %v6305_v47, %v6299_v50 }
 0x438   :  { %v1806_v26 = vpop.f32.mrf.mxu3  ;;  %2416 = vmatmul.bf16.gmra.mxu2 %v7581_v10 }
 0x439   :  { %v1807_v57 = vadd.f32 %v1806_v26, %v7582_v34  ;;  %2546 = vmatpush.bf16.msra.mxu3 %v2348_v29  ;;  %v7585_v29 = vld [vmem:[#allocation11_spill] sm:$0xff] }
 0x43b   :  { %v1976_v15 = vadd.f32 %v1975_v60, %v1807_v57  ;;  %v7591_v57 = vld [vmem:[#allocation62_spill] sm:$0xff] }
 0x43d   :  { %v2059_v1 = vmax.f32 %v1976_v15, 0.0  ;;  %2547 = vmatpush.bf16.msra.mxu3 %v2347_v7  ;;  %v1983_v13 = vpop.f32.mrf.mxu0  ;;  %v7584_v7 = vld [vmem:[#allocation12_spill] sm:$0xff] }
 0x43e   :  { %v6317_v40 = vpop.f32.mrf.mxu1 }
 0x43f   :  { %v2097_v19 = vpack.c.bf16 %v2059_v1, %v2058_v33 }
 0x440   :  { %v1809_v49 = vpop.f32.mrf.mxu3 }
 0x441   :  { %2301 = vmatmul.bf16.gmra.mxu1 %v2097_v19  ;;  %2548 = vmatpush.bf16.msra.mxu3 %v2346_v41  ;;  %v1810_v55 = vadd.f32 %v1809_v49, %v7583_v37  ;;  %v7593_v37 = vld [vmem:[#allocation17_spill] sm:$0xff] }
 0x443   :  { %v1979_v61 = vadd.f32 %v1978_v28, %v1810_v55 }
 0x445   :  { %2549 = vmatpush.bf16.msra.mxu3 %v2345_v27  ;;  %v1985_v39 = vpop.f32.mrf.mxu0  ;;  %v2060_v36 = vmax.f32 %v1979_v61, 0.0 }
 0x446   :  { %v6326_v11 = vpop.f32.mrf.mxu1 }
 0x447   :  { %v2354_v20 = vpack.c.bf16 %v6326_v11, %v6317_v40 }
 0x448   :  { %v1811_v53 = vpop.f32.mrf.mxu3  ;;  %2421 = vmatmul.bf16.gmra.mxu2 %v7584_v7  ;;  %2550 = vmatmul.bf16.vlgmr.msra.gmra.mxu3 %v7585_v29 }
 0x449   :  { %v1812_v16 = vadd.f32 %v1811_v53, %v7586_v42  ;;  %v7594_v53 = vld [vmem:[#allocation65_spill] sm:$0xff] }
 0x44b   :  { %v1981_v41 = vadd.f32 %v1980_v23, %v1812_v16  ;;  %v6333_v8 = vpop.f32.mrf.mxu2 }
 0x44d   :  { %v2061_v51 = vmax.f32 %v1981_v41, 0.0  ;;  %v1988_v24 = vpop.f32.mrf.mxu0 }
 0x44e   :  { %v6335_v17 = vpop.f32.mrf.mxu1 }
 0x44f   :  { %v2098_v27 = vpack.c.bf16 %v2061_v51, %v2060_v36 }
 0x450   :  { %v1814_v60 = vpop.f32.mrf.mxu3 }
 0x451   :  { %2306 = vmatmul.bf16.gmra.mxu1 %v2098_v27  ;;  %v1815_v32 = vadd.f32 %v1814_v60, %v7587_v58  ;;  %v7595_v60 = vld [vmem:[#allocation68_spill] sm:$0xff] }
 0x453   :  { %v6337_v21 = vpop.f32.mrf.mxu2  ;;  %v1984_v28 = vadd.f32 %v1983_v13, %v1815_v32  ;;  %v7592_v13 = vld [vmem:[#allocation18_spill] sm:$0xff] }
 0x455   :  { %v2062_v6 = vmax.f32 %v1984_v28, 0.0  ;;  %v1990_v26 = vpop.f32.mrf.mxu0  ;;  %v7598_v28 = vld [vmem:[#allocation71_spill] sm:$0xff] }
 0x456   :  { %v6340_v63 = vpop.f32.mrf.mxu1 }
 0x457   :  { %v2355_v45 = vpack.c.bf16 %v6340_v63, %v6335_v17  ;;  %v7611_v17 = vld [vmem:[#allocation37_spill] sm:$0xff]  ;;  %v7612_v63 = vld [vmem:[#allocation38_spill] sm:$0xff] }
 0x458   :  { %v1816_v22 = vpop.f32.mrf.mxu3  ;;  %2426 = vmatmul.bf16.gmra.mxu2 %v7588_v2  ;;  %2555 = vmatmul.bf16.gmra.mxu3 %v7589_v62  ;;  %v7597_v2 = vld [vmem:[#allocation20_spill] sm:$0xff] }
 0x459   :  { %v1817_v54 = vadd.f32 %v1816_v22, %v7590_v31  ;;  %v7596_v22 = vld [vmem:[#allocation21_spill] sm:$0xff] }
 0x45b   :  { %v1986_v35 = vadd.f32 %v1985_v39, %v1817_v54  ;;  %v6347_v9 = vpop.f32.mrf.mxu2 }
 0x45d   :  { %v2063_v44 = vmax.f32 %v1986_v35, 0.0  ;;  %v1993_v49 = vpop.f32.mrf.mxu0 }
 0x45e   :  { %v6349_v23 = vpop.f32.mrf.mxu1 }
 0x45f   :  { %v2099_v10 = vpack.c.bf16 %v2063_v44, %v2062_v6 }
 0x460   :  { %v1819_v25 = vpop.f32.mrf.mxu3 }
 0x461   :  { %2311 = vmatmul.bf16.gmra.mxu1 %v2099_v10  ;;  %v1820_v15 = vadd.f32 %v1819_v25, %v7591_v57 }
 0x463   :  { %v6351_v34 = vpop.f32.mrf.mxu2  ;;  %v1989_v55 = vadd.f32 %v1988_v24, %v1820_v15 }
 0x465   :  { %v2064_v42 = vmax.f32 %v1989_v55, 0.0  ;;  %v1995_v51 = vpop.f32.mrf.mxu0 }
 0x466   :  { %v6354_v33 = vpop.f32.mrf.mxu1 }
 0x467   :  { %v2356_v1 = vpack.c.bf16 %v6354_v33, %v6349_v23  ;;  %v6428_v23 = vld [vmem:[%s7334_s5] ss:$0 sm:$0xff] }
 0x468   :  { %v1821_v19 = vpop.f32.mrf.mxu3  ;;  %2431 = vmatmul.bf16.gmra.mxu2 %v7592_v13  ;;  %2560 = vmatmul.bf16.gmra.mxu3 %v7593_v37  ;;  %v2383_v40 = vadd.f32 %v6428_v23, %v6333_v8  ;;  %v7615_v8 = vld [vmem:[#allocation42_spill] sm:$0xff] }
 0x469   :  { %v1822_v7 = vadd.f32 %v1821_v19, %v7594_v53  ;;  %v7599_v19 = vld [vmem:[#allocation74_spill] sm:$0xff] }
 0x46b   :  { %v1991_v29 = vadd.f32 %v1990_v26, %v1822_v7  ;;  %v6361_v61 = vpop.f32.mrf.mxu2  ;;  %v7601_v7 = vld [vmem:[#allocation23_spill] sm:$0xff] }
 0x46d   :  { %v2065_v16 = vmax.f32 %v1991_v29, 0.0  ;;  %v1998_v6 = vpop.f32.mrf.mxu0 }
 0x46e   :  { %v6363_v39 = vpop.f32.mrf.mxu1 }
 0x46f   :  { %v2100_v41 = vpack.c.bf16 %v2065_v16, %v2064_v42  ;;  %v7602_v42 = vld [vmem:[#allocation77_spill] sm:$0xff] }
 0x470   :  { %v1824_v36 = vpop.f32.mrf.mxu3 }
 0x471   :  { %2316 = vmatmul.bf16.gmra.mxu1 %v2100_v41  ;;  %v1825_v58 = vadd.f32 %v1824_v36, %v7595_v60 }
 0x473   :  { %v6365_v27 = vpop.f32.mrf.mxu2  ;;  %v1994_v62 = vadd.f32 %v1993_v49, %v1825_v58  ;;  %v7600_v49 = vld [vmem:[#allocation24_spill] sm:$0xff] }
 0x475   :  { %v2066_v44 = vmax.f32 %v1994_v62, 0.0  ;;  %v2000_v37 = vpop.f32.mrf.mxu0 }
 0x476   :  { %v6368_v32 = vpop.f32.mrf.mxu1 }
 0x478   :  { %v1826_v24 = vpop.f32.mrf.mxu3  ;;  %2436 = vmatmul.bf16.gmra.mxu2 %v7596_v22  ;;  %2565 = vmatmul.bf16.gmra.mxu3 %v7597_v2 }
 0x479   :  { %v1827_v31 = vadd.f32 %v1826_v24, %v7598_v28  ;;  %v7603_v28 = vld [vmem:[#allocation80_spill] sm:$0xff] }
 0x47b   :  { %v1996_v54 = vadd.f32 %v1995_v51, %v1827_v31  ;;  %v6373_v35 = vpop.f32.mrf.mxu2 }
 0x47d   :  { %v2067_v26 = vmax.f32 %v1996_v54, 0.0  ;;  %v2003_v22 = vpop.f32.mrf.mxu0 }
 0x47e   :  { %v2282_v10 = vpop.f32.mrf.mxu1 }
 0x47f   :  { %v2101_v25 = vpack.c.bf16 %v2067_v26, %v2066_v44  ;;  %v7604_v26 = vld [vmem:[#allocation27_spill] sm:$0xff] }
 0x480   :  { %v1829_v57 = vpop.f32.mrf.mxu3 }
 0x481   :  { %2321 = vmatmul.bf16.gmra.mxu1 %v2101_v25  ;;  %v1830_v13 = vadd.f32 %v1829_v57, %v7599_v19  ;;  %v7606_v57 = vld [vmem:[#allocation82_spill] sm:$0xff] }
 0x483   :  { %v6375_v15 = vpop.f32.mrf.mxu2  ;;  %v1999_v29 = vadd.f32 %v1998_v6, %v1830_v13  ;;  %v7605_v6 = vld [vmem:[#allocation26_spill] sm:$0xff] }
 0x485   :  { %v2068_v51 = vmax.f32 %v1999_v29, 0.0  ;;  %v2005_v13 = vpop.f32.mrf.mxu0 }
 0x486   :  { %v2284_v55 = vpop.f32.mrf.mxu1 }
 0x488   :  { %v1831_v53 = vpop.f32.mrf.mxu3  ;;  %2441 = vmatmul.bf16.gmra.mxu2 %v7600_v49  ;;  %2570 = vmatmul.bf16.gmra.mxu3 %v7601_v7 }
 0x489   :  { %v1832_v16 = vadd.f32 %v1831_v53, %v7602_v42 }
 0x48b   :  { %v2001_v41 = vadd.f32 %v2000_v37, %v1832_v16  ;;  %v6381_v36 = vpop.f32.mrf.mxu2 }
 0x48d   :  { %v2069_v60 = vmax.f32 %v2001_v41, 0.0 }
 0x48e   :  { %v2287_v58 = vpop.f32.mrf.mxu1 }
 0x48f   :  { %v2102_v24 = vpack.c.bf16 %v2069_v60, %v2068_v51  ;;  %v7607_v60 = vld [vmem:[#allocation30_spill] sm:$0xff] }
 0x490   :  { %v1834_v2 = vpop.f32.mrf.mxu3 }
 0x491   :  { %2326 = vmatmul.bf16.gmra.mxu1 %v2102_v24  ;;  %v1835_v31 = vadd.f32 %v1834_v2, %v7603_v28  ;;  %v7608_v24 = vld [vmem:[#allocation29_spill] sm:$0xff] }
 0x493   :  { %v6383_v62 = vpop.f32.mrf.mxu2  ;;  %v2004_v25 = vadd.f32 %v2003_v22, %v1835_v31  ;;  %v2358_v31 = vpack.c.bf16 %v2284_v55, %v2282_v10 }
 0x495   :  { %v2070_v49 = vmax.f32 %v2004_v25, 0.0  ;;  %v7609_v25 = vld [vmem:[#allocation33_spill] sm:$0xff] }
 0x496   :  { %v2289_v54 = vpop.f32.mrf.mxu1 }
 0x497   :  { %v2359_v22 = vpack.c.bf16 %v2289_v54, %v2287_v58 }
 0x498   :  { %v1836_v44 = vpop.f32.mrf.mxu3  ;;  %2446 = vmatmul.bf16.gmra.mxu2 %v7604_v26  ;;  %2575 = vmatmul.bf16.gmra.mxu3 %v7605_v6 }
 0x499   :  { %v1837_v19 = vadd.f32 %v1836_v44, %v7606_v57  ;;  %v2357_v44 = vpack.c.bf16 %v6368_v32, %v6363_v39  ;;  %v7610_v57 = vld [vmem:[#allocation32_spill] sm:$0xff] }
 0x49b   :  { %v2006_v37 = vadd.f32 %v2005_v13, %v1837_v19  ;;  %v6389_v53 = vpop.f32.mrf.mxu2  ;;  %v7614_v19 = vld [vmem:[#allocation41_spill] sm:$0xff]  ;;  %v7616_v13 = vld [vmem:[#allocation40_spill] sm:$0xff] }
 0x49d   :  { %v2071_v7 = vmax.f32 %v2006_v37, 0.0  ;;  %v2388_v37 = vadd.f32 %v6428_v23, %v6347_v9  ;;  %v7618_v9 = vld [vmem:[#allocation48_spill] sm:$0xff] }
 0x49e   :  { %v2292_v29 = vpop.f32.mrf.mxu1 }
 0x49f   :  { %v2103_v42 = vpack.c.bf16 %v2071_v7, %v2070_v49 }
 0x4a1   :  { %2331 = vmatmul.bf16.gmra.mxu1 %v2103_v42  ;;  %v2390_v42 = vadd.f32 %v6428_v23, %v6351_v34 }
 0x4a3   :  { %v6391_v16 = vpop.f32.mrf.mxu2 }
 0x4a6   :  { %v2294_v41 = vpop.f32.mrf.mxu1 }
 0x4a7   :  { %v2360_v51 = vpack.c.bf16 %v2294_v41, %v2292_v29 }
 0x4a8   :  { %2451 = vmatmul.bf16.gmra.mxu2 %v7607_v60  ;;  %2580 = vmatmul.bf16.gmra.mxu3 %v7608_v24 }
 0x4a9   :  { %2711 = vmatpush.bf16.msra.mxu0 %v2360_v51 }
 0x4ab   :  { %v6395_v2 = vpop.f32.mrf.mxu2 }
 0x4ad   :  { %2712 = vmatpush.bf16.msra.mxu0 %v2359_v22  ;;  %v7617_v22 = vld [vmem:[#allocation46_spill] sm:$0xff] }
 0x4ae   :  { %v6397_v28 = vpop.f32.mrf.mxu1 }
 0x4b1   :  { %2713 = vmatpush.bf16.msra.mxu0 %v2358_v31  ;;  %v7619_v31 = vld [vmem:[#allocation45_spill] sm:$0xff] }
 0x4b3   :  { %v6401_v26 = vpop.f32.mrf.mxu2 }
 0x4b5   :  { %2714 = vmatpush.bf16.msra.mxu0 %v2357_v44  ;;  %v2393_v44 = vadd.f32 %v6428_v23, %v6361_v61  ;;  %v7622_v61 = vld [vmem:[#allocation51_spill] sm:$0xff] }
 0x4b6   :  { %v6403_v6 = vpop.f32.mrf.mxu1 }
 0x4b8   :  { %2456 = vmatmul.bf16.gmra.mxu2 %v7609_v25  ;;  %2585 = vmatmul.bf16.gmra.mxu3 %v7610_v57 }
 0x4b9   :  { %2715 = vmatpush.bf16.msra.mxu0 %v2356_v1 }
 0x4bb   :  { %v6410_v58 = vpop.f32.mrf.mxu2 }
 0x4bd   :  { %2716 = vmatpush.bf16.msra.mxu0 %v2355_v45  ;;  %v7613_v45 = vld [vmem:[#allocation36_spill] sm:$0xff] }
 0x4be   :  { %v6415_v39 = vpop.f32.mrf.mxu1 }
 0x4c1   :  { %2717 = vmatpush.bf16.msra.mxu0 %v2354_v20  ;;  %v2385_v20 = vadd.f32 %v6428_v23, %v6337_v21 }
 0x4c3   :  { %v6420_v32 = vpop.f32.mrf.mxu2 }
 0x4c5   :  { %2718 = vmatpush.bf16.msra.mxu0 %v2353_v3 }
 0x4c6   :  { %v6430_v33 = vpop.f32.mrf.mxu1 }
 0x4c8   :  { %2461 = vmatmul.bf16.gmra.mxu2 %v7611_v17  ;;  %2719 = vmatmul.bf16.vlgmr.msra.gmra.mxu0 %v7612_v63  ;;  %v2395_v63 = vadd.f32 %v6428_v23, %v6365_v27 }
 0x4c9   :  { %2590 = vmatmul.bf16.gmra.mxu3 %v7613_v45 }
 0x4cb   :  { %v6437_v11 = vpop.f32.mrf.mxu2  ;;  %v2551_v50 = vpop.f32.mrf.mxu3 }
 0x4cc   :  { %v6439_v47 = vadd.f32 %v2551_v50, %v2383_v40 }
 0x4ce   :  { %v6441_v3 = vpop.f32.mrf.mxu1 }
 0x4d3   :  { %v6445_v1 = vpop.f32.mrf.mxu2  ;;  %v2553_v10 = vpop.f32.mrf.mxu3 }
 0x4d4   :  { %v6447_v55 = vadd.f32 %v2553_v10, %v2385_v20  ;;  %v7620_v10 = vld [vmem:[#allocation52_spill] sm:$0xff] }
 0x4d6   :  { %v6449_v54 = vpop.f32.mrf.mxu1 }
 0x4d8   :  { %2466 = vmatmul.bf16.gmra.mxu2 %v7614_v19  ;;  %2724 = vmatmul.bf16.gmra.mxu0 %v7615_v8  ;;  %v7621_v19 = vld [vmem:[#allocation54_spill] sm:$0xff]  ;;  %v2398_v8 = vadd.f32 %v6428_v23, %v6373_v35  ;;  %v7625_v35 = vld [vmem:[#allocation57_spill] sm:$0xff] }
 0x4d9   :  { %2595 = vmatmul.bf16.gmra.mxu3 %v7616_v13 }
 0x4db   :  { %v6456_v49 = vpop.f32.mrf.mxu2  ;;  %v2556_v7 = vpop.f32.mrf.mxu3 }
 0x4dc   :  { %v6458_v21 = vadd.f32 %v2556_v7, %v2388_v37 }
 0x4de   :  { %v6460_v29 = vpop.f32.mrf.mxu1 }
 0x4e3   :  { %v6464_v41 = vpop.f32.mrf.mxu2  ;;  %v2558_v51 = vpop.f32.mrf.mxu3 }
 0x4e4   :  { %v6466_v60 = vadd.f32 %v2558_v51, %v2390_v42  ;;  %v2400_v42 = vadd.f32 %v6428_v23, %v6375_v15 }
 0x4e6   :  { %v6468_v24 = vpop.f32.mrf.mxu1 }
 0x4e8   :  { %2471 = vmatmul.bf16.gmra.mxu2 %v7617_v22  ;;  %2729 = vmatmul.bf16.gmra.mxu0 %v7618_v9 }
 0x4e9   :  { %2600 = vmatmul.bf16.gmra.mxu3 %v7619_v31 }
 0x4eb   :  { %v6475_v25 = vpop.f32.mrf.mxu2  ;;  %v2561_v57 = vpop.f32.mrf.mxu3 }
 0x4ec   :  { %v6477_v34 = vadd.f32 %v2561_v57, %v2393_v44  ;;  %v7623_v44 = vld [vmem:[#allocation58_spill] sm:$0xff]  ;;  %v7624_v57 = vld [vmem:[#allocation60_spill] sm:$0xff] }
 0x4ee   :  { %v6479_v17 = vpop.f32.mrf.mxu1 }
 0x4f3   :  { %v6483_v45 = vpop.f32.mrf.mxu2  ;;  %v2563_v40 = vpop.f32.mrf.mxu3 }
 0x4f4   :  { %v6485_v50 = vadd.f32 %v2563_v40, %v2395_v63  ;;  %v2403_v63 = vadd.f32 %v6428_v23, %v6381_v36  ;;  %v7628_v36 = vld [vmem:[#allocation63_spill] sm:$0xff] }
 0x4f6   :  { %v2319_v20 = vpop.f32.mrf.mxu1 }
 0x4f8   :  { %2476 = vmatmul.bf16.gmra.mxu2 %v7620_v10  ;;  %2734 = vmatmul.bf16.gmra.mxu0 %v7621_v19 }
 0x4f9   :  { %2605 = vmatmul.bf16.gmra.mxu3 %v7622_v61  ;;  %v2405_v61 = vadd.f32 %v6428_v23, %v6383_v62 }
 0x4fb   :  { %v6492_v13 = vpop.f32.mrf.mxu2  ;;  %v2566_v37 = vpop.f32.mrf.mxu3 }
 0x4fc   :  { %v6494_v7 = vadd.f32 %v2566_v37, %v2398_v8 }
 0x4fe   :  { %v2322_v27 = vpop.f32.mrf.mxu1 }
 0x503   :  { %v6498_v51 = vpop.f32.mrf.mxu2  ;;  %v2568_v22 = vpop.f32.mrf.mxu3 }
 0x504   :  { %v6500_v9 = vadd.f32 %v2568_v22, %v2400_v42 }
 0x506   :  { %v2324_v31 = vpop.f32.mrf.mxu1 }
 0x508   :  { %2481 = vmatmul.bf16.gmra.mxu2 %v7623_v44  ;;  %2739 = vmatmul.bf16.gmra.mxu0 %v7624_v57  ;;  %v7626_v44 = vld [vmem:[#allocation64_spill] sm:$0xff]  ;;  %v7627_v57 = vld [vmem:[#allocation66_spill] sm:$0xff] }
 0x509   :  { %2610 = vmatmul.bf16.gmra.mxu3 %v7625_v35  ;;  %v2408_v35 = vadd.f32 %v6428_v23, %v6389_v53  ;;  %v4366_v53 = vld [vmem:[%s7335_s6 + $0x38] sm:$0xff] }
 0x50a   :  { %3213 = vmatpush.bf16.msra.mxu2 %v4366_v53 }
 0x50b   :  { %v6507_v40 = vpop.f32.mrf.mxu2  ;;  %v2571_v10 = vpop.f32.mrf.mxu3 }
 0x50c   :  { %v6509_v19 = vadd.f32 %v2571_v10, %v2403_v63 }
 0x50e   :  { %v2327_v15 = vpop.f32.mrf.mxu1 }
 0x513   :  { %v6513_v8 = vpop.f32.mrf.mxu2  ;;  %v2573_v37 = vpop.f32.mrf.mxu3 }
 0x514   :  { %v6515_v42 = vadd.f32 %v2573_v37, %v2405_v61  ;;  %v2410_v61 = vadd.f32 %v6428_v23, %v6391_v16  ;;  %v2413_v16 = vadd.f32 %v6428_v23, %v6395_v2  ;;  %v2364_v2 = vpack.c.bf16 %v6468_v24, %v6460_v29 }
 0x515   :  { %v2362_v29 = vpack.c.bf16 %v6430_v33, %v6415_v39  ;;  %v2420_v24 = vadd.f32 %v6428_v23, %v6420_v32  ;;  %v7636_v39 = vld [vmem:[#allocation2_spill] sm:$0xff]  ;;  %v7637_v33 = vld [vmem:[#allocation83_spill] sm:$0xff]  ;;  %v7638_v32 = vld [vmem:[#allocation81_spill] sm:$0xff] }
 0x516   :  { %v2329_v22 = vpop.f32.mrf.mxu1 }
 0x518   :  { %2486 = vmatmul.bf16.gmra.mxu2 %v7626_v44  ;;  %2744 = vmatmul.bf16.gmra.mxu0 %v7627_v57 }
 0x519   :  { %2615 = vmatmul.bf16.gmra.mxu3 %v7628_v36  ;;  %v7629_v36 = vld [vmem:[#allocation70_spill] sm:$0xff] }
 0x51b   :  { %v6522_v63 = vpop.f32.mrf.mxu2  ;;  %v2576_v10 = vpop.f32.mrf.mxu3 }
 0x51c   :  { %v6524_v14 = vadd.f32 %v2576_v10, %v2408_v35  ;;  %v7631_v35 = vld [vmem:[#allocation69_spill] sm:$0xff]  ;;  %v2367_v10 = vpack.c.bf16 %v2329_v22, %v2327_v15  ;;  %v7632_v15 = vld [vmem:[#allocation76_spill] sm:$0xff]  ;;  %v7633_v22 = vld [vmem:[#allocation78_spill] sm:$0xff] }
 0x51e   :  { %v2332_v62 = vpop.f32.mrf.mxu1 }
 0x523   :  { %v6528_v37 = vpop.f32.mrf.mxu2  ;;  %v2578_v30 = vpop.f32.mrf.mxu3 }
 0x524   :  { %v6530_v44 = vadd.f32 %v2578_v30, %v2410_v61 }
 0x526   :  { %v2334_v57 = vpop.f32.mrf.mxu1 }
 0x527   :  { %v2368_v59 = vpack.c.bf16 %v2334_v57, %v2332_v62  ;;  %v2366_v57 = vpack.c.bf16 %v2324_v31, %v2322_v27  ;;  %v7634_v27 = vld [vmem:[#allocation75_spill] sm:$0xff] }
 0x528   :  { %2491 = vmatmul.bf16.gmra.mxu2 %v7629_v36  ;;  %2749 = vmatmul.bf16.gmra.mxu0 %v7630_v5  ;;  %v2415_v36 = vadd.f32 %v6428_v23, %v6401_v26  ;;  %v2365_v5 = vpack.c.bf16 %v2319_v20, %v6479_v17  ;;  %v2418_v26 = vadd.f32 %v6428_v23, %v6410_v58 }
 0x529   :  { %2880 = vmatpush.bf16.msra.mxu1 %v2368_v59  ;;  %2620 = vmatmul.bf16.gmra.mxu3 %v7631_v35  ;;  %v2363_v17 = vpack.c.bf16 %v6449_v54, %v6441_v3 }
 0x52b   :  { %v6540_v30 = vpop.f32.mrf.mxu2  ;;  %v2581_v61 = vpop.f32.mrf.mxu3 }
 0x52c   :  { %v6542_v62 = vadd.f32 %v2581_v61, %v2413_v16  ;;  %v2361_v16 = vpack.c.bf16 %v6403_v6, %v6397_v28  ;;  %v2423_v28 = vadd.f32 %v6428_v23, %v6437_v11 }
 0x52d   :  { %2881 = vmatpush.bf16.msra.mxu1 %v2367_v10 }
 0x531   :  { %2882 = vmatpush.bf16.msra.mxu1 %v2366_v57  ;;  %v7635_v57 = vld [vmem:[#allocation35_spill] sm:$0xff] }
 0x533   :  { %v6547_v59 = vpop.f32.mrf.mxu2  ;;  %v2583_v35 = vpop.f32.mrf.mxu3 }
 0x534   :  { %v6549_v0 = vadd.f32 %v2583_v35, %v2415_v36 }
 0x535   :  { %2883 = vmatpush.bf16.msra.mxu1 %v2365_v5 }
 0x538   :  { %2496 = vmatmul.bf16.gmra.mxu2 %v7632_v15  ;;  %2754 = vmatmul.bf16.gmra.mxu0 %v7633_v22 }
 0x539   :  { %2884 = vmatpush.bf16.msra.mxu1 %v2364_v2  ;;  %2625 = vmatmul.bf16.gmra.mxu3 %v7634_v27  ;;  %v2425_v2 = vadd.f32 %v6428_v23, %v6445_v1  ;;  %v2428_v1 = vadd.f32 %v6428_v23, %v6456_v49 }
 0x53b   :  { %v6560_v20 = vpop.f32.mrf.mxu2  ;;  %v2586_v31 = vpop.f32.mrf.mxu3 }
 0x53c   :  { %v6562_v53 = vadd.f32 %v2586_v31, %v2418_v26  ;;  %v7640_v31 = vld [vmem:[#allocation3_spill] sm:$0xff] }
 0x53d   :  { %2885 = vmatpush.bf16.msra.mxu1 %v2363_v17  ;;  %v7639_v17 = vld [vmem:[#allocation39_spill] sm:$0xff] }
 0x541   :  { %2886 = vmatpush.bf16.msra.mxu1 %v2362_v29  ;;  %v7641_v29 = vld [vmem:[#allocation86_spill] sm:$0xff] }
 0x543   :  { %v6570_v58 = vpop.f32.mrf.mxu2  ;;  %v2588_v10 = vpop.f32.mrf.mxu3 }
 0x544   :  { %v6572_v3 = vadd.f32 %v2588_v10, %v2420_v24 }
 0x545   :  { %2887 = vmatpush.bf16.msra.mxu1 %v2361_v16  ;;  %v2720_v54 = vpop.f32.mrf.mxu0 }
 0x546   :  { %v6575_v61 = vadd.f32 %v2720_v54, %v6439_v47 }
 0x548   :  { %2888 = vmatmul.bf16.vlgmr.msra.gmra.mxu1 %v7635_v57  ;;  %2501 = vmatmul.bf16.gmra.mxu2 %v7636_v39  ;;  %v2430_v57 = vadd.f32 %v6428_v23, %v6464_v41  ;;  %v7646_v41 = vld [vmem:[#allocation88_spill] sm:$0xff] }
 0x549   :  { %2759 = vmatmul.bf16.gmra.mxu0 %v7637_v33  ;;  %2630 = vmatmul.bf16.gmra.mxu3 %v7638_v32 }
 0x54b   :  { %v6583_v6 = vpop.f32.mrf.mxu2 }
 0x54c   :  { %v2591_v36 = vpop.f32.mrf.mxu3 }
 0x54d   :  { %v2722_v5 = vpop.f32.mrf.mxu0  ;;  %v6585_v35 = vadd.f32 %v2591_v36, %v2423_v28  ;;  %v7643_v36 = vld [vmem:[#allocation43_spill] sm:$0xff] }
 0x54e   :  { %v6588_v47 = vadd.f32 %v2722_v5, %v6447_v55  ;;  %v7642_v55 = vld [vmem:[#allocation85_spill] sm:$0xff]  ;;  %v7644_v5 = vld [vmem:[#allocation4_spill] sm:$0xff] }
 0x553   :  { %v6592_v15 = vpop.f32.mrf.mxu2 }
 0x554   :  { %v2593_v22 = vpop.f32.mrf.mxu3 }
 0x555   :  { %v2725_v27 = vpop.f32.mrf.mxu0  ;;  %v6594_v26 = vadd.f32 %v2593_v22, %v2425_v2  ;;  %v7645_v2 = vld [vmem:[#allocation89_spill] sm:$0xff]  ;;  %v2433_v22 = vadd.f32 %v6428_v23, %v6475_v25 }
 0x556   :  { %v6597_v11 = vadd.f32 %v2725_v27, %v6458_v21 }
 0x558   :  { %2893 = vmatmul.bf16.gmra.mxu1 %v7639_v17  ;;  %2506 = vmatmul.bf16.gmra.mxu2 %v7640_v31 }
 0x559   :  { %2764 = vmatmul.bf16.gmra.mxu0 %v7641_v29  ;;  %2635 = vmatmul.bf16.gmra.mxu3 %v7642_v55  ;;  %v2435_v55 = vadd.f32 %v6428_v23, %v6483_v45  ;;  %v2438_v45 = vadd.f32 %v6428_v23, %v6492_v13 }
 0x55b   :  { %v6605_v24 = vpop.f32.mrf.mxu2 }
 0x55c   :  { %v2596_v16 = vpop.f32.mrf.mxu3 }
 0x55d   :  { %v2727_v10 = vpop.f32.mrf.mxu0  ;;  %v6607_v54 = vadd.f32 %v2596_v16, %v2428_v1 }
 0x55e   :  { %v6610_v21 = vadd.f32 %v2727_v10, %v6466_v60  ;;  %v4365_v60 = vld [vmem:[%s7335_s6 + $0x30] sm:$0xff] }
 0x55f   :  { %3214 = vmatpush.bf16.msra.mxu2 %v4365_v60 }
 0x563   :  { %v6614_v39 = vpop.f32.mrf.mxu2 }
 0x564   :  { %v2598_v33 = vpop.f32.mrf.mxu3 }
 0x565   :  { %v2730_v32 = vpop.f32.mrf.mxu0  ;;  %v6616_v28 = vadd.f32 %v2598_v33, %v2430_v57  ;;  %v7647_v33 = vld [vmem:[#allocation49_spill] sm:$0xff] }
 0x566   :  { %v6619_v49 = vadd.f32 %v2730_v32, %v6477_v34  ;;  %v7648_v32 = vld [vmem:[#allocation5_spill] sm:$0xff] }
 0x568   :  { %2898 = vmatmul.bf16.gmra.mxu1 %v7643_v36  ;;  %2511 = vmatmul.bf16.gmra.mxu2 %v7644_v5  ;;  %v7649_v36 = vld [vmem:[#allocation92_spill] sm:$0xff] }
 0x569   :  { %2769 = vmatmul.bf16.gmra.mxu0 %v7645_v2  ;;  %2640 = vmatmul.bf16.gmra.mxu3 %v7646_v41 }
 0x56b   :  { %v6630_v27 = vpop.f32.mrf.mxu2 }
 0x56c   :  { %v2601_v34 = vpop.f32.mrf.mxu3 }
 0x56d   :  { %v2732_v17 = vpop.f32.mrf.mxu0  ;;  %v6632_v31 = vadd.f32 %v2601_v34, %v2433_v22  ;;  %v2440_v22 = vadd.f32 %v6428_v23, %v6498_v51  ;;  %v2443_v51 = vadd.f32 %v6428_v23, %v6507_v40 }
 0x56e   :  { %v6635_v29 = vadd.f32 %v2732_v17, %v6485_v50  ;;  %v7650_v50 = vld [vmem:[#allocation91_spill] sm:$0xff] }
 0x573   :  { %v6639_v1 = vpop.f32.mrf.mxu2 }
 0x574   :  { %v2603_v16 = vpop.f32.mrf.mxu3 }
 0x575   :  { %v2735_v10 = vpop.f32.mrf.mxu0  ;;  %v6641_v57 = vadd.f32 %v2603_v16, %v2435_v55 }
 0x576   :  { %v6644_v25 = vadd.f32 %v2735_v10, %v6494_v7  ;;  %v7651_v10 = vld [vmem:[#allocation55_spill] sm:$0xff] }
 0x578   :  { %2903 = vmatmul.bf16.gmra.mxu1 %v7647_v33  ;;  %2516 = vmatmul.bf16.gmra.mxu2 %v7648_v32  ;;  %v7652_v33 = vld [vmem:[#allocation6_spill] sm:$0xff]  ;;  %v7653_v32 = vld [vmem:[#allocation95_spill] sm:$0xff] }
 0x579   :  { %2774 = vmatmul.bf16.gmra.mxu0 %v7649_v36  ;;  %2645 = vmatmul.bf16.gmra.mxu3 %v7650_v50 }
 0x57b   :  { %v6652_v5 = vpop.f32.mrf.mxu2 }
 0x57c   :  { %v2606_v60 = vpop.f32.mrf.mxu3 }
 0x57d   :  { %v2737_v2 = vpop.f32.mrf.mxu0  ;;  %v6654_v41 = vadd.f32 %v2606_v60, %v2438_v45 }
 0x57e   :  { %v6657_v7 = vadd.f32 %v2737_v2, %v6500_v9  ;;  %v7654_v9 = vld [vmem:[#allocation94_spill] sm:$0xff]  ;;  %v2445_v2 = vadd.f32 %v6428_v23, %v6513_v8  ;;  %v7660_v8 = vld [vmem:[#allocation97_spill] sm:$0xff] }
 0x583   :  { %v6661_v34 = vpop.f32.mrf.mxu2 }
 0x584   :  { %v2608_v17 = vpop.f32.mrf.mxu3 }
 0x585   :  { %v2740_v55 = vpop.f32.mrf.mxu0  ;;  %v6663_v16 = vadd.f32 %v2608_v17, %v2440_v22 }
 0x586   :  { %v6666_v13 = vadd.f32 %v2740_v55, %v6509_v19 }
 0x588   :  { %2908 = vmatmul.bf16.gmra.mxu1 %v7651_v10  ;;  %2521 = vmatmul.bf16.gmra.mxu2 %v7652_v33  ;;  %v7657_v33 = vld [vmem:[#allocation61_spill] sm:$0xff] }
 0x589   :  { %2779 = vmatmul.bf16.gmra.mxu0 %v7653_v32  ;;  %2650 = vmatmul.bf16.gmra.mxu3 %v7654_v9  ;;  %v7658_v32 = vld [vmem:[#allocation7_spill] sm:$0xff]  ;;  %v7659_v9 = vld [vmem:[#allocation98_spill] sm:$0xff] }
 0x58b   :  { %v6674_v36 = vpop.f32.mrf.mxu2 }
 0x58c   :  { %7655 = vst [vmem:[#allocation44_spill] sm:$0xff] %v6674_v36  ;;  %v2611_v50 = vpop.f32.mrf.mxu3 }
 0x58d   :  { %v2742_v45 = vpop.f32.mrf.mxu0  ;;  %v6676_v60 = vadd.f32 %v2611_v50, %v2443_v51  ;;  %v4363_v51 = vld [vmem:[%s7335_s6 + $0x20] sm:$0xff] }
 0x58e   :  { %v6679_v19 = vadd.f32 %v2742_v45, %v6515_v42  ;;  %v4364_v42 = vld [vmem:[%s7335_s6 + $0x28] sm:$0xff] }
 0x58f   :  { %3215 = vmatpush.bf16.msra.mxu2 %v4364_v42  ;;  %v4362_v42 = vld [vmem:[%s7335_s6 + $0x18] sm:$0xff] }
 0x593   :  { %v6683_v22 = vpop.f32.mrf.mxu2  ;;  %3216 = vmatpush.bf16.msra.mxu2 %v4363_v51  ;;  %v7663_v51 = vld [vmem:[#allocation67_spill] sm:$0xff] }
 0x594   :  { %7656 = vst [vmem:[#allocation9_spill] sm:$0xff] %v6683_v22  ;;  %v2613_v17 = vpop.f32.mrf.mxu3 }
 0x595   :  { %v2745_v55 = vpop.f32.mrf.mxu0  ;;  %v6685_v10 = vadd.f32 %v2613_v17, %v2445_v2 }
 0x596   :  { %v6688_v40 = vadd.f32 %v2745_v55, %v6524_v14  ;;  %v2448_v14 = vadd.f32 %v6428_v23, %v6522_v63 }
 0x597   :  { %3217 = vmatpush.bf16.msra.mxu2 %v4362_v42 }
 0x598   :  { %2913 = vmatmul.bf16.gmra.mxu1 %v7657_v33  ;;  %2526 = vmatmul.bf16.gmra.mxu2 %v7658_v32  ;;  %v2450_v33 = vadd.f32 %v6428_v23, %v6528_v37  ;;  %v4361_v37 = vld [vmem:[%s7335_s6 + $0x10] sm:$0xff] }
 0x599   :  { %2784 = vmatmul.bf16.gmra.mxu0 %v7659_v9  ;;  %2655 = vmatmul.bf16.gmra.mxu3 %v7660_v8 }
 0x59b   :  { %v6702_v50 = vpop.f32.mrf.mxu2  ;;  %3218 = vmatpush.bf16.msra.mxu2 %v4361_v37  ;;  %v4359_v37 = vld [vmem:[%s7335_s6] sm:$0xff] }
 0x59c   :  { %7661 = vst [vmem:[#allocation47_spill] sm:$0xff] %v6702_v50  ;;  %v2616_v45 = vpop.f32.mrf.mxu3 }
 0x59d   :  { %v2747_v2 = vpop.f32.mrf.mxu0  ;;  %v6704_v17 = vadd.f32 %v2616_v45, %v2448_v14  ;;  %v7665_v45 = vld [vmem:[#allocation101_spill] sm:$0xff] }
 0x59e   :  { %v6707_v55 = vadd.f32 %v2747_v2, %v6530_v44  ;;  %v7664_v44 = vld [vmem:[#allocation8_spill] sm:$0xff] }
 0x59f   :  { %v7666_v2 = vld [vmem:[#allocation100_spill] sm:$0xff] }
 0x5a3   :  { %v6711_v32 = vpop.f32.mrf.mxu2 }
 0x5a4   :  { %7662 = vst [vmem:[#allocation50_spill] sm:$0xff] %v6711_v32  ;;  %v2618_v63 = vpop.f32.mrf.mxu3 }
 0x5a5   :  { %v2750_v9 = vpop.f32.mrf.mxu0  ;;  %v6716_v8 = vadd.f32 %v2618_v63, %v2450_v33  ;;  %v2453_v33 = vadd.f32 %v6428_v23, %v6540_v30  ;;  %v2455_v30 = vadd.f32 %v6428_v23, %v6547_v59  ;;  %v2458_v59 = vadd.f32 %v6428_v23, %v6560_v20 }
 0x5a6   :  { %v6719_v14 = vadd.f32 %v2750_v9, %v6542_v62  ;;  %v4360_v62 = vld [vmem:[%s7335_s6 + $0x8] sm:$0xff] }
 0x5a7   :  { %3219 = vmatpush.bf16.msra.mxu2 %v4360_v62  ;;  %v7669_v62 = vld [vmem:[#allocation73_spill] sm:$0xff] }
 0x5a8   :  { %2918 = vmatmul.bf16.gmra.mxu1 %v7663_v51  ;;  %2531 = vmatmul.bf16.gmra.mxu2 %v7664_v44 }
 0x5a9   :  { %2789 = vmatmul.bf16.gmra.mxu0 %v7665_v45  ;;  %2660 = vmatmul.bf16.gmra.mxu3 %v7666_v2 }
 0x5ab   :  { %v6730_v42 = vpop.f32.mrf.mxu2  ;;  %3220 = vmatpush.bf16.msra.mxu2 %v4359_v37 }
 0x5ac   :  { %7667 = vst [vmem:[#allocation12_spill] sm:$0xff] %v6730_v42  ;;  %v2621_v63 = vpop.f32.mrf.mxu3 }
 0x5ad   :  { %v2752_v9 = vpop.f32.mrf.mxu0  ;;  %v6735_v51 = vadd.f32 %v2621_v63, %v2453_v33  ;;  %v7671_v63 = vld [vmem:[#allocation104_spill] sm:$0xff] }
 0x5ae   :  { %v6738_v44 = vadd.f32 %v2752_v9, %v6549_v0  ;;  %v7670_v0 = vld [vmem:[#allocation10_spill] sm:$0xff]  ;;  %v7672_v9 = vld [vmem:[#allocation103_spill] sm:$0xff] }
 0x5b3   :  { %v6745_v45 = vpop.f32.mrf.mxu2 }
 0x5b4   :  { %7668 = vst [vmem:[#allocation11_spill] sm:$0xff] %v6745_v45  ;;  %v2623_v2 = vpop.f32.mrf.mxu3 }
 0x5b5   :  { %v2755_v42 = vpop.f32.mrf.mxu0  ;;  %v6747_v32 = vadd.f32 %v2623_v2, %v2455_v30 }
 0x5b6   :  { %v6750_v33 = vadd.f32 %v2755_v42, %v6562_v53  ;;  %v2460_v42 = vadd.f32 %v6428_v23, %v6570_v58 }
 0x5b8   :  { %2923 = vmatmul.bf16.gmra.mxu1 %v7669_v62  ;;  %2536 = vmatmul.bf16.gmra.mxu2 %v7670_v0 }
 0x5b9   :  { %2794 = vmatmul.bf16.gmra.mxu0 %v7671_v63  ;;  %2665 = vmatmul.bf16.gmra.mxu3 %v7672_v9 }
 0x5bb   :  { %v6758_v37 = vpop.f32.mrf.mxu2 }
 0x5bc   :  { %7673 = vst [vmem:[#allocation53_spill] sm:$0xff] %v6758_v37  ;;  %v2626_v45 = vpop.f32.mrf.mxu3  ;;  %v7675_v37 = vld [vmem:[#allocation79_spill] sm:$0xff] }
 0x5bd   :  { %v2757_v50 = vpop.f32.mrf.mxu0  ;;  %v6760_v30 = vadd.f32 %v2626_v45, %v2458_v59  ;;  %v7676_v45 = vld [vmem:[#allocation106_spill] sm:$0xff]  ;;  %v7677_v59 = vld [vmem:[#allocation13_spill] sm:$0xff] }
 0x5be   :  { %v6763_v53 = vadd.f32 %v2757_v50, %v6572_v3  ;;  %v2463_v3 = vadd.f32 %v6428_v23, %v6583_v6  ;;  %v2465_v6 = vadd.f32 %v6428_v23, %v6592_v15  ;;  %v2468_v15 = vadd.f32 %v6428_v23, %v6605_v24 }
 0x5bf   :  { %v2470_v24 = vadd.f32 %v6428_v23, %v6614_v39  ;;  %v2473_v39 = vadd.f32 %v6428_v23, %v6630_v27  ;;  %v2475_v27 = vadd.f32 %v6428_v23, %v6639_v1  ;;  %v2478_v1 = vadd.f32 %v6428_v23, %v6652_v5 }
 0x5c0   :  { %v2480_v5 = vadd.f32 %v6428_v23, %v6661_v34 }
 0x5c3   :  { %v6767_v2 = vpop.f32.mrf.mxu2 }
 0x5c4   :  { %7674 = vst [vmem:[#allocation56_spill] sm:$0xff] %v6767_v2  ;;  %v2628_v62 = vpop.f32.mrf.mxu3 }
 0x5c5   :  { %v2889_v0 = vpop.f32.mrf.mxu1  ;;  %v6769_v63 = vadd.f32 %v2628_v62, %v2460_v42 }
 0x5c6   :  { %v2760_v9 = vpop.f32.mrf.mxu0  ;;  %v2890_v50 = vadd.f32 %v2889_v0, %v6575_v61 }
 0x5c7   :  { %v6772_v20 = vadd.f32 %v2760_v9, %v6585_v35 }
 0x5c8   :  { %2928 = vmatmul.bf16.gmra.mxu1 %v7675_v37 }
 0x5c9   :  { %2799 = vmatmul.bf16.gmra.mxu0 %v7676_v45  ;;  %2670 = vmatmul.bf16.gmra.mxu3 %v7677_v59  ;;  %v3049_v45 = vmax.f32 %v2890_v50, 0.0  ;;  %v7681_v50 = vld [vmem:[#allocation16_spill] sm:$0xff] }
 0x5cb   :  { %v6779_v58 = vpop.f32.mrf.mxu2 }
 0x5cc   :  { %7678 = vst [vmem:[#allocation15_spill] sm:$0xff] %v6779_v58  ;;  %v2631_v2 = vpop.f32.mrf.mxu3 }
 0x5cd   :  { %v2891_v42 = vpop.f32.mrf.mxu1  ;;  %v6782_v62 = vadd.f32 %v2631_v2, %v2463_v3  ;;  %v7679_v3 = vld [vmem:[#allocation84_spill] sm:$0xff] }
 0x5ce   :  { %v2892_v35 = vadd.f32 %v2891_v42, %v6588_v47  ;;  %v2762_v9 = vpop.f32.mrf.mxu0 }
 0x5cf   :  { %v6786_v37 = vadd.f32 %v2762_v9, %v6594_v26  ;;  %v7680_v26 = vld [vmem:[#allocation108_spill] sm:$0xff] }
 0x5d0   :  { %v3050_v22 = vmax.f32 %v2892_v35, 0.0 }
 0x5d2   :  { %v3113_v59 = vpack.c.bf16 %v3050_v22, %v3049_v45 }
 0x5d3   :  { %v6790_v36 = vpop.f32.mrf.mxu2 }
 0x5d4   :  { %3221 = vmatmul.bf16.vlgmr.msra.gmra.mxu2 %v3113_v59  ;;  %v2633_v61 = vpop.f32.mrf.mxu3 }
 0x5d5   :  { %v2894_v0 = vpop.f32.mrf.mxu1  ;;  %v6792_v58 = vadd.f32 %v2633_v61, %v2465_v6 }
 0x5d6   :  { %v2765_v2 = vpop.f32.mrf.mxu0  ;;  %v2895_v42 = vadd.f32 %v2894_v0, %v6597_v11 }
 0x5d7   :  { %v6795_v47 = vadd.f32 %v2765_v2, %v6607_v54 }
 0x5d8   :  { %2933 = vmatmul.bf16.gmra.mxu1 %v7679_v3  ;;  %v3051_v61 = vmax.f32 %v2895_v42, 0.0  ;;  %v7684_v42 = vld [vmem:[#allocation19_spill] sm:$0xff] }
 0x5d9   :  { %2804 = vmatmul.bf16.gmra.mxu0 %v7680_v26  ;;  %2675 = vmatmul.bf16.gmra.mxu3 %v7681_v50 }
 0x5db   :  { %v6802_v22 = vpop.f32.mrf.mxu2 }
 0x5dc   :  { %v2636_v35 = vpop.f32.mrf.mxu3 }
 0x5dd   :  { %v2896_v9 = vpop.f32.mrf.mxu1  ;;  %v6805_v45 = vadd.f32 %v2636_v35, %v2468_v15  ;;  %v7682_v35 = vld [vmem:[#allocation87_spill] sm:$0xff] }
 0x5de   :  { %v2897_v54 = vadd.f32 %v2896_v9, %v6610_v21  ;;  %v2767_v59 = vpop.f32.mrf.mxu0 }
 0x5df   :  { %v6809_v6 = vadd.f32 %v2767_v59, %v6616_v28  ;;  %v7683_v28 = vld [vmem:[#allocation110_spill] sm:$0xff] }
 0x5e0   :  { %v3052_v2 = vmax.f32 %v2897_v54, 0.0 }
 0x5e2   :  { %v3114_v3 = vpack.c.bf16 %v3052_v2, %v3051_v61 }
 0x5e3   :  { %v6813_v26 = vpop.f32.mrf.mxu2 }
 0x5e4   :  { %3226 = vmatmul.bf16.gmra.mxu2 %v3114_v3  ;;  %v2638_v11 = vpop.f32.mrf.mxu3 }
 0x5e5   :  { %v2899_v0 = vpop.f32.mrf.mxu1  ;;  %v6815_v50 = vadd.f32 %v2638_v11, %v2470_v24 }
 0x5e6   :  { %v2770_v15 = vpop.f32.mrf.mxu0  ;;  %v2900_v54 = vadd.f32 %v2899_v0, %v6619_v49 }
 0x5e7   :  { %v6818_v21 = vadd.f32 %v2770_v15, %v6632_v31 }
 0x5e8   :  { %2938 = vmatmul.bf16.gmra.mxu1 %v7682_v35  ;;  %v3053_v11 = vmax.f32 %v2900_v54, 0.0  ;;  %v7687_v54 = vld [vmem:[#allocation22_spill] sm:$0xff] }
 0x5e9   :  { %2809 = vmatmul.bf16.gmra.mxu0 %v7683_v28  ;;  %2680 = vmatmul.bf16.gmra.mxu3 %v7684_v42 }
 0x5eb   :  { %v6825_v9 = vpop.f32.mrf.mxu2 }
 0x5ec   :  { %v2641_v59 = vpop.f32.mrf.mxu3 }
 0x5ed   :  { %v2901_v61 = vpop.f32.mrf.mxu1  ;;  %v6828_v2 = vadd.f32 %v2641_v59, %v2473_v39  ;;  %v7685_v59 = vld [vmem:[#allocation90_spill] sm:$0xff] }
 0x5ee   :  { %v2902_v31 = vadd.f32 %v2901_v61, %v6635_v29  ;;  %v2772_v3 = vpop.f32.mrf.mxu0 }
 0x5ef   :  { %v6832_v24 = vadd.f32 %v2772_v3, %v6641_v57  ;;  %v7686_v57 = vld [vmem:[#allocation112_spill] sm:$0xff] }
 0x5f0   :  { %v3054_v15 = vmax.f32 %v2902_v31, 0.0 }
 0x5f2   :  { %v3115_v35 = vpack.c.bf16 %v3054_v15, %v3053_v11 }
 0x5f3   :  { %v6836_v28 = vpop.f32.mrf.mxu2 }
 0x5f4   :  { %3231 = vmatmul.bf16.gmra.mxu2 %v3115_v35  ;;  %v2643_v49 = vpop.f32.mrf.mxu3 }
 0x5f5   :  { %v2904_v0 = vpop.f32.mrf.mxu1  ;;  %v6838_v42 = vadd.f32 %v2643_v49, %v2475_v27 }
 0x5f6   :  { %v2775_v39 = vpop.f32.mrf.mxu0  ;;  %v2905_v31 = vadd.f32 %v2904_v0, %v6644_v25 }
 0x5f7   :  { %v6841_v29 = vadd.f32 %v2775_v39, %v6654_v41 }
 0x5f8   :  { %2943 = vmatmul.bf16.gmra.mxu1 %v7685_v59  ;;  %v3055_v49 = vmax.f32 %v2905_v31, 0.0  ;;  %v7690_v31 = vld [vmem:[#allocation25_spill] sm:$0xff] }
 0x5f9   :  { %2814 = vmatmul.bf16.gmra.mxu0 %v7686_v57  ;;  %2685 = vmatmul.bf16.gmra.mxu3 %v7687_v54 }
 0x5fb   :  { %v6848_v61 = vpop.f32.mrf.mxu2 }
 0x5fc   :  { %v2646_v3 = vpop.f32.mrf.mxu3 }
 0x5fd   :  { %v2906_v11 = vpop.f32.mrf.mxu1  ;;  %v6851_v15 = vadd.f32 %v2646_v3, %v2478_v1  ;;  %v7688_v3 = vld [vmem:[#allocation93_spill] sm:$0xff] }
 0x5fe   :  { %v2907_v41 = vadd.f32 %v2906_v11, %v6657_v7  ;;  %v2777_v35 = vpop.f32.mrf.mxu0 }
 0x5ff   :  { %v6855_v27 = vadd.f32 %v2777_v35, %v6663_v16  ;;  %v7689_v16 = vld [vmem:[#allocation114_spill] sm:$0xff] }
 0x600   :  { %v3056_v39 = vmax.f32 %v2907_v41, 0.0 }
 0x602   :  { %v3116_v59 = vpack.c.bf16 %v3056_v39, %v3055_v49 }
 0x603   :  { %v6859_v57 = vpop.f32.mrf.mxu2 }
 0x604   :  { %3236 = vmatmul.bf16.gmra.mxu2 %v3116_v59  ;;  %v2648_v25 = vpop.f32.mrf.mxu3 }
 0x605   :  { %v2909_v0 = vpop.f32.mrf.mxu1  ;;  %v6861_v54 = vadd.f32 %v2648_v25, %v2480_v5 }
 0x606   :  { %v2780_v1 = vpop.f32.mrf.mxu0  ;;  %v2910_v23 = vadd.f32 %v2909_v0, %v6666_v13  ;;  %v7692_v13 = vld [vmem:[#allocation116_spill] sm:$0xff] }
 0x607   :  { %v6864_v7 = vadd.f32 %v2780_v1, %v6676_v60 }
 0x608   :  { %2948 = vmatmul.bf16.gmra.mxu1 %v7688_v3  ;;  %v3057_v39 = vmax.f32 %v2910_v23, 0.0 }
 0x609   :  { %2819 = vmatmul.bf16.gmra.mxu0 %v7689_v16  ;;  %2690 = vmatmul.bf16.gmra.mxu3 %v7690_v31  ;;  %v7691_v16 = vld [vmem:[#allocation96_spill] sm:$0xff] }
 0x60b   :  { %v6869_v11 = vpop.f32.mrf.mxu2 }
 0x60d   :  { %v2911_v34 = vpop.f32.mrf.mxu1 }
 0x60e   :  { %v2912_v41 = vadd.f32 %v2911_v34, %v6679_v19  ;;  %v2782_v35 = vpop.f32.mrf.mxu0  ;;  %v7693_v19 = vld [vmem:[#allocation28_spill] sm:$0xff] }
 0x60f   :  { %v6874_v49 = vadd.f32 %v2782_v35, %v6685_v10 }
 0x610   :  { %v3058_v60 = vmax.f32 %v2912_v41, 0.0 }
 0x612   :  { %v3117_v59 = vpack.c.bf16 %v3058_v60, %v3057_v39 }
 0x613   :  { %v6876_v5 = vpop.f32.mrf.mxu2 }
 0x614   :  { %3241 = vmatmul.bf16.gmra.mxu2 %v3117_v59 }
 0x615   :  { %v2914_v25 = vpop.f32.mrf.mxu1 }
 0x616   :  { %v2785_v1 = vpop.f32.mrf.mxu0  ;;  %v2915_v10 = vadd.f32 %v2914_v25, %v6688_v40  ;;  %v7694_v40 = vld [vmem:[#allocation99_spill] sm:$0xff]  ;;  %v7695_v25 = vld [vmem:[#allocation118_spill] sm:$0xff] }
 0x617   :  { %v6879_v3 = vadd.f32 %v2785_v1, %v6704_v17 }
 0x618   :  { %2953 = vmatmul.bf16.gmra.mxu1 %v7691_v16  ;;  %v3059_v35 = vmax.f32 %v2915_v10, 0.0 }
 0x619   :  { %2824 = vmatmul.bf16.gmra.mxu0 %v7692_v13  ;;  %2695 = vmatmul.bf16.gmra.mxu3 %v7693_v19 }
 0x61b   :  { %v6885_v31 = vpop.f32.mrf.mxu2 }
 0x61d   :  { %v2916_v0 = vpop.f32.mrf.mxu1 }
 0x61e   :  { %v2917_v23 = vadd.f32 %v2916_v0, %v6707_v55  ;;  %v2787_v34 = vpop.f32.mrf.mxu0  ;;  %v7696_v55 = vld [vmem:[#allocation31_spill] sm:$0xff] }
 0x61f   :  { %v6889_v41 = vadd.f32 %v2787_v34, %v6716_v8 }
 0x620   :  { %v3060_v17 = vmax.f32 %v2917_v23, 0.0 }
 0x622   :  { %v3118_v39 = vpack.c.bf16 %v3060_v17, %v3059_v35 }
 0x623   :  { %v6891_v1 = vpop.f32.mrf.mxu2 }
 0x624   :  { %3246 = vmatmul.bf16.gmra.mxu2 %v3118_v39 }
 0x625   :  { %v2919_v60 = vpop.f32.mrf.mxu1 }
 0x626   :  { %v2790_v59 = vpop.f32.mrf.mxu0  ;;  %v2920_v8 = vadd.f32 %v2919_v60, %v6719_v14  ;;  %v7698_v14 = vld [vmem:[#allocation120_spill] sm:$0xff] }
 0x627   :  { %v6894_v16 = vadd.f32 %v2790_v59, %v6735_v51 }
 0x628   :  { %2958 = vmatmul.bf16.gmra.mxu1 %v7694_v40  ;;  %v3061_v23 = vmax.f32 %v2920_v8, 0.0  ;;  %v7697_v40 = vld [vmem:[#allocation102_spill] sm:$0xff] }
 0x629   :  { %2829 = vmatmul.bf16.gmra.mxu0 %v7695_v25  ;;  %2700 = vmatmul.bf16.gmra.mxu3 %v7696_v55 }
 0x62b   :  { %v6904_v35 = vpop.f32.mrf.mxu2 }
 0x62d   :  { %v2921_v13 = vpop.f32.mrf.mxu1 }
 0x62e   :  { %v2922_v19 = vadd.f32 %v2921_v13, %v6738_v44  ;;  %v2792_v10 = vpop.f32.mrf.mxu0  ;;  %v7699_v44 = vld [vmem:[#allocation34_spill] sm:$0xff] }
 0x62f   :  { %v6902_v0 = vadd.f32 %v2792_v10, %v6747_v32 }
 0x630   :  { %v3062_v34 = vmax.f32 %v2922_v19, 0.0 }
 0x632   :  { %v3119_v51 = vpack.c.bf16 %v3062_v34, %v3061_v23 }
 0x633   :  { %v6912_v60 = vpop.f32.mrf.mxu2 }
 0x634   :  { %3251 = vmatmul.bf16.gmra.mxu2 %v3119_v51 }
 0x635   :  { %v2924_v17 = vpop.f32.mrf.mxu1 }
 0x636   :  { %v2795_v39 = vpop.f32.mrf.mxu0  ;;  %v2925_v32 = vadd.f32 %v2924_v17, %v6750_v33 }
 0x637   :  { %v6907_v59 = vadd.f32 %v2795_v39, %v6760_v30 }
 0x638   :  { %2963 = vmatmul.bf16.gmra.mxu1 %v7697_v40  ;;  %v3063_v19 = vmax.f32 %v2925_v32, 0.0  ;;  %v7700_v40 = vld [vmem:[#allocation105_spill] sm:$0xff] }
 0x639   :  { %2834 = vmatmul.bf16.gmra.mxu0 %v7698_v14  ;;  %2705 = vmatmul.bf16.gmra.mxu3 %v7699_v44 }
 0x63b   :  { %v6919_v34 = vpop.f32.mrf.mxu2 }
 0x63d   :  { %v2926_v25 = vpop.f32.mrf.mxu1 }
 0x63e   :  { %v2927_v55 = vadd.f32 %v2926_v25, %v6763_v53  ;;  %v2797_v8 = vpop.f32.mrf.mxu0 }
 0x63f   :  { %v6917_v13 = vadd.f32 %v2797_v8, %v6769_v63 }
 0x640   :  { %v3064_v30 = vmax.f32 %v2927_v55, 0.0 }
 0x642   :  { %v3120_v10 = vpack.c.bf16 %v3064_v30, %v3063_v19  ;;  %v7701_v30 = vld [vmem:[#allocation107_spill] sm:$0xff] }
 0x643   :  { %v6928_v14 = vpop.f32.mrf.mxu2 }
 0x644   :  { %3256 = vmatmul.bf16.gmra.mxu2 %v3120_v10 }
 0x645   :  { %v2929_v23 = vpop.f32.mrf.mxu1 }
 0x646   :  { %v2800_v51 = vpop.f32.mrf.mxu0  ;;  %v2930_v33 = vadd.f32 %v2929_v23, %v6772_v20 }
 0x647   :  { %v6922_v39 = vadd.f32 %v2800_v51, %v6782_v62  ;;  %v6936_v62 = vld [vmem:[%s7336_s7] ss:$0 sm:$0xff] }
 0x648   :  { %2968 = vmatmul.bf16.gmra.mxu1 %v7700_v40  ;;  %v3065_v32 = vmax.f32 %v2930_v33, 0.0 }
 0x649   :  { %2839 = vmatmul.bf16.gmra.mxu0 %v6080_v38 }
 0x64d   :  { %v2931_v53 = vpop.f32.mrf.mxu1 }
 0x64e   :  { %v2932_v63 = vadd.f32 %v2931_v53, %v6786_v37  ;;  %v2802_v17 = vpop.f32.mrf.mxu0 }
 0x64f   :  { %v6931_v44 = vadd.f32 %v2802_v17, %v6792_v58 }
 0x650   :  { %v3066_v25 = vmax.f32 %v2932_v63, 0.0 }
 0x652   :  { %v3121_v55 = vpack.c.bf16 %v3066_v25, %v3065_v32 }
 0x654   :  { %3261 = vmatmul.bf16.gmra.mxu2 %v3121_v55 }
 0x655   :  { %v2934_v38 = vpop.f32.mrf.mxu1 }
 0x656   :  { %v2805_v20 = vpop.f32.mrf.mxu0  ;;  %v2935_v58 = vadd.f32 %v2934_v38, %v6795_v47 }
 0x657   :  { %v3222_v8 = vpop.f32.mrf.mxu2  ;;  %v6939_v37 = vadd.f32 %v2805_v20, %v6805_v45 }
 0x658   :  { %v3223_v19 = vadd.f32 %v6936_v62, %v3222_v8  ;;  %2973 = vmatmul.bf16.gmra.mxu1 %v7701_v30  ;;  %v3067_v33 = vmax.f32 %v2935_v58, 0.0 }
 0x659   :  { %2844 = vmatmul.bf16.gmra.mxu0 %v6104_v52 }
 0x65a   :  { %3382 = vst [vmem:[%s7337_s8] sm:$0xff] %v3223_v19 }
 0x65d   :  { %v2936_v10 = vpop.f32.mrf.mxu1 }
 0x65e   :  { %v2937_v23 = vadd.f32 %v2936_v10, %v6809_v6  ;;  %v2807_v51 = vpop.f32.mrf.mxu0 }
 0x65f   :  { %v3224_v40 = vpop.f32.mrf.mxu2  ;;  %v6950_v45 = vadd.f32 %v2807_v51, %v6815_v50  ;;  %v7702_v50 = vld [vmem:[#allocation109_spill] sm:$0xff] }
 0x660   :  { %v3068_v53 = vmax.f32 %v2937_v23, 0.0  ;;  %v3225_v63 = vadd.f32 %v6936_v62, %v3224_v40 }
 0x662   :  { %3383 = vst [vmem:[%s7337_s8 + $0x8] sm:$0xff] %v3225_v63  ;;  %v3122_v52 = vpack.c.bf16 %v3068_v53, %v3067_v33 }
 0x664   :  { %3266 = vmatmul.bf16.gmra.mxu2 %v3122_v52 }
 0x665   :  { %v2939_v17 = vpop.f32.mrf.mxu1 }
 0x666   :  { %v2810_v47 = vpop.f32.mrf.mxu0  ;;  %v2940_v55 = vadd.f32 %v2939_v17, %v6818_v21 }
 0x667   :  { %v3227_v32 = vpop.f32.mrf.mxu2  ;;  %v6957_v6 = vadd.f32 %v2810_v47, %v6828_v2 }
 0x668   :  { %v3228_v25 = vadd.f32 %v6936_v62, %v3227_v32  ;;  %2978 = vmatmul.bf16.gmra.mxu1 %v7702_v50  ;;  %v3069_v30 = vmax.f32 %v2940_v55, 0.0 }
 0x669   :  { %2849 = vmatmul.bf16.gmra.mxu0 %v6139_v48 }
 0x66a   :  { %3384 = vst [vmem:[%s7337_s8 + $0x10] sm:$0xff] %v3228_v25 }
 0x66d   :  { %v2941_v38 = vpop.f32.mrf.mxu1 }
 0x66e   :  { %v2942_v20 = vadd.f32 %v2941_v38, %v6832_v24  ;;  %v2812_v8 = vpop.f32.mrf.mxu0 }
 0x66f   :  { %v3229_v19 = vpop.f32.mrf.mxu2  ;;  %v6968_v2 = vadd.f32 %v2812_v8, %v6838_v42  ;;  %v7703_v42 = vld [vmem:[#allocation111_spill] sm:$0xff] }
 0x670   :  { %v3070_v58 = vmax.f32 %v2942_v20, 0.0  ;;  %v3230_v10 = vadd.f32 %v6936_v62, %v3229_v19 }
 0x672   :  { %3385 = vst [vmem:[%s7337_s8 + $0x18] sm:$0xff] %v3230_v10  ;;  %v3123_v48 = vpack.c.bf16 %v3070_v58, %v3069_v30 }
 0x674   :  { %3271 = vmatmul.bf16.gmra.mxu2 %v3123_v48 }
 0x675   :  { %v2944_v23 = vpop.f32.mrf.mxu1 }
 0x676   :  { %v2815_v21 = vpop.f32.mrf.mxu0  ;;  %v2945_v33 = vadd.f32 %v2944_v23, %v6841_v29 }
 0x677   :  { %v3232_v51 = vpop.f32.mrf.mxu2  ;;  %v6975_v24 = vadd.f32 %v2815_v21, %v6851_v15  ;;  %v7705_v21 = vld [vmem:[#allocation115_spill] sm:$0xff] }
 0x678   :  { %v3233_v40 = vadd.f32 %v6936_v62, %v3232_v51  ;;  %2983 = vmatmul.bf16.gmra.mxu1 %v7703_v42  ;;  %v3071_v47 = vmax.f32 %v2945_v33, 0.0 }
 0x679   :  { %2854 = vmatmul.bf16.gmra.mxu0 %v6178_v18 }
 0x67a   :  { %3386 = vst [vmem:[%s7337_s8 + $0x20] sm:$0xff] %v3233_v40 }
 0x67d   :  { %v2946_v53 = vpop.f32.mrf.mxu1 }
 0x67e   :  { %v2947_v63 = vadd.f32 %v2946_v53, %v6855_v27  ;;  %v2817_v52 = vpop.f32.mrf.mxu0  ;;  %v7704_v27 = vld [vmem:[#allocation113_spill] sm:$0xff] }
 0x67f   :  { %v3234_v17 = vpop.f32.mrf.mxu2  ;;  %v6986_v15 = vadd.f32 %v2817_v52, %v6861_v54 }
 0x680   :  { %v3072_v32 = vmax.f32 %v2947_v63, 0.0  ;;  %v3235_v25 = vadd.f32 %v6936_v62, %v3234_v17 }
 0x682   :  { %3387 = vst [vmem:[%s7337_s8 + $0x28] sm:$0xff] %v3235_v25  ;;  %v3124_v18 = vpack.c.bf16 %v3072_v32, %v3071_v47  ;;  %v7706_v47 = vld [vmem:[#allocation117_spill] sm:$0xff] }
 0x684   :  { %3276 = vmatmul.bf16.gmra.mxu2 %v3124_v18 }
 0x685   :  { %v2949_v50 = vpop.f32.mrf.mxu1 }
 0x686   :  { %v2950_v54 = vadd.f32 %v2949_v50, %v6864_v7 }
 0x687   :  { %v3237_v29 = vpop.f32.mrf.mxu2 }
 0x688   :  { %v3238_v55 = vadd.f32 %v6936_v62, %v3237_v29  ;;  %2988 = vmatmul.bf16.gmra.mxu1 %v7704_v27  ;;  %v3073_v19 = vmax.f32 %v2950_v54, 0.0 }
 0x689   :  { %2859 = vmatmul.bf16.gmra.mxu0 %v6207_v4 }
 0x68a   :  { %3388 = vst [vmem:[%s7337_s8 + $0x30] sm:$0xff] %v3238_v55 }
 0x68d   :  { %v2951_v38 = vpop.f32.mrf.mxu1 }
 0x68e   :  { %v2952_v20 = vadd.f32 %v2951_v38, %v6874_v49  ;;  %v7707_v38 = vld [vmem:[#allocation119_spill] sm:$0xff] }
 0x68f   :  { %v3239_v8 = vpop.f32.mrf.mxu2 }
 0x690   :  { %v3074_v30 = vmax.f32 %v2952_v20, 0.0  ;;  %v3240_v58 = vadd.f32 %v6936_v62, %v3239_v8 }
 0x692   :  { %3389 = vst [vmem:[%s7337_s8 + $0x38] sm:$0xff] %v3240_v58  ;;  %v3125_v10 = vpack.c.bf16 %v3074_v30, %v3073_v19 }
 0x694   :  { %3281 = vmatmul.bf16.gmra.mxu2 %v3125_v10 }
 0x695   :  { %v2954_v4 = vpop.f32.mrf.mxu1 }
 0x696   :  { %v2955_v7 = vadd.f32 %v2954_v4, %v6879_v3 }
 0x697   :  { %v3242_v48 = vpop.f32.mrf.mxu2 }
 0x698   :  { %v3243_v23 = vadd.f32 %v6936_v62, %v3242_v48  ;;  %2993 = vmatmul.bf16.gmra.mxu1 %v7705_v21  ;;  %v3075_v42 = vmax.f32 %v2955_v7, 0.0 }
 0x699   :  { %2864 = vmatmul.bf16.gmra.mxu0 %v6236_v56 }
 0x69a   :  { %3390 = vst [vmem:[%s7337_s8 + $0x40] sm:$0xff] %v3243_v23  ;;  %v7708_v23 = vld [vmem:[#allocation121_spill] sm:$0xff] }
 0x69d   :  { %v2956_v49 = vpop.f32.mrf.mxu1 }
 0x69e   :  { %v2957_v51 = vadd.f32 %v2956_v49, %v6889_v41 }
 0x69f   :  { %v3244_v40 = vpop.f32.mrf.mxu2 }
 0x6a0   :  { %v3076_v33 = vmax.f32 %v2957_v51, 0.0  ;;  %v3245_v53 = vadd.f32 %v6936_v62, %v3244_v40 }
 0x6a2   :  { %3391 = vst [vmem:[%s7337_s8 + $0x48] sm:$0xff] %v3245_v53  ;;  %v3126_v63 = vpack.c.bf16 %v3076_v33, %v3075_v42  ;;  %v7048_v42 = vpop.f32.mrf.mxu3  ;;  %v7053_v53 = vpop.f32.mrf.mxu0 }
 0x6a4   :  { %3286 = vmatmul.bf16.gmra.mxu2 %v3126_v63 }
 0x6a5   :  { %v2959_v56 = vpop.f32.mrf.mxu1 }
 0x6a6   :  { %v2960_v3 = vadd.f32 %v2959_v56, %v6894_v16 }
 0x6a7   :  { %v3247_v52 = vpop.f32.mrf.mxu2 }
 0x6a8   :  { %v3248_v17 = vadd.f32 %v6936_v62, %v3247_v52  ;;  %2998 = vmatmul.bf16.gmra.mxu1 %v7706_v47  ;;  %v3077_v18 = vmax.f32 %v2960_v3, 0.0 }
 0x6a9   :  { %2869 = vmatmul.bf16.gmra.mxu0 %v6263_v43 }
 0x6aa   :  { %3392 = vst [vmem:[%s7337_s8 + $0x50] sm:$0xff] %v3248_v17  ;;  %v2653_v52 = vpop.f32.mrf.mxu3  ;;  %v2822_v3 = vpop.f32.mrf.mxu0 }
 0x6ad   :  { %v2961_v41 = vpop.f32.mrf.mxu1 }
 0x6ae   :  { %v2962_v32 = vadd.f32 %v2961_v41, %v6902_v0 }
 0x6af   :  { %v3249_v25 = vpop.f32.mrf.mxu2 }
 0x6b0   :  { %v3078_v50 = vmax.f32 %v2962_v32, 0.0  ;;  %v3250_v29 = vadd.f32 %v6936_v62, %v3249_v25 }
 0x6b2   :  { %3393 = vst [vmem:[%s7337_s8 + $0x58] sm:$0xff] %v3250_v29  ;;  %v3127_v55 = vpack.c.bf16 %v3078_v50, %v3077_v18 }
 0x6b4   :  { %3291 = vmatmul.bf16.gmra.mxu2 %v3127_v55 }
 0x6b5   :  { %v2964_v43 = vpop.f32.mrf.mxu1 }
 0x6b6   :  { %v2965_v16 = vadd.f32 %v2964_v43, %v6907_v59  ;;  %v7066_v43 = vpop.f32.mrf.mxu3 }
 0x6b7   :  { %v3252_v27 = vpop.f32.mrf.mxu2 }
 0x6b8   :  { %v3253_v54 = vadd.f32 %v6936_v62, %v3252_v27  ;;  %3003 = vmatmul.bf16.gmra.mxu1 %v7707_v38  ;;  %v3079_v19 = vmax.f32 %v2965_v16, 0.0 }
 0x6b9   :  { %2874 = vmatmul.bf16.gmra.mxu0 %v6288_v12 }
 0x6ba   :  { %3394 = vst [vmem:[%s7337_s8 + $0x60] sm:$0xff] %v3253_v54 }
 0x6bd   :  { %v2966_v0 = vpop.f32.mrf.mxu1 }
 0x6be   :  { %v2967_v20 = vadd.f32 %v2966_v0, %v6917_v13 }
 0x6bf   :  { %v3254_v8 = vpop.f32.mrf.mxu2 }
 0x6c0   :  { %v3080_v30 = vmax.f32 %v2967_v20, 0.0  ;;  %v3255_v58 = vadd.f32 %v6936_v62, %v3254_v8  ;;  %v2658_v20 = vpop.f32.mrf.mxu3 }
 0x6c2   :  { %3395 = vst [vmem:[%s7337_s8 + $0x68] sm:$0xff] %v3255_v58  ;;  %v3128_v10 = vpack.c.bf16 %v3080_v30, %v3079_v19 }
 0x6c4   :  { %3296 = vmatmul.bf16.gmra.mxu2 %v3128_v10 }
 0x6c5   :  { %v2969_v12 = vpop.f32.mrf.mxu1 }
 0x6c6   :  { %v2970_v59 = vadd.f32 %v2969_v12, %v6922_v39 }
 0x6c7   :  { %v3257_v4 = vpop.f32.mrf.mxu2 }
 0x6c8   :  { %v3258_v48 = vadd.f32 %v6936_v62, %v3257_v4  ;;  %3008 = vmatmul.bf16.gmra.mxu1 %v7708_v23  ;;  %v3081_v49 = vmax.f32 %v2970_v59, 0.0  ;;  %v7710_v4 = vld [vmem:[#allocation123_spill] sm:$0xff] }
 0x6ca   :  { %3396 = vst [vmem:[%s7337_s8 + $0x70] sm:$0xff] %v3258_v48 }
 0x6cd   :  { %v2971_v13 = vpop.f32.mrf.mxu1 }
 0x6ce   :  { %v2972_v21 = vadd.f32 %v2971_v13, %v6931_v44  ;;  %v7709_v44 = vld [vmem:[#allocation122_spill] sm:$0xff] }
 0x6cf   :  { %v3259_v7 = vpop.f32.mrf.mxu2 }
 0x6d0   :  { %v3082_v51 = vmax.f32 %v2972_v21, 0.0  ;;  %v3260_v40 = vadd.f32 %v6936_v62, %v3259_v7 }
 0x6d2   :  { %3397 = vst [vmem:[%s7337_s8 + $0x78] sm:$0xff] %v3260_v40  ;;  %v3129_v33 = vpack.c.bf16 %v3082_v51, %v3081_v49 }
 0x6d4   :  { %3301 = vmatmul.bf16.gmra.mxu2 %v3129_v33 }
 0x6d5   :  { %v2974_v63 = vpop.f32.mrf.mxu1 }
 0x6d6   :  { %v2975_v17 = vadd.f32 %v2974_v63, %v6939_v37  ;;  %v7068_v37 = vpop.f32.mrf.mxu0 }
 0x6d7   :  { %v3262_v39 = vpop.f32.mrf.mxu2 }
 0x6d8   :  { %v3263_v56 = vadd.f32 %v6936_v62, %v3262_v39  ;;  %3013 = vmatmul.bf16.gmra.mxu1 %v7709_v44  ;;  %v3083_v25 = vmax.f32 %v2975_v17, 0.0  ;;  %v7712_v17 = vld [vmem:[#allocation9_spill] sm:$0xff] }
 0x6da   :  { %3398 = vst [vmem:[%s7337_s8 + $0x80] sm:$0xff] %v3263_v56 }
 0x6dd   :  { %v2976_v47 = vpop.f32.mrf.mxu1 }
 0x6de   :  { %v2977_v41 = vadd.f32 %v2976_v47, %v6950_v45  ;;  %v2827_v58 = vpop.f32.mrf.mxu0 }
 0x6df   :  { %v3264_v32 = vpop.f32.mrf.mxu2 }
 0x6e0   :  { %v3084_v18 = vmax.f32 %v2977_v41, 0.0  ;;  %v3265_v50 = vadd.f32 %v6936_v62, %v3264_v32 }
 0x6e2   :  { %3399 = vst [vmem:[%s7337_s8 + $0x88] sm:$0xff] %v3265_v50  ;;  %v3130_v29 = vpack.c.bf16 %v3084_v18, %v3083_v25  ;;  %v7713_v25 = vld [vmem:[#allocation124_spill] sm:$0xff] }
 0x6e4   :  { %3306 = vmatmul.bf16.gmra.mxu2 %v3130_v29 }
 0x6e5   :  { %v2979_v55 = vpop.f32.mrf.mxu1 }
 0x6e6   :  { %v2980_v45 = vadd.f32 %v2979_v55, %v6957_v6  ;;  %v7088_v48 = vpop.f32.mrf.mxu0 }
 0x6e7   :  { %v3267_v27 = vpop.f32.mrf.mxu2 }
 0x6e8   :  { %v3268_v54 = vadd.f32 %v6936_v62, %v3267_v27  ;;  %3018 = vmatmul.bf16.gmra.mxu1 %v6112_v46  ;;  %v3085_v8 = vmax.f32 %v2980_v45, 0.0 }
 0x6ea   :  { %3400 = vst [vmem:[%s7337_s8 + $0x90] sm:$0xff] %v3268_v54 }
 0x6ed   :  { %v2981_v38 = vpop.f32.mrf.mxu1 }
 0x6ee   :  { %v2982_v16 = vadd.f32 %v2981_v38, %v6968_v2  ;;  %v7083_v2 = vpop.f32.mrf.mxu3  ;;  %v2832_v39 = vpop.f32.mrf.mxu0 }
 0x6ef   :  { %v3269_v0 = vpop.f32.mrf.mxu2 }
 0x6f0   :  { %v3086_v19 = vmax.f32 %v2982_v16, 0.0  ;;  %v3270_v30 = vadd.f32 %v6936_v62, %v3269_v0 }
 0x6f2   :  { %3401 = vst [vmem:[%s7337_s8 + $0x98] sm:$0xff] %v3270_v30  ;;  %v3131_v46 = vpack.c.bf16 %v3086_v19, %v3085_v8 }
 0x6f4   :  { %3311 = vmatmul.bf16.gmra.mxu2 %v3131_v46 }
 0x6f5   :  { %v2984_v10 = vpop.f32.mrf.mxu1 }
 0x6f6   :  { %v2985_v23 = vadd.f32 %v2984_v10, %v6975_v24  ;;  %v2663_v33 = vpop.f32.mrf.mxu3  ;;  %v7099_v24 = vld [vmem:[%s7334_s5] ss:$0 sm:$0xff]  ;;  %v7114_v16 = vpop.f32.mrf.mxu0 }
 0x6f7   :  { %v3272_v12 = vpop.f32.mrf.mxu2  ;;  %v2485_v47 = vadd.f32 %v7099_v24, %v7712_v17  ;;  %v7715_v10 = vld [vmem:[#allocation50_spill] sm:$0xff] }
 0x6f8   :  { %v3273_v6 = vadd.f32 %v6936_v62, %v3272_v12  ;;  %3023 = vmatmul.bf16.gmra.mxu1 %v7710_v4  ;;  %v3087_v7 = vmax.f32 %v2985_v23, 0.0  ;;  %v2490_v12 = vadd.f32 %v7099_v24, %v7715_v10  ;;  %v7716_v23 = vld [vmem:[#allocation125_spill] sm:$0xff] }
 0x6f9   :  { %v2654_v50 = vadd.f32 %v2653_v52, %v2485_v47  ;;  %v7714_v52 = vld [vmem:[#allocation47_spill] sm:$0xff] }
 0x6fa   :  { %3402 = vst [vmem:[%s7337_s8 + $0xa0] sm:$0xff] %v3273_v6 }
 0x6fb   :  { %v2823_v55 = vadd.f32 %v2822_v3, %v2654_v50  ;;  %v2488_v3 = vadd.f32 %v7099_v24, %v7714_v52 }
 0x6fd   :  { %v2986_v59 = vpop.f32.mrf.mxu1  ;;  %v2657_v6 = vadd.f32 %v7066_v43, %v2488_v3 }
 0x6fe   :  { %v2987_v13 = vadd.f32 %v2986_v59, %v6986_v15  ;;  %v7711_v15 = vld [vmem:[#allocation44_spill] sm:$0xff]  ;;  %v7112_v54 = vpop.f32.mrf.mxu3  ;;  %v2837_v59 = vpop.f32.mrf.mxu0 }
 0x6ff   :  { %v3274_v21 = vpop.f32.mrf.mxu2  ;;  %v2483_v56 = vadd.f32 %v7099_v24, %v7711_v15 }
 0x700   :  { %v3088_v49 = vmax.f32 %v2987_v13, 0.0  ;;  %v3275_v51 = vadd.f32 %v6936_v62, %v3274_v21  ;;  %v2826_v13 = vadd.f32 %v7068_v37, %v2657_v6  ;;  %v2659_v21 = vadd.f32 %v2658_v20, %v2490_v12 }
 0x701   :  { %v2652_v41 = vadd.f32 %v7048_v42, %v2483_v56 }
 0x702   :  { %3403 = vst [vmem:[%s7337_s8 + $0xa8] sm:$0xff] %v3275_v51  ;;  %v3132_v40 = vpack.c.bf16 %v3088_v49, %v3087_v7  ;;  %v2828_v49 = vadd.f32 %v2827_v58, %v2659_v21 }
 0x703   :  { %v2821_v18 = vadd.f32 %v7053_v53, %v2652_v41  ;;  %v7717_v41 = vld [vmem:[#allocation12_spill] sm:$0xff] }
 0x704   :  { %3316 = vmatmul.bf16.gmra.mxu2 %v3132_v40  ;;  %v2493_v20 = vadd.f32 %v7099_v24, %v7717_v41 }
 0x705   :  { %v2989_v63 = vpop.f32.mrf.mxu1 }
 0x706   :  { %v2990_v29 = vadd.f32 %v2989_v63, %v2821_v18  ;;  %v2668_v46 = vpop.f32.mrf.mxu3  ;;  %v2840_v37 = vpop.f32.mrf.mxu0  ;;  %v2662_v18 = vadd.f32 %v7083_v2, %v2493_v20 }
 0x707   :  { %v3277_v44 = vpop.f32.mrf.mxu2 }
 0x708   :  { %v3278_v32 = vadd.f32 %v6936_v62, %v3277_v44  ;;  %3028 = vmatmul.bf16.gmra.mxu1 %v7713_v25  ;;  %v3089_v42 = vmax.f32 %v2990_v29, 0.0  ;;  %v7719_v29 = vld [vmem:[#allocation126_spill] sm:$0xff] }
 0x70a   :  { %3404 = vst [vmem:[%s7337_s8 + $0xb0] sm:$0xff] %v3278_v32  ;;  %v7718_v32 = vld [vmem:[#allocation11_spill] sm:$0xff] }
 0x70b   :  { %v2495_v25 = vadd.f32 %v7099_v24, %v7718_v32  ;;  %v7723_v32 = vld [vmem:[#allocation15_spill] sm:$0xff] }
 0x70d   :  { %v2991_v27 = vpop.f32.mrf.mxu1 }
 0x70e   :  { %v2992_v45 = vadd.f32 %v2991_v27, %v2823_v55  ;;  %v2671_v44 = vpop.f32.mrf.mxu3  ;;  %v2831_v55 = vadd.f32 %v7088_v48, %v2662_v18  ;;  %v2664_v27 = vadd.f32 %v2663_v33, %v2495_v25  ;;  %v7720_v33 = vld [vmem:[#allocation53_spill] sm:$0xff]  ;;  %v2505_v25 = vadd.f32 %v7099_v24, %v6790_v36 }
 0x70f   :  { %v3279_v38 = vpop.f32.mrf.mxu2  ;;  %v2498_v12 = vadd.f32 %v7099_v24, %v7720_v33  ;;  %v2510_v33 = vadd.f32 %v7099_v24, %v6813_v26 }
 0x710   :  { %v3090_v0 = vmax.f32 %v2992_v45, 0.0  ;;  %v3280_v8 = vadd.f32 %v6936_v62, %v3279_v38 }
 0x712   :  { %v3133_v19 = vpack.c.bf16 %v3090_v0, %v3089_v42  ;;  %3405 = vst [vmem:[%s7337_s8 + $0xb8] sm:$0xff] %v3280_v8  ;;  %v2833_v42 = vadd.f32 %v2832_v39, %v2664_v27  ;;  %v2842_v8 = vpop.f32.mrf.mxu0 }
 0x714   :  { %3321 = vmatmul.bf16.gmra.mxu2 %v3133_v19 }
 0x715   :  { %v2994_v53 = vpop.f32.mrf.mxu1 }
 0x716   :  { %v2995_v7 = vadd.f32 %v2994_v53, %v2826_v13  ;;  %v2673_v45 = vpop.f32.mrf.mxu3  ;;  %v2667_v13 = vadd.f32 %v7112_v54, %v2498_v12 }
 0x717   :  { %v3282_v30 = vpop.f32.mrf.mxu2  ;;  %v2674_v27 = vadd.f32 %v2673_v45, %v2505_v25  ;;  %v2508_v45 = vadd.f32 %v7099_v24, %v6802_v22 }
 0x718   :  { %v3283_v4 = vadd.f32 %v6936_v62, %v3282_v30  ;;  %3033 = vmatmul.bf16.gmra.mxu1 %v7716_v23  ;;  %v3091_v15 = vmax.f32 %v2995_v7, 0.0  ;;  %v7722_v7 = vld [vmem:[#allocation127_spill] sm:$0xff] }
 0x71a   :  { %3406 = vst [vmem:[%s7337_s8 + $0xc0] sm:$0xff] %v3283_v4  ;;  %v2845_v6 = vpop.f32.mrf.mxu0  ;;  %v7721_v4 = vld [vmem:[#allocation56_spill] sm:$0xff] }
 0x71b   :  { %v2500_v23 = vadd.f32 %v7099_v24, %v7721_v4 }
 0x71d   :  { %v2996_v51 = vpop.f32.mrf.mxu1 }
 0x71e   :  { %v2997_v40 = vadd.f32 %v2996_v51, %v2828_v49  ;;  %v2676_v10 = vpop.f32.mrf.mxu3  ;;  %v2836_v49 = vadd.f32 %v7114_v16, %v2667_v13  ;;  %v2669_v51 = vadd.f32 %v2668_v46, %v2500_v23  ;;  %v2503_v46 = vadd.f32 %v7099_v24, %v7723_v32 }
 0x71f   :  { %v3284_v63 = vpop.f32.mrf.mxu2  ;;  %v2677_v12 = vadd.f32 %v2676_v10, %v2508_v45 }
 0x720   :  { %v3092_v56 = vmax.f32 %v2997_v40, 0.0  ;;  %v3285_v43 = vadd.f32 %v6936_v62, %v3284_v63  ;;  %v2838_v63 = vadd.f32 %v2837_v59, %v2669_v51  ;;  %v2672_v18 = vadd.f32 %v2671_v44, %v2503_v46 }
 0x721   :  { %v2846_v4 = vadd.f32 %v2845_v6, %v2677_v12 }
 0x722   :  { %v3134_v17 = vpack.c.bf16 %v3092_v56, %v3091_v15  ;;  %3407 = vst [vmem:[%s7337_s8 + $0xc8] sm:$0xff] %v3285_v43  ;;  %v2847_v20 = vpop.f32.mrf.mxu0 }
 0x724   :  { %3326 = vmatmul.bf16.gmra.mxu2 %v3134_v17 }
 0x725   :  { %v2999_v47 = vpop.f32.mrf.mxu1 }
 0x726   :  { %v3000_v38 = vadd.f32 %v2999_v47, %v2831_v55  ;;  %v2678_v17 = vpop.f32.mrf.mxu3  ;;  %v2841_v55 = vadd.f32 %v2840_v37, %v2672_v18 }
 0x727   :  { %v3287_v58 = vpop.f32.mrf.mxu2  ;;  %v2679_v23 = vadd.f32 %v2678_v17, %v2510_v33 }
 0x728   :  { %v3288_v50 = vadd.f32 %v6936_v62, %v3287_v58  ;;  %3038 = vmatmul.bf16.gmra.mxu1 %v7719_v29  ;;  %v3093_v52 = vmax.f32 %v3000_v38, 0.0 }
 0x72a   :  { %3408 = vst [vmem:[%s7337_s8 + $0xd0] sm:$0xff] %v3288_v50  ;;  %v2850_v38 = vpop.f32.mrf.mxu0 }
 0x72d   :  { %v3001_v0 = vpop.f32.mrf.mxu1 }
 0x72e   :  { %v3002_v19 = vadd.f32 %v3001_v0, %v2833_v42  ;;  %v2681_v29 = vpop.f32.mrf.mxu3  ;;  %v2843_v0 = vadd.f32 %v2842_v8, %v2674_v27 }
 0x72f   :  { %v3289_v53 = vpop.f32.mrf.mxu2 }
 0x730   :  { %v3094_v2 = vmax.f32 %v3002_v19, 0.0  ;;  %v3290_v3 = vadd.f32 %v6936_v62, %v3289_v53 }
 0x732   :  { %v3135_v30 = vpack.c.bf16 %v3094_v2, %v3093_v52  ;;  %3409 = vst [vmem:[%s7337_s8 + $0xd8] sm:$0xff] %v3290_v3 }
 0x734   :  { %3331 = vmatmul.bf16.gmra.mxu2 %v3135_v30 }
 0x735   :  { %v3004_v48 = vpop.f32.mrf.mxu1 }
 0x736   :  { %v3005_v40 = vadd.f32 %v3004_v48, %v2836_v49  ;;  %v2683_v37 = vpop.f32.mrf.mxu3  ;;  %v2852_v48 = vpop.f32.mrf.mxu0 }
 0x737   :  { %v3292_v39 = vpop.f32.mrf.mxu2 }
 0x738   :  { %v3293_v21 = vadd.f32 %v6936_v62, %v3292_v39  ;;  %3043 = vmatmul.bf16.gmra.mxu1 %v7722_v7  ;;  %v3095_v47 = vmax.f32 %v3005_v40, 0.0 }
 0x73a   :  { %3410 = vst [vmem:[%s7337_s8 + $0xe0] sm:$0xff] %v3293_v21  ;;  %v2848_v21 = vadd.f32 %v2847_v20, %v2679_v23  ;;  %v2523_v23 = vadd.f32 %v7099_v24, %v6869_v11 }
 0x73d   :  { %v3006_v15 = vpop.f32.mrf.mxu1 }
 0x73e   :  { %v3007_v56 = vadd.f32 %v3006_v15, %v2838_v63  ;;  %v2686_v49 = vpop.f32.mrf.mxu3  ;;  %v2855_v22 = vpop.f32.mrf.mxu0 }
 0x73f   :  { %v3294_v43 = vpop.f32.mrf.mxu2 }
 0x740   :  { %v3096_v41 = vmax.f32 %v3007_v56, 0.0  ;;  %v3295_v54 = vadd.f32 %v6936_v62, %v3294_v43  ;;  %v2513_v56 = vadd.f32 %v7099_v24, %v6825_v9 }
 0x742   :  { %v3136_v58 = vpack.c.bf16 %v3096_v41, %v3095_v47  ;;  %3411 = vst [vmem:[%s7337_s8 + $0xe8] sm:$0xff] %v3295_v54  ;;  %v2515_v47 = vadd.f32 %v7099_v24, %v6836_v28  ;;  %v2682_v41 = vadd.f32 %v2681_v29, %v2513_v56 }
 0x744   :  { %3336 = vmatmul.bf16.gmra.mxu2 %v3136_v58  ;;  %v2851_v58 = vadd.f32 %v2850_v38, %v2682_v41 }
 0x745   :  { %v3009_v16 = vpop.f32.mrf.mxu1 }
 0x746   :  { %v3010_v42 = vadd.f32 %v3009_v16, %v2841_v55  ;;  %v2688_v17 = vpop.f32.mrf.mxu3  ;;  %v2857_v20 = vpop.f32.mrf.mxu0  ;;  %v2684_v16 = vadd.f32 %v2683_v37, %v2515_v47 }
 0x747   :  { %v3297_v59 = vpop.f32.mrf.mxu2 }
 0x748   :  { %v3298_v50 = vadd.f32 %v6936_v62, %v3297_v59  ;;  %v3097_v2 = vmax.f32 %v3010_v42, 0.0  ;;  %v2853_v46 = vadd.f32 %v2852_v48, %v2684_v16  ;;  %v2518_v42 = vadd.f32 %v7099_v24, %v6848_v61 }
 0x74a   :  { %3412 = vst [vmem:[%s7337_s8 + $0xf0] sm:$0xff] %v3298_v50 }
 0x74d   :  { %v3011_v19 = vpop.f32.mrf.mxu1 }
 0x74e   :  { %v3012_v53 = vadd.f32 %v3011_v19, %v2843_v0  ;;  %v2691_v28 = vpop.f32.mrf.mxu3  ;;  %v2860_v27 = vpop.f32.mrf.mxu0  ;;  %v2520_v19 = vadd.f32 %v7099_v24, %v6859_v57 }
 0x74f   :  { %v3299_v52 = vpop.f32.mrf.mxu2 }
 0x750   :  { %v3098_v3 = vmax.f32 %v3012_v53, 0.0  ;;  %v3300_v36 = vadd.f32 %v6936_v62, %v3299_v52  ;;  %v2687_v53 = vadd.f32 %v2686_v49, %v2518_v42  ;;  %v2692_v49 = vadd.f32 %v2691_v28, %v2523_v23 }
 0x751   :  { %v2538_v23 = vadd.f32 %v7099_v24, %v6919_v34 }
 0x752   :  { %v3137_v44 = vpack.c.bf16 %v3098_v3, %v3097_v2  ;;  %3413 = vst [vmem:[%s7337_s8 + $0xf8] sm:$0xff] %v3300_v36  ;;  %v2856_v2 = vadd.f32 %v2855_v22, %v2687_v53  ;;  %v2689_v3 = vadd.f32 %v2688_v17, %v2520_v19  ;;  %v2533_v53 = vadd.f32 %v7099_v24, %v6904_v35 }
 0x754   :  { %3341 = vmatmul.bf16.gmra.mxu2 %v3137_v44  ;;  %v2858_v37 = vadd.f32 %v2857_v20, %v2689_v3 }
 0x755   :  { %v3014_v30 = vpop.f32.mrf.mxu1 }
 0x756   :  { %v3015_v13 = vadd.f32 %v3014_v30, %v2846_v4  ;;  %v2693_v36 = vpop.f32.mrf.mxu3  ;;  %v2862_v48 = vpop.f32.mrf.mxu0 }
 0x757   :  { %v3302_v8 = vpop.f32.mrf.mxu2 }
 0x758   :  { %v3303_v39 = vadd.f32 %v6936_v62, %v3302_v8  ;;  %v3099_v63 = vmax.f32 %v3015_v13, 0.0 }
 0x75a   :  { %3414 = vst [vmem:[%s7337_s8 + $0x100] sm:$0xff] %v3303_v39 }
 0x75d   :  { %v3016_v7 = vpop.f32.mrf.mxu1 }
 0x75e   :  { %v3017_v51 = vadd.f32 %v3016_v7, %v2848_v21  ;;  %v2696_v4 = vpop.f32.mrf.mxu3  ;;  %v2865_v21 = vpop.f32.mrf.mxu0  ;;  %v2525_v7 = vadd.f32 %v7099_v24, %v6876_v5 }
 0x75f   :  { %v3304_v40 = vpop.f32.mrf.mxu2 }
 0x760   :  { %v3100_v15 = vmax.f32 %v3017_v51, 0.0  ;;  %v3305_v26 = vadd.f32 %v6936_v62, %v3304_v40  ;;  %v2861_v40 = vadd.f32 %v2860_v27, %v2692_v49  ;;  %v2694_v22 = vadd.f32 %v2693_v36, %v2525_v7 }
 0x761   :  { %v2540_v7 = vadd.f32 %v7099_v24, %v6928_v14 }
 0x762   :  { %v3138_v10 = vpack.c.bf16 %v3100_v15, %v3099_v63  ;;  %3415 = vst [vmem:[%s7337_s8 + $0x108] sm:$0xff] %v3305_v26  ;;  %v2863_v15 = vadd.f32 %v2862_v48, %v2694_v22 }
 0x764   :  { %3346 = vmatmul.bf16.gmra.mxu2 %v3138_v10 }
 0x765   :  { %v3019_v6 = vpop.f32.mrf.mxu1 }
 0x766   :  { %v3020_v32 = vadd.f32 %v3019_v6, %v2851_v58  ;;  %v2698_v11 = vpop.f32.mrf.mxu3  ;;  %v2867_v5 = vpop.f32.mrf.mxu0  ;;  %v2530_v58 = vadd.f32 %v7099_v24, %v6891_v1 }
 0x767   :  { %v3307_v43 = vpop.f32.mrf.mxu2 }
 0x768   :  { %v3308_v54 = vadd.f32 %v6936_v62, %v3307_v43  ;;  %v3101_v18 = vmax.f32 %v3020_v32, 0.0 }
 0x76a   :  { %3416 = vst [vmem:[%s7337_s8 + $0x110] sm:$0xff] %v3308_v54  ;;  %v2528_v54 = vadd.f32 %v7099_v24, %v6885_v31 }
 0x76c   :  { %v2697_v16 = vadd.f32 %v2696_v4, %v2528_v54 }
 0x76d   :  { %v3021_v59 = vpop.f32.mrf.mxu1 }
 0x76e   :  { %v3022_v25 = vadd.f32 %v3021_v59, %v2853_v46  ;;  %v2701_v46 = vpop.f32.mrf.mxu3  ;;  %v2866_v59 = vadd.f32 %v2865_v21, %v2697_v16 }
 0x76f   :  { %v3309_v9 = vpop.f32.mrf.mxu2  ;;  %v2702_v3 = vadd.f32 %v2701_v46, %v2533_v53 }
 0x770   :  { %v3102_v50 = vmax.f32 %v3022_v25, 0.0  ;;  %v3310_v55 = vadd.f32 %v6936_v62, %v3309_v9  ;;  %v2699_v25 = vadd.f32 %v2698_v11, %v2530_v58  ;;  %v2870_v9 = vpop.f32.mrf.mxu0 }
 0x772   :  { %v3139_v29 = vpack.c.bf16 %v3102_v50, %v3101_v18  ;;  %3417 = vst [vmem:[%s7337_s8 + $0x118] sm:$0xff] %v3310_v55  ;;  %v2868_v50 = vadd.f32 %v2867_v5, %v2699_v25 }
 0x774   :  { %3351 = vmatmul.bf16.gmra.mxu2 %v3139_v29 }
 0x775   :  { %v3024_v38 = vpop.f32.mrf.mxu1 }
 0x776   :  { %v3025_v44 = vadd.f32 %v3024_v38, %v2856_v2  ;;  %v2703_v42 = vpop.f32.mrf.mxu3  ;;  %v2535_v2 = vadd.f32 %v7099_v24, %v6912_v60 }
 0x777   :  { %v3312_v0 = vpop.f32.mrf.mxu2 }
 0x778   :  { %v3313_v52 = vadd.f32 %v6936_v62, %v3312_v0  ;;  %v3103_v8 = vmax.f32 %v3025_v44, 0.0  ;;  %v2872_v19 = vpop.f32.mrf.mxu0  ;;  %v2871_v44 = vadd.f32 %v2870_v9, %v2702_v3 }
 0x77a   :  { %3418 = vst [vmem:[%s7337_s8 + $0x120] sm:$0xff] %v3313_v52 }
 0x77d   :  { %v3026_v30 = vpop.f32.mrf.mxu1 }
 0x77e   :  { %v3027_v45 = vadd.f32 %v3026_v30, %v2858_v37  ;;  %v2704_v37 = vadd.f32 %v2703_v42, %v2535_v2  ;;  %v4389_v42 = vld [vmem:[%s7336_s7] ss:$0 sm:$0xff] }
 0x77f   :  { %v3314_v61 = vpop.f32.mrf.mxu2 }
 0x780   :  { %v3104_v33 = vmax.f32 %v3027_v45, 0.0  ;;  %v3315_v57 = vadd.f32 %v6936_v62, %v3314_v61  ;;  %v2873_v48 = vadd.f32 %v2872_v19, %v2704_v37  ;;  %v2706_v61 = vpop.f32.mrf.mxu3  ;;  %v2875_v35 = vpop.f32.mrf.mxu0 }
 0x781   :  { %v2707_v49 = vadd.f32 %v2706_v61, %v2538_v23 }
 0x782   :  { %v3140_v12 = vpack.c.bf16 %v3104_v33, %v3103_v8  ;;  %3419 = vst [vmem:[%s7337_s8 + $0x128] sm:$0xff] %v3315_v57 }
 0x783   :  { %v2876_v22 = vadd.f32 %v2875_v35, %v2707_v49 }
 0x784   :  { %3356 = vmatmul.bf16.gmra.mxu2 %v3140_v12 }
 0x785   :  { %v3029_v39 = vpop.f32.mrf.mxu1 }
 0x786   :  { %v3030_v63 = vadd.f32 %v3029_v39, %v2861_v40 }
 0x787   :  { %v3317_v13 = vpop.f32.mrf.mxu2 }
 0x788   :  { %v3318_v51 = vadd.f32 %v6936_v62, %v3317_v13  ;;  %v3105_v56 = vmax.f32 %v3030_v63, 0.0  ;;  %v2708_v21 = vpop.f32.mrf.mxu3  ;;  %v2877_v40 = vpop.f32.mrf.mxu0 }
 0x789   :  { %v2709_v63 = vadd.f32 %v2708_v21, %v2540_v7 }
 0x78a   :  { %3420 = vst [vmem:[%s7337_s8 + $0x130] sm:$0xff] %v3318_v51 }
 0x78d   :  { %v3031_v26 = vpop.f32.mrf.mxu1 }
 0x78e   :  { %v3032_v10 = vadd.f32 %v3031_v26, %v2863_v15  ;;  %v2878_v26 = vadd.f32 %v2877_v40, %v2709_v63 }
 0x78f   :  { %v3319_v6 = vpop.f32.mrf.mxu2 }
 0x790   :  { %v3106_v43 = vmax.f32 %v3032_v10, 0.0  ;;  %v3320_v17 = vadd.f32 %v6936_v62, %v3319_v6 }
 0x792   :  { %v3141_v47 = vpack.c.bf16 %v3106_v43, %v3105_v56  ;;  %3421 = vst [vmem:[%s7337_s8 + $0x138] sm:$0xff] %v3320_v17 }
 0x794   :  { %3361 = vmatmul.bf16.gmra.mxu2 %v3141_v47 }
 0x795   :  { %v3034_v41 = vpop.f32.mrf.mxu1 }
 0x796   :  { %v3035_v18 = vadd.f32 %v3034_v41, %v2866_v59 }
 0x797   :  { %v3322_v20 = vpop.f32.mrf.mxu2 }
 0x798   :  { %v3323_v32 = vadd.f32 %v6936_v62, %v3322_v20  ;;  %v3107_v29 = vmax.f32 %v3035_v18, 0.0 }
 0x79a   :  { %3422 = vst [vmem:[%s7337_s8 + $0x140] sm:$0xff] %v3323_v32 }
 0x79d   :  { %v3036_v55 = vpop.f32.mrf.mxu1 }
 0x79e   :  { %v3037_v28 = vadd.f32 %v3036_v55, %v2868_v50 }
 0x79f   :  { %v3324_v31 = vpop.f32.mrf.mxu2 }
 0x7a0   :  { %v3108_v27 = vmax.f32 %v3037_v28, 0.0  ;;  %v3325_v1 = vadd.f32 %v6936_v62, %v3324_v31 }
 0x7a2   :  { %v3142_v38 = vpack.c.bf16 %v3108_v27, %v3107_v29  ;;  %3423 = vst [vmem:[%s7337_s8 + $0x148] sm:$0xff] %v3325_v1 }
 0x7a4   :  { %3366 = vmatmul.bf16.gmra.mxu2 %v3142_v38 }
 0x7a5   :  { %v3039_v0 = vpop.f32.mrf.mxu1 }
 0x7a6   :  { %v3040_v30 = vadd.f32 %v3039_v0, %v2871_v44 }
 0x7a7   :  { %v3327_v52 = vpop.f32.mrf.mxu2 }
 0x7a8   :  { %v3328_v36 = vadd.f32 %v6936_v62, %v3327_v52  ;;  %v3109_v57 = vmax.f32 %v3040_v30, 0.0 }
 0x7aa   :  { %3424 = vst [vmem:[%s7337_s8 + $0x150] sm:$0xff] %v3328_v36 }
 0x7ad   :  { %v3041_v45 = vpop.f32.mrf.mxu1 }
 0x7ae   :  { %v3042_v8 = vadd.f32 %v3041_v45, %v2873_v48 }
 0x7af   :  { %v3329_v33 = vpop.f32.mrf.mxu2 }
 0x7b0   :  { %v3110_v12 = vmax.f32 %v3042_v8, 0.0  ;;  %v3330_v60 = vadd.f32 %v6936_v62, %v3329_v33 }
 0x7b2   :  { %v3143_v39 = vpack.c.bf16 %v3110_v12, %v3109_v57  ;;  %3425 = vst [vmem:[%s7337_s8 + $0x158] sm:$0xff] %v3330_v60 }
 0x7b4   :  { %3371 = vmatmul.bf16.gmra.mxu2 %v3143_v39 }
 0x7b5   :  { %v3044_v4 = vpop.f32.mrf.mxu1 }
 0x7b6   :  { %v3045_v15 = vadd.f32 %v3044_v4, %v2876_v22 }
 0x7b7   :  { %v3332_v13 = vpop.f32.mrf.mxu2 }
 0x7b8   :  { %v3333_v51 = vadd.f32 %v6936_v62, %v3332_v13  ;;  %v3111_v11 = vmax.f32 %v3045_v15, 0.0 }
 0x7ba   :  { %3426 = vst [vmem:[%s7337_s8 + $0x160] sm:$0xff] %v3333_v51 }
 0x7bd   :  { %v3046_v10 = vpop.f32.mrf.mxu1 }
 0x7be   :  { %v3047_v6 = vadd.f32 %v3046_v10, %v2878_v26 }
 0x7bf   :  { %v3334_v34 = vpop.f32.mrf.mxu2 }
 0x7c0   :  { %v3112_v56 = vmax.f32 %v3047_v6, 0.0  ;;  %v3335_v43 = vadd.f32 %v6936_v62, %v3334_v34 }
 0x7c2   :  { %v3144_v14 = vpack.c.bf16 %v3112_v56, %v3111_v11  ;;  %3427 = vst [vmem:[%s7337_s8 + $0x168] sm:$0xff] %v3335_v43 }
 0x7c4   :  { %3376 = vmatmul.bf16.gmra.mxu2 %v3144_v14 }
 0x7c7   :  { %v3337_v24 = vpop.f32.mrf.mxu2 }
 0x7c8   :  { %v3338_v17 = vadd.f32 %v6936_v62, %v3337_v24 }
 0x7ca   :  { %3428 = vst [vmem:[%s7337_s8 + $0x170] sm:$0xff] %v3338_v17 }
 0x7cf   :  { %v3339_v5 = vpop.f32.mrf.mxu2 }
 0x7d0   :  { %v3340_v47 = vadd.f32 %v6936_v62, %v3339_v5 }
 0x7d2   :  { %3429 = vst [vmem:[%s7337_s8 + $0x178] sm:$0xff] %v3340_v47 }
 0x7d7   :  { %v3342_v41 = vpop.f32.mrf.mxu2 }
 0x7d8   :  { %v3343_v54 = vadd.f32 %v6936_v62, %v3342_v41 }
 0x7da   :  { %3430 = vst [vmem:[%s7337_s8 + $0x180] sm:$0xff] %v3343_v54 }
 0x7df   :  { %v3344_v20 = vpop.f32.mrf.mxu2 }
 0x7e0   :  { %v3345_v58 = vadd.f32 %v6936_v62, %v3344_v20 }
 0x7e2   :  { %3431 = vst [vmem:[%s7337_s8 + $0x188] sm:$0xff] %v3345_v58 }
 0x7e7   :  { %v3347_v16 = vpop.f32.mrf.mxu2 }
 0x7e8   :  { %v3348_v32 = vadd.f32 %v6936_v62, %v3347_v16 }
 0x7ea   :  { %3432 = vst [vmem:[%s7337_s8 + $0x190] sm:$0xff] %v3348_v32 }
 0x7ef   :  { %v3349_v46 = vpop.f32.mrf.mxu2 }
 0x7f0   :  { %v3350_v59 = vadd.f32 %v6936_v62, %v3349_v46 }
 0x7f2   :  { %3433 = vst [vmem:[%s7337_s8 + $0x198] sm:$0xff] %v3350_v59 }
 0x7f7   :  { %v3352_v25 = vpop.f32.mrf.mxu2 }
 0x7f8   :  { %v3353_v9 = vadd.f32 %v6936_v62, %v3352_v25 }
 0x7fa   :  { %3434 = vst [vmem:[%s7337_s8 + $0x1a0] sm:$0xff] %v3353_v9 }
 0x7ff   :  { %v3354_v18 = vpop.f32.mrf.mxu2 }
 0x800   :  { %v3355_v50 = vadd.f32 %v6936_v62, %v3354_v18 }
 0x802   :  { %3435 = vst [vmem:[%s7337_s8 + $0x1a8] sm:$0xff] %v3355_v50 }
 0x807   :  { %v3357_v55 = vpop.f32.mrf.mxu2 }
 0x808   :  { %v3358_v28 = vadd.f32 %v6936_v62, %v3357_v55 }
 0x80a   :  { %3436 = vst [vmem:[%s7337_s8 + $0x1b0] sm:$0xff] %v3358_v28 }
 0x80f   :  { %v3359_v31 = vpop.f32.mrf.mxu2 }
 0x810   :  { %v3360_v29 = vadd.f32 %v6936_v62, %v3359_v31 }
 0x812   :  { %3437 = vst [vmem:[%s7337_s8 + $0x1b8] sm:$0xff] %v3360_v29 }
 0x817   :  { %v3362_v27 = vpop.f32.mrf.mxu2 }
 0x818   :  { %v3363_v1 = vadd.f32 %v6936_v62, %v3362_v27 }
 0x81a   :  { %3438 = vst [vmem:[%s7337_s8 + $0x1c0] sm:$0xff] %v3363_v1 }
 0x81f   :  { %v3364_v38 = vpop.f32.mrf.mxu2 }
 0x820   :  { %v3365_v0 = vadd.f32 %v4389_v42, %v3364_v38 }
 0x822   :  { %3439 = vst [vmem:[%s7337_s8 + $0x1c8] sm:$0xff] %v3365_v0 }
 0x827   :  { %v3367_v19 = vpop.f32.mrf.mxu2 }
 0x828   :  { %v3368_v53 = vadd.f32 %v4389_v42, %v3367_v19 }
 0x82a   :  { %3440 = vst [vmem:[%s7337_s8 + $0x1d0] sm:$0xff] %v3368_v53 }
 0x82f   :  { %v3369_v62 = vpop.f32.mrf.mxu2 }
 0x830   :  { %v3370_v52 = vadd.f32 %v4389_v42, %v3369_v62 }
 0x832   :  { %3441 = vst [vmem:[%s7337_s8 + $0x1d8] sm:$0xff] %v3370_v52 }
 0x837   :  { %v3372_v2 = vpop.f32.mrf.mxu2 }
 0x838   :  { %v3373_v3 = vadd.f32 %v4389_v42, %v3372_v2 }
 0x83a   :  { %3442 = vst [vmem:[%s7337_s8 + $0x1e0] sm:$0xff] %v3373_v3 }
 0x83f   :  { %v3374_v36 = vpop.f32.mrf.mxu2 }
 0x840   :  { %v3375_v44 = vadd.f32 %v4389_v42, %v3374_v36 }
 0x842   :  { %3443 = vst [vmem:[%s7337_s8 + $0x1e8] sm:$0xff] %v3375_v44 }
 0x847   :  { %v3377_v37 = vpop.f32.mrf.mxu2 }
 0x848   :  { %v3378_v30 = vadd.f32 %v4389_v42, %v3377_v37 }
 0x84a   :  { %3444 = vst [vmem:[%s7337_s8 + $0x1f0] sm:$0xff] %v3378_v30 }
 0x84f   :  { %v3379_v48 = vpop.f32.mrf.mxu2 }
 0x850   :  { %v3380_v45 = vadd.f32 %v4389_v42, %v3379_v48 }
 0x852   :  { %3445 = vst [vmem:[%s7337_s8 + $0x1f8] sm:$0xff] %v3380_v45 }

</bundles_post_ra>
